<compile_context>
chip_gen: v7x
topology: tpu7x:2x2x1
jax: 0.10.0
libtpu: 0.0.40
codegen_flags: <defaults>
</compile_context>

<pallas_src>
import functools
import numpy as np
import jax
import jax.numpy as jnp
from jax.experimental import pallas as pl
from jax.experimental.pallas import tpu as pltpu


# ----------------------------------------------------------------------------
# Tiling heuristics
# ----------------------------------------------------------------------------
def _pick_batch_tile(B):
    # Largest batch tile that still leaves >=2 grid steps (lets both
    # TensorCores of a dual-TC chip pick up work via "parallel" semantics).
    for bt in (8, 4, 2, 1):
        if B % bt == 0 and B // bt >= 2:
            return bt
    return B  # B == 1


def _pick_row_chunk(H, W, Cin, Cout, bt, budget_bytes=1 << 20):
    # Largest even divisor of H whose im2col patch / accumulator footprint
    # stays under ~1 MiB (keeps spills bounded); fall back to 2.
    for th in range(H, 1, -1):
        if H % th == 0 and th % 2 == 0:
            if bt * th * W * max(Cout, 9 * Cin) * 4 <= budget_bytes:
                return th
    return 2


def _pick_fc_tk(K):
    for tk in (2048, 1024, 512, 256, 128):
        if K % tk == 0:
            return tk
    return K


# ----------------------------------------------------------------------------
# Shared conv-block helpers (run inside the kernels)
# ----------------------------------------------------------------------------
def _write_padded(xpad_ref, x_ref, Bt, H, W, Cin):
    # padding=1 done in VMEM: zero the 1-pixel halo, then place the interior.
    zrow = jnp.zeros((Bt, 1, W + 2, Cin), jnp.float32)
    zcol = jnp.zeros((Bt, H, 1, Cin), jnp.float32)
    xpad_ref[:, 0:1, :, :] = zrow
    xpad_ref[:, H + 1:H + 2, :, :] = zrow
    xpad_ref[:, 1:H + 1, 0:1, :] = zcol
    xpad_ref[:, 1:H + 1, W + 1:W + 2, :] = zcol
    xpad_ref[:, 1:H + 1, 1:W + 1, :] = x_ref[...]


def _pool_and_store(o_ref, y, r0, Bt, TH, W, Cout):
    # 2x2 max-pool, stride 2; channels stay on the 128-lane axis.
    # y: (Bt*TH, W, Cout)
    n2 = Bt * TH // 2
    y = jnp.max(y.reshape(n2, 2, W, Cout), axis=1)
    y = jnp.max(y.reshape(n2, W // 2, 2, Cout), axis=2)
    o_ref[:, r0 // 2:(r0 + TH) // 2, :, :] = y.reshape(Bt, TH // 2, W // 2, Cout)


# ----------------------------------------------------------------------------
# Conv block kernels: 3x3 conv (pad=1) + folded BN + ReLU + 2x2 maxpool
# ----------------------------------------------------------------------------
def conv1_block_kernel(x_ref, w_ref, b_ref, o_ref, xpad_ref, *,
                       Bt, H, W, Cout, TH):
    # Cin == 1 (first block): a K=1 MXU contraction would waste the MXU, so do
    # the 3x3 conv as 9 shifted VPU multiply-adds broadcast over Cout lanes.
    # x_ref: (Bt, H, W, 1); w_ref: (9, Cout); b_ref: (1, Cout)
    _write_padded(xpad_ref, x_ref, Bt, H, W, 1)
    wmat = w_ref[...]          # (9, Cout)
    bias = b_ref[...]          # (1, Cout)
    for r0 in range(0, H, TH):
        acc = jnp.zeros((Bt, TH, W, Cout), jnp.float32)
        for kh in range(3):
            for kw in range(3):
                t = kh * 3 + kw
                xs = xpad_ref[:, r0 + kh:r0 + kh + TH, kw:kw + W, :]  # (Bt,TH,W,1)
                acc = acc + xs * wmat[t:t + 1, :]                      # -> (...,Cout)
        y = jnp.maximum(acc + bias, 0.0)
        _pool_and_store(o_ref, y.reshape(Bt * TH, W, Cout), r0, Bt, TH, W, Cout)


def convN_block_kernel(x_ref, w_ref, b_ref, o_ref, xpad_ref, patch_ref, *,
                       Bt, H, W, Cin, Cout, TH):
    # General block: im2col in VMEM, then ONE large-K MXU dot per row chunk.
    # x_ref: (Bt, H, W, Cin); w_ref: (9*Cin, Cout); b_ref: (1, Cout)
    # patch_ref: (Bt*TH*W, 9*Cin) VMEM scratch
    _write_padded(xpad_ref, x_ref, Bt, H, W, Cin)
    bias = b_ref[...]
    n = Bt * TH * W
    for r0 in range(0, H, TH):
        for kh in range(3):
            for kw in range(3):
                t = kh * 3 + kw
                patch_ref[:, t * Cin:(t + 1) * Cin] = (
                    xpad_ref[:, r0 + kh:r0 + kh + TH, kw:kw + W, :]
                    .reshape(n, Cin))
        y = jnp.dot(patch_ref[...], w_ref[...],
                    preferred_element_type=jnp.float32)        # (n, Cout), K=9*Cin
        y = jnp.maximum(y + bias, 0.0).reshape(Bt * TH, W, Cout)
        _pool_and_store(o_ref, y, r0, Bt, TH, W, Cout)


def conv_block(x_nhwc, w, b):
    # x_nhwc: (B, H, W, Cin); w: (9*Cin, Cout); b: (1, Cout)
    B, H, W, Cin = x_nhwc.shape
    Cout = w.shape[-1]
    assert H % 2 == 0 and W % 2 == 0
    bt = _pick_batch_tile(B)
    th = _pick_row_chunk(H, W, Cin, Cout, bt)

    scratch = [pltpu.VMEM((bt, H + 2, W + 2, Cin), jnp.float32)]
    if Cin == 1:
        kernel = functools.partial(conv1_block_kernel, Bt=bt, H=H, W=W,
                                   Cout=Cout, TH=th)
    else:
        kernel = functools.partial(convN_block_kernel, Bt=bt, H=H, W=W,
                                   Cin=Cin, Cout=Cout, TH=th)
        scratch.append(pltpu.VMEM((bt * th * W, 9 * Cin), jnp.float32))

    return pl.pallas_call(
        kernel,
        out_shape=jax.ShapeDtypeStruct((B, H // 2, W // 2, Cout), jnp.float32),
        grid_spec=pltpu.PrefetchScalarGridSpec(
            num_scalar_prefetch=0,
            grid=(B // bt,),
            in_specs=[
                pl.BlockSpec((bt, H, W, Cin), lambda i: (i, 0, 0, 0)),
                pl.BlockSpec((9 * Cin, Cout), lambda i: (0, 0)),
                pl.BlockSpec((1, Cout), lambda i: (0, 0)),
            ],
            out_specs=pl.BlockSpec((bt, H // 2, W // 2, Cout),
                                   lambda i: (i, 0, 0, 0)),
            scratch_shapes=scratch,
        ),
        compiler_params=pltpu.CompilerParams(
            dimension_semantics=("parallel",)),
    )(x_nhwc, w, b)


# ----------------------------------------------------------------------------
# FC head: Linear(fc_in,256) -> ReLU -> (Dropout = identity) -> Linear(256,NC)
# K-tiled over fc_in with a VMEM f32 accumulator (streams w1 from HBM).
# ----------------------------------------------------------------------------
def fc_kernel(x_ref, w1_ref, b1_ref, w2_ref, b2_ref, o_ref, acc_ref):
    k = pl.program_id(0)

    @pl.when(k == 0)
    def _():
        acc_ref[...] = jnp.zeros_like(acc_ref)

    acc_ref[...] += jnp.dot(x_ref[...], w1_ref[...],
                            preferred_element_type=jnp.float32)

    @pl.when(k == pl.num_programs(0) - 1)
    def _():
        h = jnp.maximum(acc_ref[...] + b1_ref[...], 0.0)
        # Dropout(0.5) is identity at inference.
        o_ref[...] = (jnp.dot(h, w2_ref[...],
                              preferred_element_type=jnp.float32)
                      + b2_ref[...]).astype(o_ref.dtype)


def fc_layers(x, w1, b1, w2p, b2p, num_classes):
    B, K = x.shape
    H1 = w1.shape[1]          # 256
    NCp = w2p.shape[1]        # num_classes padded to a multiple of 128
    tk = _pick_fc_tk(K)
    out = pl.pallas_call(
        fc_kernel,
        out_shape=jax.ShapeDtypeStruct((B, NCp), jnp.float32),
        grid_spec=pltpu.PrefetchScalarGridSpec(
            num_scalar_prefetch=0,
            grid=(K // tk,),
            in_specs=[
                pl.BlockSpec((B, tk), lambda k: (0, k)),
                pl.BlockSpec((tk, H1), lambda k: (k, 0)),
                pl.BlockSpec((1, H1), lambda k: (0, 0)),
                pl.BlockSpec((H1, NCp), lambda k: (0, 0)),
                pl.BlockSpec((1, NCp), lambda k: (0, 0)),
            ],
            out_specs=pl.BlockSpec((B, NCp), lambda k: (0, 0)),
            scratch_shapes=[pltpu.VMEM((B, H1), jnp.float32)],
        ),
        compiler_params=pltpu.CompilerParams(
            dimension_semantics=("arbitrary",)),   # reduction over K tiles
    )(x, w1, b1, w2p, b2p)
    return out[:, :num_classes]


# ----------------------------------------------------------------------------
# Full forward (Pallas path)
# ----------------------------------------------------------------------------
def audio_cnn_forward(x_nchw, params):
    # x: (B, 1, n_mels, time) NCHW; with C==1 the NHWC transpose is a reshape.
    x = jnp.transpose(x_nchw, (0, 2, 3, 1))
    for (w, b) in params["conv_blocks"]:
        x = conv_block(x, w, b)
    B = x.shape[0]
    # Flatten directly in NHWC order; w1's rows were permuted at init so this
    # is numerically identical to PyTorch's NCHW x.view(B, -1) @ w1.
    x = x.reshape(B, -1)
    w1, b1, w2p, b2p = params["fc"]
    return fc_layers(x, w1, b1, w2p, b2p, params["num_classes"])


# ----------------------------------------------------------------------------
# Deterministic parameter init (BN folded into conv weights/bias)
# ----------------------------------------------------------------------------
def init_params(key, n_mels, time_steps, num_classes):
    eps = 1e-5
    channels = [(1, 32), (32, 64), (64, 128)]
    conv_blocks = []
    for (cin, cout) in channels:
        key, kw, kb, kg, kbe, km, kv = jax.random.split(key, 7)
        w = jax.random.normal(kw, (3, 3, cin, cout), jnp.float32) * 0.05
        b = jax.random.normal(kb, (cout,), jnp.float32) * 0.05
        gamma = 1.0 + 0.1 * jax.random.normal(kg, (cout,), jnp.float32)
        beta = 0.1 * jax.random.normal(kbe, (cout,), jnp.float32)
        mean = 0.1 * jax.random.normal(km, (cout,), jnp.float32)
        var = jax.random.uniform(kv, (cout,), jnp.float32, minval=0.5, maxval=1.5)
        scale = gamma / jnp.sqrt(var + eps)                 # inference-mode BN fold
        w_eff = (w * scale[None, None, None, :]).reshape(9 * cin, cout)
        b_eff = ((b - mean) * scale + beta).reshape(1, cout)
        conv_blocks.append((w_eff, b_eff))

    H3, W3 = n_mels // 8, time_steps // 8
    fc_in = 128 * H3 * W3
    key, k1, k2, k3, k4 = jax.random.split(key, 5)
    w1_chw = jax.random.normal(k1, (fc_in, 256), jnp.float32) * 0.02
    b1 = jax.random.normal(k2, (1, 256), jnp.float32) * 0.02
    w2 = jax.random.normal(k3, (256, num_classes), jnp.float32) * 0.02
    b2 = jax.random.normal(k4, (1, num_classes), jnp.float32) * 0.02

    # One-time row permutation so the kernel can flatten in NHWC order.
    w1_nhwc = (w1_chw.reshape(128, H3, W3, 256)
               .transpose(1, 2, 0, 3).reshape(fc_in, 256))
    # Pad the classifier to a 128-lane-dense output; sliced back in the wrapper.
    ncp = ((num_classes + 127) // 128) * 128
    w2_pad = jnp.zeros((256, ncp), jnp.float32).at[:, :num_classes].set(w2)
    b2_pad = jnp.zeros((1, ncp), jnp.float32).at[:, :num_classes].set(b2)

    return {
        "conv_blocks": conv_blocks,
        "fc": (w1_nhwc, b1, w2_pad, b2_pad),       # used by the Pallas path
        "fc_ref": (w1_chw, b1, w2, b2),            # used by the pure-JAX reference
        "num_classes": num_classes,
    }


# ----------------------------------------------------------------------------
# Pure-JAX reference (PyTorch semantics: NCHW flatten, unpermuted/unpadded fc)
# ----------------------------------------------------------------------------
def reference_forward(x_nchw, params):
    x = jnp.transpose(x_nchw, (0, 2, 3, 1))
    for (w, b) in params["conv_blocks"]:
        cin, cout = x.shape[-1], w.shape[-1]
        y = jax.lax.conv_general_dilated(
            x, w.reshape(3, 3, cin, cout),
            window_strides=(1, 1), padding=((1, 1), (1, 1)),
            dimension_numbers=("NHWC", "HWIO", "NHWC"))
        y = jnp.maximum(y + b.reshape(1, 1, 1, cout), 0.0)
        x = jax.lax.reduce_window(y, -jnp.inf, jax.lax.max,
                                  (1, 2, 2, 1), (1, 2, 2, 1), "VALID")
    B = x.shape[0]
    x = jnp.transpose(x, (0, 3, 1, 2)).reshape(B, -1)   # PyTorch x.view(B, -1)
    w1, b1, w2, b2 = params["fc_ref"]
    h = jnp.maximum(x @ w1 + b1, 0.0)
    return h @ w2 + b2


if __name__ == "__main__":
    # Small shapes consistent with the module (n_mels / time_steps scaled down,
    # divisible by 8 so fc_in = 128 * (H//8) * (W//8) stays valid).
    B, n_mels_s, time_s, num_classes = 2, 16, 16, 10
    key = jax.random.PRNGKey(0)
    key, kx = jax.random.split(key)
    x = jax.random.normal(kx, (B, 1, n_mels_s, time_s), jnp.float32)
    params = init_params(key, n_mels_s, time_s, num_classes)

    out = jax.block_until_ready(audio_cnn_forward(x, params))
    ref = jax.block_until_ready(reference_forward(x, params))
    np.testing.assert_allclose(np.asarray(out), np.asarray(ref),
                               rtol=1e-4, atol=1e-4)
    print("KERNEL_OK")
</pallas_src>

<mosaic_0001>
module attributes {stable_mosaic.version = 11 : i64} {
  func.func @conv1_block_kernel(%arg0: i32, %arg1: memref<1x16x16x1xf32, #tpu.memory_space<vmem>>, %arg2: memref<9x32xf32, #tpu.memory_space<vmem>>, %arg3: memref<1x32xf32, #tpu.memory_space<vmem>>, %arg4: memref<1x8x8x32xf32, #tpu.memory_space<vmem>>, %arg5: memref<1x18x18x1xf32, #tpu.memory_space<vmem>>) attributes {dimension_semantics = [#tpu.dimension_semantics<parallel>], iteration_bounds = array<i64: 2>, scalar_prefetch = 0 : i64, scratch_operands = 1 : i64, tpu.core_type = #tpu.core_type<tc>, window_params = [{transform_indices = @transform_0, window_bounds = array<i64: 1, 16, 16, 1>}, {pipeline_mode = #tpu.pipeline_mode<synchronous>, transform_indices = @transform_1, window_bounds = array<i64: 9, 32>}, {pipeline_mode = #tpu.pipeline_mode<synchronous>, transform_indices = @transform_2, window_bounds = array<i64: 1, 32>}, {transform_indices = @transform_3, window_bounds = array<i64: 1, 8, 8, 32>}]} {
    %cst = arith.constant 0.000000e+00 : f32
    %0 = vector.broadcast %cst : f32 to vector<1x1x18x1xf32>
    %cst_0 = arith.constant 0.000000e+00 : f32
    %1 = vector.broadcast %cst_0 : f32 to vector<1x16x1x1xf32>
    %c0 = arith.constant 0 : index
    %c0_1 = arith.constant 0 : index
    %c0_2 = arith.constant 0 : index
    %c0_3 = arith.constant 0 : index
    %2 = vector.load %arg5[%c0, %c0_1, %c0_2, %c0_3] : memref<1x18x18x1xf32, #tpu.memory_space<vmem>>, vector<1x1x18x1xf32>
    tpu.vector_store %arg5[%c0, %c0_1, %c0_2, %c0_3], %0 {strides = array<i32>} : memref<1x18x18x1xf32, #tpu.memory_space<vmem>>, vector<1x1x18x1xf32>,
    %c0_4 = arith.constant 0 : index
    %c17 = arith.constant 17 : index
    %c0_5 = arith.constant 0 : index
    %c0_6 = arith.constant 0 : index
    %3 = vector.load %arg5[%c0_4, %c17, %c0_5, %c0_6] : memref<1x18x18x1xf32, #tpu.memory_space<vmem>>, vector<1x1x18x1xf32>
    tpu.vector_store %arg5[%c0_4, %c17, %c0_5, %c0_6], %0 {strides = array<i32>} : memref<1x18x18x1xf32, #tpu.memory_space<vmem>>, vector<1x1x18x1xf32>,
    %c0_7 = arith.constant 0 : index
    %c1 = arith.constant 1 : index
    %c0_8 = arith.constant 0 : index
    %c0_9 = arith.constant 0 : index
    %4 = vector.load %arg5[%c0_7, %c1, %c0_8, %c0_9] : memref<1x18x18x1xf32, #tpu.memory_space<vmem>>, vector<1x16x1x1xf32>
    tpu.vector_store %arg5[%c0_7, %c1, %c0_8, %c0_9], %1 {strides = array<i32>} : memref<1x18x18x1xf32, #tpu.memory_space<vmem>>, vector<1x16x1x1xf32>,
    %c0_10 = arith.constant 0 : index
    %c1_11 = arith.constant 1 : index
    %c17_12 = arith.constant 17 : index
    %c0_13 = arith.constant 0 : index
    %5 = vector.load %arg5[%c0_10, %c1_11, %c17_12, %c0_13] : memref<1x18x18x1xf32, #tpu.memory_space<vmem>>, vector<1x16x1x1xf32>
    tpu.vector_store %arg5[%c0_10, %c1_11, %c17_12, %c0_13], %1 {strides = array<i32>} : memref<1x18x18x1xf32, #tpu.memory_space<vmem>>, vector<1x16x1x1xf32>,
    %c0_14 = arith.constant 0 : index
    %c0_15 = arith.constant 0 : index
    %c0_16 = arith.constant 0 : index
    %c0_17 = arith.constant 0 : index
    %6 = vector.load %arg1[%c0_14, %c0_15, %c0_16, %c0_17] : memref<1x16x16x1xf32, #tpu.memory_space<vmem>>, vector<1x16x16x1xf32>
    %c0_18 = arith.constant 0 : index
    %c1_19 = arith.constant 1 : index
    %c1_20 = arith.constant 1 : index
    %c0_21 = arith.constant 0 : index
    %7 = vector.load %arg5[%c0_18, %c1_19, %c1_20, %c0_21] : memref<1x18x18x1xf32, #tpu.memory_space<vmem>>, vector<1x16x16x1xf32>
    tpu.vector_store %arg5[%c0_18, %c1_19, %c1_20, %c0_21], %6 {strides = array<i32>} : memref<1x18x18x1xf32, #tpu.memory_space<vmem>>, vector<1x16x16x1xf32>,
    %c0_22 = arith.constant 0 : index
    %c0_23 = arith.constant 0 : index
    %8 = vector.load %arg2[%c0_22, %c0_23] : memref<9x32xf32, #tpu.memory_space<vmem>>, vector<9x32xf32>
    %c0_24 = arith.constant 0 : index
    %c0_25 = arith.constant 0 : index
    %9 = vector.load %arg3[%c0_24, %c0_25] : memref<1x32xf32, #tpu.memory_space<vmem>>, vector<1x32xf32>
    %cst_26 = arith.constant 0.000000e+00 : f32
    %10 = vector.broadcast %cst_26 : f32 to vector<1x16x16x32xf32>
    %c0_27 = arith.constant 0 : index
    %c0_28 = arith.constant 0 : index
    %c0_29 = arith.constant 0 : index
    %c0_30 = arith.constant 0 : index
    %11 = vector.load %arg5[%c0_27, %c0_28, %c0_29, %c0_30] : memref<1x18x18x1xf32, #tpu.memory_space<vmem>>, vector<1x16x16x1xf32>
    %12 = vector.extract_strided_slice %8 {offsets = [0, 0], sizes = [1, 32], strides = [1, 1]} : vector<9x32xf32> to vector<1x32xf32>
    %13 = vector.shape_cast %12 : vector<1x32xf32> to vector<1x1x1x32xf32>
    %14 = vector.broadcast %11 : vector<1x16x16x1xf32> to vector<1x16x16x32xf32>
    %15 = vector.broadcast %13 : vector<1x1x1x32xf32> to vector<1x16x16x32xf32>
    %16 = arith.mulf %14, %15 : vector<1x16x16x32xf32>
    %17 = arith.addf %10, %16 : vector<1x16x16x32xf32>
    %c0_31 = arith.constant 0 : index
    %c0_32 = arith.constant 0 : index
    %c1_33 = arith.constant 1 : index
    %c0_34 = arith.constant 0 : index
    %18 = vector.load %arg5[%c0_31, %c0_32, %c1_33, %c0_34] : memref<1x18x18x1xf32, #tpu.memory_space<vmem>>, vector<1x16x16x1xf32>
    %19 = vector.extract_strided_slice %8 {offsets = [1, 0], sizes = [1, 32], strides = [1, 1]} : vector<9x32xf32> to vector<1x32xf32>
    %20 = vector.shape_cast %19 : vector<1x32xf32> to vector<1x1x1x32xf32>
    %21 = vector.broadcast %18 : vector<1x16x16x1xf32> to vector<1x16x16x32xf32>
    %22 = vector.broadcast %20 : vector<1x1x1x32xf32> to vector<1x16x16x32xf32>
    %23 = arith.mulf %21, %22 : vector<1x16x16x32xf32>
    %24 = arith.addf %17, %23 : vector<1x16x16x32xf32>
    %c0_35 = arith.constant 0 : index
    %c0_36 = arith.constant 0 : index
    %c2 = arith.constant 2 : index
    %c0_37 = arith.constant 0 : index
    %25 = vector.load %arg5[%c0_35, %c0_36, %c2, %c0_37] : memref<1x18x18x1xf32, #tpu.memory_space<vmem>>, vector<1x16x16x1xf32>
    %26 = vector.extract_strided_slice %8 {offsets = [2, 0], sizes = [1, 32], strides = [1, 1]} : vector<9x32xf32> to vector<1x32xf32>
    %27 = vector.shape_cast %26 : vector<1x32xf32> to vector<1x1x1x32xf32>
    %28 = vector.broadcast %25 : vector<1x16x16x1xf32> to vector<1x16x16x32xf32>
    %29 = vector.broadcast %27 : vector<1x1x1x32xf32> to vector<1x16x16x32xf32>
    %30 = arith.mulf %28, %29 : vector<1x16x16x32xf32>
    %31 = arith.addf %24, %30 : vector<1x16x16x32xf32>
    %c0_38 = arith.constant 0 : index
    %c1_39 = arith.constant 1 : index
    %c0_40 = arith.constant 0 : index
    %c0_41 = arith.constant 0 : index
    %32 = vector.load %arg5[%c0_38, %c1_39, %c0_40, %c0_41] : memref<1x18x18x1xf32, #tpu.memory_space<vmem>>, vector<1x16x16x1xf32>
    %33 = vector.extract_strided_slice %8 {offsets = [3, 0], sizes = [1, 32], strides = [1, 1]} : vector<9x32xf32> to vector<1x32xf32>
    %34 = vector.shape_cast %33 : vector<1x32xf32> to vector<1x1x1x32xf32>
    %35 = vector.broadcast %32 : vector<1x16x16x1xf32> to vector<1x16x16x32xf32>
    %36 = vector.broadcast %34 : vector<1x1x1x32xf32> to vector<1x16x16x32xf32>
    %37 = arith.mulf %35, %36 : vector<1x16x16x32xf32>
    %38 = arith.addf %31, %37 : vector<1x16x16x32xf32>
    %c0_42 = arith.constant 0 : index
    %c1_43 = arith.constant 1 : index
    %c1_44 = arith.constant 1 : index
    %c0_45 = arith.constant 0 : index
    %39 = vector.load %arg5[%c0_42, %c1_43, %c1_44, %c0_45] : memref<1x18x18x1xf32, #tpu.memory_space<vmem>>, vector<1x16x16x1xf32>
    %40 = vector.extract_strided_slice %8 {offsets = [4, 0], sizes = [1, 32], strides = [1, 1]} : vector<9x32xf32> to vector<1x32xf32>
    %41 = vector.shape_cast %40 : vector<1x32xf32> to vector<1x1x1x32xf32>
    %42 = vector.broadcast %39 : vector<1x16x16x1xf32> to vector<1x16x16x32xf32>
    %43 = vector.broadcast %41 : vector<1x1x1x32xf32> to vector<1x16x16x32xf32>
    %44 = arith.mulf %42, %43 : vector<1x16x16x32xf32>
    %45 = arith.addf %38, %44 : vector<1x16x16x32xf32>
    %c0_46 = arith.constant 0 : index
    %c1_47 = arith.constant 1 : index
    %c2_48 = arith.constant 2 : index
    %c0_49 = arith.constant 0 : index
    %46 = vector.load %arg5[%c0_46, %c1_47, %c2_48, %c0_49] : memref<1x18x18x1xf32, #tpu.memory_space<vmem>>, vector<1x16x16x1xf32>
    %47 = vector.extract_strided_slice %8 {offsets = [5, 0], sizes = [1, 32], strides = [1, 1]} : vector<9x32xf32> to vector<1x32xf32>
    %48 = vector.shape_cast %47 : vector<1x32xf32> to vector<1x1x1x32xf32>
    %49 = vector.broadcast %46 : vector<1x16x16x1xf32> to vector<1x16x16x32xf32>
    %50 = vector.broadcast %48 : vector<1x1x1x32xf32> to vector<1x16x16x32xf32>
    %51 = arith.mulf %49, %50 : vector<1x16x16x32xf32>
    %52 = arith.addf %45, %51 : vector<1x16x16x32xf32>
    %c0_50 = arith.constant 0 : index
    %c2_51 = arith.constant 2 : index
    %c0_52 = arith.constant 0 : index
    %c0_53 = arith.constant 0 : index
    %53 = vector.load %arg5[%c0_50, %c2_51, %c0_52, %c0_53] : memref<1x18x18x1xf32, #tpu.memory_space<vmem>>, vector<1x16x16x1xf32>
    %54 = vector.extract_strided_slice %8 {offsets = [6, 0], sizes = [1, 32], strides = [1, 1]} : vector<9x32xf32> to vector<1x32xf32>
    %55 = vector.shape_cast %54 : vector<1x32xf32> to vector<1x1x1x32xf32>
    %56 = vector.broadcast %53 : vector<1x16x16x1xf32> to vector<1x16x16x32xf32>
    %57 = vector.broadcast %55 : vector<1x1x1x32xf32> to vector<1x16x16x32xf32>
    %58 = arith.mulf %56, %57 : vector<1x16x16x32xf32>
    %59 = arith.addf %52, %58 : vector<1x16x16x32xf32>
    %c0_54 = arith.constant 0 : index
    %c2_55 = arith.constant 2 : index
    %c1_56 = arith.constant 1 : index
    %c0_57 = arith.constant 0 : index
    %60 = vector.load %arg5[%c0_54, %c2_55, %c1_56, %c0_57] : memref<1x18x18x1xf32, #tpu.memory_space<vmem>>, vector<1x16x16x1xf32>
    %61 = vector.extract_strided_slice %8 {offsets = [7, 0], sizes = [1, 32], strides = [1, 1]} : vector<9x32xf32> to vector<1x32xf32>
    %62 = vector.shape_cast %61 : vector<1x32xf32> to vector<1x1x1x32xf32>
    %63 = vector.broadcast %60 : vector<1x16x16x1xf32> to vector<1x16x16x32xf32>
    %64 = vector.broadcast %62 : vector<1x1x1x32xf32> to vector<1x16x16x32xf32>
    %65 = arith.mulf %63, %64 : vector<1x16x16x32xf32>
    %66 = arith.addf %59, %65 : vector<1x16x16x32xf32>
    %c0_58 = arith.constant 0 : index
    %c2_59 = arith.constant 2 : index
    %c2_60 = arith.constant 2 : index
    %c0_61 = arith.constant 0 : index
    %67 = vector.load %arg5[%c0_58, %c2_59, %c2_60, %c0_61] : memref<1x18x18x1xf32, #tpu.memory_space<vmem>>, vector<1x16x16x1xf32>
    %68 = vector.extract_strided_slice %8 {offsets = [8, 0], sizes = [1, 32], strides = [1, 1]} : vector<9x32xf32> to vector<1x32xf32>
    %69 = vector.shape_cast %68 : vector<1x32xf32> to vector<1x1x1x32xf32>
    %70 = vector.broadcast %67 : vector<1x16x16x1xf32> to vector<1x16x16x32xf32>
    %71 = vector.broadcast %69 : vector<1x1x1x32xf32> to vector<1x16x16x32xf32>
    %72 = arith.mulf %70, %71 : vector<1x16x16x32xf32>
    %73 = arith.addf %66, %72 : vector<1x16x16x32xf32>
    %74 = vector.shape_cast %9 : vector<1x32xf32> to vector<1x1x1x32xf32>
    %75 = vector.broadcast %74 : vector<1x1x1x32xf32> to vector<1x16x16x32xf32>
    %76 = arith.addf %73, %75 : vector<1x16x16x32xf32>
    %cst_62 = arith.constant 0.000000e+00 : f32
    %77 = vector.broadcast %cst_62 : f32 to vector<1x16x16x32xf32>
    %78 = arith.maximumf %76, %77 : vector<1x16x16x32xf32>
    %79 = vector.shape_cast %78 : vector<1x16x16x32xf32> to vector<16x16x32xf32>
    %80 = vector.shape_cast %79 : vector<16x16x32xf32> to vector<8x2x16x32xf32>
    %cst_63 = arith.constant dense<0xFF800000> : vector<8x16x32xf32>
    %81 = vector.multi_reduction <maximumf>, %80, %cst_63 [1] : vector<8x2x16x32xf32> to vector<8x16x32xf32>
    %82 = vector.shape_cast %81 : vector<8x16x32xf32> to vector<8x8x2x32xf32>
    %cst_64 = arith.constant dense<0xFF800000> : vector<8x8x32xf32>
    %83 = vector.multi_reduction <maximumf>, %82, %cst_64 [2] : vector<8x8x2x32xf32> to vector<8x8x32xf32>
    %84 = vector.shape_cast %83 : vector<8x8x32xf32> to vector<1x8x8x32xf32>
    %c0_65 = arith.constant 0 : index
    %c0_66 = arith.constant 0 : index
    %c0_67 = arith.constant 0 : index
    %c0_68 = arith.constant 0 : index
    %85 = vector.load %arg4[%c0_65, %c0_66, %c0_67, %c0_68] : memref<1x8x8x32xf32, #tpu.memory_space<vmem>>, vector<1x8x8x32xf32>
    tpu.vector_store %arg4[%c0_65, %c0_66, %c0_67, %c0_68], %84 {strides = array<i32>} : memref<1x8x8x32xf32, #tpu.memory_space<vmem>>, vector<1x8x8x32xf32>,
    return
  }
  func.func @transform_0(%arg0: i32) -> (i32, i32, i32, i32) {
    %c0_i32 = arith.constant 0 : i32
    %c0_i32_0 = arith.constant 0 : i32
    %c0_i32_1 = arith.constant 0 : i32
    %c0_i32_2 = arith.constant 0 : i32
    return %arg0, %c0_i32, %c0_i32_0, %c0_i32_1 : i32, i32, i32, i32
  }
  func.func @transform_1(%arg0: i32) -> (i32, i32) {
    %c0_i32 = arith.constant 0 : i32
    %c0_i32_0 = arith.constant 0 : i32
    %c0_i32_1 = arith.constant 0 : i32
    return %c0_i32, %c0_i32_0 : i32, i32
  }
  func.func @transform_2(%arg0: i32) -> (i32, i32) {
    %c0_i32 = arith.constant 0 : i32
    %c0_i32_0 = arith.constant 0 : i32
    %c0_i32_1 = arith.constant 0 : i32
    return %c0_i32, %c0_i32_0 : i32, i32
  }
  func.func @transform_3(%arg0: i32) -> (i32, i32, i32, i32) {
    %c0_i32 = arith.constant 0 : i32
    %c0_i32_0 = arith.constant 0 : i32
    %c0_i32_1 = arith.constant 0 : i32
    %c0_i32_2 = arith.constant 0 : i32
    return %arg0, %c0_i32, %c0_i32_0, %c0_i32_1 : i32, i32, i32, i32
  }
}

</mosaic_0001>

<bundles_post_ra>
// kernel: tpu_custom_call.1
= control target key start
LH: loop header
LB: loop body
LE: loop exit
PB: predicated region body
PF: predicated region fallthrough
CT: control target
= control target key end

     0   :  { %8 = vsyncpa [#allocation4], 0  ;;  %s6310_s0 = inlined_call_operand.vmem [shape: f32[2,16,16,1], index: 0, kind: input, shape index: {}]   ;;  %s6311_s1 = inlined_call_operand.vmem [shape: f32[9,32], index: 1, kind: input, shape index: {}]   ;;  %s6312_s2 = inlined_call_operand.vmem [shape: f32[1,32], index: 2, kind: input, shape index: {}]   ;;  %s6313_s3 = inlined_call_operand.hbm [shape: f32[2,8,8,32], index: 3, kind: output, shape index: {}]  }
   0x1   :  { %10 = vsyncpa [#allocation4 + $0x1], 0  ;;  %s3913_s12 = smov 0   ;;  %s3915_s13 = smov 0  }
   0x2   :  { %s3917_s14 = smov 0   ;;  %s3919_s15 = smov 0  }
   0x3 LB: > { %s3934_s16 = sadd.s32 4294967295, %s3885_s15   ;;  %s3759_s17 = sadd.s32 4294967294, %s3885_s15   ;;  %s3885_s15 = sphi %s3919_s15, %s6837_s15   ;;  %s3881_s14 = sphi %s3917_s14, %s6836_s14   ;;  %s3877_s13 = sphi %s3915_s13, %s6835_s13   ;;  %s3873_s12 = sphi %s3913_s12, %s6834_s12  }
   0x4   : > { %s3938_s18 = sadd.s32 1, %s3885_s15   ;;  %s91_s19 = sadd.s32 1, %s3881_s14 }
   0x5   : > { %s88_s20 = ssub.s32 %s3885_s15, %s3938_s18  ;;  %p101_p0 = scmp.ne.s32.totalorder %s3881_s14, %s3877_s13 }
   0x6   : > { %p89_p1 = scmp.eq.s32.totalorder %s88_s20, 0  ;;  %p102_p2 = scmp.eq.s32.totalorder %s3934_s16, 1 }
   0x7   : > { %p107_p3 = scmp.ne.s32.totalorder %s3877_s13, %s3873_s12  ;;  %p108_p4 = scmp.eq.s32.totalorder %s3759_s17, 1 }
   0x8   : > { %s3949_s21 = scalar_select %p89_p1, %s3881_s14, %s91_s19  }
   0x9   : > { %p3951_p5 = por %p102_p2, %p101_p0  ;;  %p3955_p6 = por %p108_p4, %p107_p3 }
   0xa   : > { %p3762_p7 = scmp.ge.s32.totalorder %s3885_s15, 1  ;;  %p140_p8 = scmp.lt.s32.totalorder %s3885_s15, 3 }
   0xc   : > { %p141_p9 = pnand %p3762_p7, %p140_p8 }
   0xe   : > { %144 = sbr.rel (%p141_p9) target bundleno = 903 (0x387), region = 32 }
  0x15   : > { %vm169_vm0 = vcmask 7168   ;;  %p164_p10 = scmp.lt.s32.totalorder %s3934_s16, 1  ;;  %vm179_vm1 = vcmask 0   ;;  %v3887_v0 = vmov 0   ;;  %v3888_v1 = vmov 0.0   ;;  %s161_s8 = sand.u32 1, %s3877_s13  }
  0x16   : > { %3819 = vset.pattern.permute.xlu0 %v3887_v0  ;;  %170 = vst.msk [vmem:[#allocation2] sm:$0xff] %vm169_vm0, %v3888_v1  ;;  %171 = vst.msk [vmem:[#allocation2 + $0x8] sm:$0xff] %vm169_vm0, %v3888_v1  ;;  %3820 = vset.pattern.permute.xlu1 %v3887_v0  ;;  %vm172_vm2 = vcmask 1024   ;;  %vm2690_vm3 = vcmask 261120   ;;  %vm3091_vm4 = vcmask 254976   ;;  %vm3604_vm5 = vcmask 1041409  }
  0x17   : > { %175 = vst.msk [vmem:[#allocation2 + $0x198] sm:$0xff] %vm169_vm0, %v3888_v1  ;;  %176 = vst.msk [vmem:[#allocation2 + $0x1a0] sm:$0xff] %vm169_vm0, %v3888_v1  ;;  %s165_s24 = scalar_select %p164_p10, %s3934_s16, 1  ;;  %vm3606_vm6 = vcmask 1042434   ;;  %vm3608_vm7 = vcmask 1043459   ;;  %vm3610_vm8 = vcmask 1044484  }
  0x18   : > { %180 = vst.msk [vmem:[#allocation2 + $0x18] sm:$0x1] %vm179_vm1, %v3888_v1  ;;  %181 = vst.msk [vmem:[#allocation2 + $0x30] sm:$0x1] %vm179_vm1, %v3888_v1  ;;  %vm3612_vm9 = vcmask 1045509   ;;  %vm3614_vm10 = vcmask 1046534  }
  0x19   : > { %182 = vst.msk [vmem:[#allocation2 + $0x48] sm:$0x1] %vm179_vm1, %v3888_v1  ;;  %183 = vst.msk [vmem:[#allocation2 + $0x60] sm:$0x1] %vm179_vm1, %v3888_v1  ;;  %s3773_s25 = sshll.u32 %s165_s24, 8  ;;  %vm3616_vm11 = vcmask 1047559  }
  0x1a   : > { %184 = vst.msk [vmem:[#allocation2 + $0x78] sm:$0x1] %vm179_vm1, %v3888_v1  ;;  %185 = vst.msk [vmem:[#allocation2 + $0x90] sm:$0x1] %vm179_vm1, %v3888_v1  ;;  %s4004_s28 = scalar_lea.vmem %s6310_s0, %s3773_s25  ;;  %s3763_s9 = sshll.u32 %s161_s8, 6 }
  0x1b   : > { %186 = vst.msk [vmem:[#allocation2 + $0xa8] sm:$0x1] %vm179_vm1, %v3888_v1  ;;  %187 = vst.msk [vmem:[#allocation2 + $0xc0] sm:$0x1] %vm179_vm1, %v3888_v1  ;;  %v212_v2 = vld [vmem:[%s4004_s28] sm:$0xff]  ;;  %v214_v3 = vld [vmem:[%s4004_s28 + $0x10] sm:$0xff] }
  0x1c   : > { %188 = vst.msk [vmem:[#allocation2 + $0xd8] sm:$0x1] %vm179_vm1, %v3888_v1  ;;  %189 = vst.msk [vmem:[#allocation2 + $0xf0] sm:$0x1] %vm179_vm1, %v3888_v1  ;;  %v213_v4 = vld [vmem:[%s4004_s28 + $0x8] sm:$0xff]  ;;  %v216_v5 = vld [vmem:[%s4004_s28 + $0x20] sm:$0xff] }
  0x1d   : > { %190 = vst.msk [vmem:[#allocation2 + $0x108] sm:$0x1] %vm179_vm1, %v3888_v1  ;;  %191 = vst.msk [vmem:[#allocation2 + $0x120] sm:$0x1] %vm179_vm1, %v3888_v1  ;;  %v215_v6 = vld [vmem:[%s4004_s28 + $0x18] sm:$0xff]  ;;  %v218_v7 = vld [vmem:[%s4004_s28 + $0x30] sm:$0xff] }
  0x1e   : > { %192 = vst.msk [vmem:[#allocation2 + $0x138] sm:$0x1] %vm179_vm1, %v3888_v1  ;;  %193 = vst.msk [vmem:[#allocation2 + $0x150] sm:$0x1] %vm179_vm1, %v3888_v1  ;;  %v279_v8 = vld [vmem:[#allocation2] sm:$0xff]  ;;  %v280_v9 = vld [vmem:[#allocation2 + $0x8] sm:$0xff] }
  0x1f   : > { %194 = vst.msk [vmem:[#allocation2 + $0x168] sm:$0x1] %vm179_vm1, %v3888_v1  ;;  %195 = vst.msk [vmem:[#allocation2 + $0x180] sm:$0x1] %vm179_vm1, %v3888_v1  ;;  %v217_v10 = vld [vmem:[%s4004_s28 + $0x28] sm:$0xff]  ;;  %313 = vperm.xlu0 %3819, %v279_v8   ;;  %v220_v11 = vld [vmem:[%s4004_s28 + $0x40] sm:$0xff] }
  0x20   : > { %196 = vst.msk [vmem:[#allocation2 + $0x29] sm:$0x1] %vm179_vm1, %v3888_v1  ;;  %197 = vst.msk [vmem:[#allocation2 + $0x41] sm:$0x1] %vm179_vm1, %v3888_v1  ;;  %v219_v12 = vld [vmem:[%s4004_s28 + $0x38] sm:$0xff]  ;;  %v222_v13 = vld [vmem:[%s4004_s28 + $0x50] sm:$0xff] }
  0x21   : > { %198 = vst.msk [vmem:[#allocation2 + $0x59] sm:$0x1] %vm179_vm1, %v3888_v1  ;;  %199 = vst.msk [vmem:[#allocation2 + $0x71] sm:$0x1] %vm179_vm1, %v3888_v1  ;;  %v221_v14 = vld [vmem:[%s4004_s28 + $0x48] sm:$0xff]  ;;  %v224_v15 = vld [vmem:[%s4004_s28 + $0x60] sm:$0xff] }
  0x22   : > { %200 = vst.msk [vmem:[#allocation2 + $0x89] sm:$0x1] %vm179_vm1, %v3888_v1  ;;  %201 = vst.msk [vmem:[#allocation2 + $0xa1] sm:$0x1] %vm179_vm1, %v3888_v1  ;;  %v223_v16 = vld [vmem:[%s4004_s28 + $0x58] sm:$0xff]  ;;  %v226_v17 = vld [vmem:[%s4004_s28 + $0x70] sm:$0xff] }
  0x23   : > { %202 = vst.msk [vmem:[#allocation2 + $0xb9] sm:$0x1] %vm179_vm1, %v3888_v1  ;;  %203 = vst.msk [vmem:[#allocation2 + $0xd1] sm:$0x1] %vm179_vm1, %v3888_v1  ;;  %v225_v18 = vld [vmem:[%s4004_s28 + $0x68] sm:$0xff]  ;;  %v228_v19 = vld [vmem:[%s4004_s28 + $0x80] sm:$0xff]  ;;  %318 = vperm.xlu0 %3819, %v280_v9  }
  0x24   : > { %204 = vst.msk [vmem:[#allocation2 + $0xe9] sm:$0x1] %vm179_vm1, %v3888_v1  ;;  %205 = vst.msk [vmem:[#allocation2 + $0x101] sm:$0x1] %vm179_vm1, %v3888_v1  ;;  %v227_v20 = vld [vmem:[%s4004_s28 + $0x78] sm:$0xff]  ;;  %v230_v21 = vld [vmem:[%s4004_s28 + $0x90] sm:$0xff] }
  0x25   : > { %206 = vst.msk [vmem:[#allocation2 + $0x119] sm:$0x1] %vm179_vm1, %v3888_v1  ;;  %207 = vst.msk [vmem:[#allocation2 + $0x131] sm:$0x1] %vm179_vm1, %v3888_v1  ;;  %v229_v22 = vld [vmem:[%s4004_s28 + $0x88] sm:$0xff]  ;;  %v232_v23 = vld [vmem:[%s4004_s28 + $0xa0] sm:$0xff] }
  0x26   : > { %208 = vst.msk [vmem:[#allocation2 + $0x149] sm:$0x1] %vm179_vm1, %v3888_v1  ;;  %209 = vst.msk [vmem:[#allocation2 + $0x161] sm:$0x1] %vm179_vm1, %v3888_v1  ;;  %v231_v24 = vld [vmem:[%s4004_s28 + $0x98] sm:$0xff]  ;;  %v234_v25 = vld [vmem:[%s4004_s28 + $0xb0] sm:$0xff] }
  0x27   : > { %210 = vst.msk [vmem:[#allocation2 + $0x179] sm:$0x1] %vm179_vm1, %v3888_v1  ;;  %211 = vst.msk [vmem:[#allocation2 + $0x191] sm:$0x1] %vm179_vm1, %v3888_v1  ;;  %v233_v29 = vld [vmem:[%s4004_s28 + $0xa8] sm:$0xff]  ;;  %v236_v30 = vld [vmem:[%s4004_s28 + $0xc0] sm:$0xff] }
  0x28   : > { %173 = vst.msk [vmem:[#allocation2 + $0x10] sm:$0x3] %vm172_vm2, %v3888_v1  ;;  %177 = vst.msk [vmem:[#allocation2 + $0x1a8] sm:$0x3] %vm172_vm2, %v3888_v1  ;;  %v235_v34 = vld [vmem:[%s4004_s28 + $0xb8] sm:$0xff]  ;;  %v238_v35 = vld [vmem:[%s4004_s28 + $0xd0] sm:$0xff] }
  0x29   : > { %244 = vst.msk [vmem:[#allocation2 + $0x19] sm:$0xff] %vm169_vm0, %v212_v2  ;;  %246 = vst.msk [vmem:[#allocation2 + $0x31] sm:$0xff] %vm169_vm0, %v214_v3  ;;  %v237_v36 = vld [vmem:[%s4004_s28 + $0xc8] sm:$0xff]  ;;  %v240_v37 = vld [vmem:[%s4004_s28 + $0xe0] sm:$0xff]  ;;  %s5898_s10 = scalar_lea.vmem [#allocation3], %s3763_s9  ;;  %s3774_s24 = sshll.u32 %s3934_s16, 10 }
  0x2a   : > { %245 = vst.msk [vmem:[#allocation2 + $0x21] sm:$0xff] %vm169_vm0, %v213_v4  ;;  %248 = vst.msk [vmem:[#allocation2 + $0x49] sm:$0xff] %vm169_vm0, %v216_v5  ;;  %v239_v38 = vld [vmem:[%s4004_s28 + $0xd8] sm:$0xff]  ;;  %v241_v40 = vld [vmem:[%s4004_s28 + $0xe8] sm:$0xff]  ;;  %s3697_s25 = sshll.u32 %s5898_s10, 4  ;;  %s6269_s16 = scalar_lea.sflag [#allocation4], %s161_s8  ;;  %s6261_s25 = int_to_ptr.vmem [resolvable:$true] %s3697_s25 }
  0x2b   : > { %247 = vst.msk [vmem:[#allocation2 + $0x39] sm:$0xff] %vm169_vm0, %v215_v6  ;;  %250 = vst.msk [vmem:[#allocation2 + $0x61] sm:$0xff] %vm169_vm0, %v218_v7  ;;  %v539_v63 = vld [vmem:[#allocation2 + $0x1] sm:$0xff]  ;;  %s3823_s29 = scalar_lea.vmem %s6261_s25, 1024  ;;  %s3890_s30 = smov [#allocation3]  }
  0x2c   : > { %249 = vst.msk [vmem:[#allocation2 + $0x51] sm:$0xff] %vm169_vm0, %v217_v10  ;;  %252 = vst.msk [vmem:[#allocation2 + $0x79] sm:$0xff] %vm169_vm0, %v220_v11  ;;  %p3824_p11 = scmp.ne.s32.totalorder %s6261_s25, %s3823_s29  ;;  %s3827_s4 = sshll.u32 %s3890_s30, 4  ;;  %s3828_s4 = int_to_ptr.vmem [resolvable:$false] %s3827_s4 }
  0x2d   : > { %251 = vst.msk [vmem:[#allocation2 + $0x69] sm:$0xff] %vm169_vm0, %v219_v12  ;;  %254 = vst.msk [vmem:[#allocation2 + $0x91] sm:$0xff] %vm169_vm0, %v222_v13  ;;  %s3829_s5 = scalar_lea.vmem %s3828_s4, 2048  ;;  %p3830_p0 = scmp.lt.s32.totalorder %s6261_s25, %s3828_s4 }
  0x2e   : > { %253 = vst.msk [vmem:[#allocation2 + $0x81] sm:$0xff] %vm169_vm0, %v221_v14  ;;  %256 = vst.msk [vmem:[#allocation2 + $0xa9] sm:$0xff] %vm169_vm0, %v224_v15  ;;  %p3825_p12 = pnand %p3824_p11, %p3951_p5  ;;  %p3831_p1 = scmp.lt.s32.totalorder %s3829_s5, %s3823_s29 }
  0x2f   : > { %255 = vst.msk [vmem:[#allocation2 + $0x99] sm:$0xff] %vm169_vm0, %v223_v16  ;;  %258 = vst.msk [vmem:[#allocation2 + $0xc1] sm:$0xff] %vm169_vm0, %v226_v17  ;;  %v540_v2 = vld [vmem:[#allocation2 + $0x9] sm:$0xff] }
  0x30   : > { %257 = vst.msk [vmem:[#allocation2 + $0xb1] sm:$0xff] %vm169_vm0, %v225_v18  ;;  %260 = vst.msk [vmem:[#allocation2 + $0xd9] sm:$0xff] %vm169_vm0, %v228_v19  ;;  %v4047_v26 = vld [vmem:[#allocation2 + $0x18] sm:$0xff]  ;;  %v4049_v27 = vld [vmem:[#allocation2 + $0x30] sm:$0xff]  ;;  %p3826_p13 = pneg %p3825_p12  ;;  %p3832_p2 = por %p3831_p1, %p3830_p0 }
  0x31   : > { %259 = vst.msk [vmem:[#allocation2 + $0xc9] sm:$0xff] %vm169_vm0, %v227_v20  ;;  %262 = vst.msk [vmem:[#allocation2 + $0xf1] sm:$0xff] %vm169_vm0, %v230_v21  ;;  %323 = vperm.xlu1 %3820, %v4047_v26   ;;  %v4055_v28 = vld [vmem:[#allocation2 + $0x20] sm:$0xff]  ;;  %333 = vperm.xlu0 %3819, %v4049_v27   ;;  %v4062_v31 = vld [vmem:[#allocation2 + $0x48] sm:$0xff] }
  0x32   : > { %261 = vst.msk [vmem:[#allocation2 + $0xe1] sm:$0xff] %vm169_vm0, %v229_v22  ;;  %264 = vst.msk [vmem:[#allocation2 + $0x109] sm:$0xff] %vm169_vm0, %v232_v23  ;;  %v4065_v32 = vld [vmem:[#allocation2 + $0x38] sm:$0xff]  ;;  %v4068_v33 = vld [vmem:[#allocation2 + $0x60] sm:$0xff]  ;;  %p3833_p3 = pnand %p3832_p2, %p3826_p13 }
  0x33   : > { %263 = vst.msk [vmem:[#allocation2 + $0xf9] sm:$0xff] %vm169_vm0, %v231_v24  ;;  %266 = vst.msk [vmem:[#allocation2 + $0x121] sm:$0xff] %vm169_vm0, %v234_v25  ;;  %v4079_v39 = vld [vmem:[#allocation2 + $0x50] sm:$0xff]  ;;  %v4086_v41 = vld [vmem:[#allocation2 + $0x78] sm:$0xff] }
  0x34   : > { %265 = vst.msk [vmem:[#allocation2 + $0x111] sm:$0xff] %vm169_vm0, %v233_v29  ;;  %268 = vst.msk [vmem:[#allocation2 + $0x139] sm:$0xff] %vm169_vm0, %v236_v30  ;;  %v4089_v42 = vld [vmem:[#allocation2 + $0x68] sm:$0xff]  ;;  %v4092_v43 = vld [vmem:[#allocation2 + $0x90] sm:$0xff] }
  0x35   : > { %328 = vperm.xlu1 %3820, %v4055_v28   ;;  %343 = vperm.xlu0 %3819, %v4062_v31   ;;  %267 = vst.msk [vmem:[#allocation2 + $0x129] sm:$0xff] %vm169_vm0, %v235_v34  ;;  %270 = vst.msk [vmem:[#allocation2 + $0x151] sm:$0xff] %vm169_vm0, %v238_v35  ;;  %v4095_v44 = vld [vmem:[#allocation2 + $0x80] sm:$0xff]  ;;  %v4098_v45 = vld [vmem:[#allocation2 + $0xa8] sm:$0xff] }
  0x36   : > { %269 = vst.msk [vmem:[#allocation2 + $0x141] sm:$0xff] %vm169_vm0, %v237_v36  ;;  %272 = vst.msk [vmem:[#allocation2 + $0x169] sm:$0xff] %vm169_vm0, %v240_v37  ;;  %v4101_v46 = vld [vmem:[#allocation2 + $0x98] sm:$0xff]  ;;  %v4104_v47 = vld [vmem:[#allocation2 + $0xc0] sm:$0xff] }
  0x37   : > { %271 = vst.msk [vmem:[#allocation2 + $0x159] sm:$0xff] %vm169_vm0, %v239_v38  ;;  %273 = vst.msk [vmem:[#allocation2 + $0x171] sm:$0xff] %vm169_vm0, %v241_v40  ;;  %v4107_v48 = vld [vmem:[#allocation2 + $0xb0] sm:$0xff]  ;;  %v4110_v49 = vld [vmem:[#allocation2 + $0xd8] sm:$0xff] }
  0x38   : > { %v4113_v50 = vld [vmem:[#allocation2 + $0xc8] sm:$0xff]  ;;  %v4116_v51 = vld [vmem:[#allocation2 + $0xf0] sm:$0xff]  ;;  %v4155_v1 = vld [vmem:[#allocation2 + $0x19] sm:$0xff] }
  0x39   : > { %338 = vperm.xlu1 %3820, %v4065_v32   ;;  %353 = vperm.xlu0 %3819, %v4068_v33   ;;  %v4119_v52 = vld [vmem:[#allocation2 + $0xe0] sm:$0xff]  ;;  %v4122_v53 = vld [vmem:[#allocation2 + $0x108] sm:$0xff]  ;;  %v4159_v3 = vld [vmem:[#allocation2 + $0x31] sm:$0xff] }
  0x3a   : > { %v4125_v54 = vld [vmem:[#allocation2 + $0xf8] sm:$0xff]  ;;  %v4128_v55 = vld [vmem:[#allocation2 + $0x120] sm:$0xff]  ;;  %v4164_v5 = vld [vmem:[#allocation2 + $0x49] sm:$0xff] }
  0x3b   : > { %v4131_v56 = vld [vmem:[#allocation2 + $0x110] sm:$0xff]  ;;  %v4134_v57 = vld [vmem:[#allocation2 + $0x138] sm:$0xff]  ;;  %v4161_v4 = vld [vmem:[#allocation2 + $0x21] sm:$0xff] }
  0x3c   : > { %v4137_v58 = vld [vmem:[#allocation2 + $0x128] sm:$0xff]  ;;  %v4140_v59 = vld [vmem:[#allocation2 + $0x150] sm:$0xff]  ;;  %v4167_v6 = vld [vmem:[#allocation2 + $0x39] sm:$0xff] }
  0x3d   : > { %348 = vperm.xlu1 %3820, %v4079_v39   ;;  %363 = vperm.xlu0 %3819, %v4086_v41   ;;  %v4143_v60 = vld [vmem:[#allocation2 + $0x140] sm:$0xff]  ;;  %v4146_v61 = vld [vmem:[#allocation2 + $0x168] sm:$0xff]  ;;  %v4173_v8 = vld [vmem:[#allocation2 + $0x51] sm:$0xff] }
  0x3e   : > { %v4149_v62 = vld [vmem:[#allocation2 + $0x158] sm:$0xff]  ;;  %v4153_v0 = vld [vmem:[#allocation2 + $0x170] sm:$0xff]  ;;  %v4170_v7 = vld [vmem:[#allocation2 + $0x61] sm:$0xff] }
  0x3f   : > { %v4176_v9 = vld [vmem:[#allocation2 + $0x79] sm:$0xff]  ;;  %v4179_v10 = vld [vmem:[#allocation2 + $0x69] sm:$0xff]  ;;  %v4182_v11 = vld [vmem:[#allocation2 + $0x91] sm:$0xff] }
  0x40   : > { %v4185_v12 = vld [vmem:[#allocation2 + $0x81] sm:$0xff]  ;;  %v4188_v13 = vld [vmem:[#allocation2 + $0xa9] sm:$0xff]  ;;  %v4191_v14 = vld [vmem:[#allocation2 + $0x99] sm:$0xff] }
  0x41   : > { %358 = vperm.xlu1 %3820, %v4089_v42   ;;  %373 = vperm.xlu0 %3819, %v4092_v43   ;;  %v4194_v15 = vld [vmem:[#allocation2 + $0xc1] sm:$0xff]  ;;  %v4197_v16 = vld [vmem:[#allocation2 + $0xb1] sm:$0xff]  ;;  %v4200_v17 = vld [vmem:[#allocation2 + $0xd9] sm:$0xff] }
  0x42   : > { %v4203_v18 = vld [vmem:[#allocation2 + $0xc9] sm:$0xff]  ;;  %v4206_v19 = vld [vmem:[#allocation2 + $0xf1] sm:$0xff]  ;;  %v4209_v20 = vld [vmem:[#allocation2 + $0xe1] sm:$0xff] }
  0x43   : > { %v4212_v21 = vld [vmem:[#allocation2 + $0x109] sm:$0xff]  ;;  %v4215_v22 = vld [vmem:[#allocation2 + $0xf9] sm:$0xff]  ;;  %v4218_v23 = vld [vmem:[#allocation2 + $0x121] sm:$0xff] }
  0x44   : > { %v4221_v24 = vld [vmem:[#allocation2 + $0x111] sm:$0xff]  ;;  %v4224_v25 = vld [vmem:[#allocation2 + $0x139] sm:$0xff]  ;;  %v4227_v29 = vld [vmem:[#allocation2 + $0x129] sm:$0xff] }
  0x45   : > { %368 = vperm.xlu1 %3820, %v4095_v44   ;;  %383 = vperm.xlu0 %3819, %v4098_v45   ;;  %6356 = vst [vmem:[#allocation6_spill] sm:$0xff] %v4227_v29  ;;  %v242_v30 = vld [vmem:[%s4004_s28 + $0xf0] sm:$0xff]  ;;  %v4235_v35 = vld [vmem:[#allocation2 + $0x141] sm:$0xff]  ;;  %v243_v37 = vld [vmem:[%s4004_s28 + $0xf8] sm:$0xff]  ;;  %s6259_s28 = scalar_lea.hbm %s6313_s3, %s3774_s24 }
  0x46   : > { %274 = vst.msk [vmem:[#allocation2 + $0x181] sm:$0xff] %vm169_vm0, %v242_v30  ;;  %v4232_v34 = vld [vmem:[#allocation2 + $0x151] sm:$0xff]  ;;  %6358 = vst [vmem:[#allocation8_spill] sm:$0xff] %v4235_v35  ;;  %v4238_v36 = vld [vmem:[#allocation2 + $0x169] sm:$0xff] }
  0x47   : > { %6357 = vst [vmem:[#allocation7_spill] sm:$0xff] %v4232_v34  ;;  %6359 = vst [vmem:[#allocation9_spill] sm:$0xff] %v4238_v36  ;;  %v4243_v38 = vld [vmem:[#allocation2 + $0x159] sm:$0xff]  ;;  %v799_v40 = vld [vmem:[#allocation2 + $0x2] sm:$0xff] }
  0x48   : > { %275 = vst.msk [vmem:[#allocation2 + $0x189] sm:$0xff] %vm169_vm0, %v243_v37  ;;  %6360 = vst [vmem:[#allocation10_spill] sm:$0xff] %v4243_v38  ;;  %v4251_v30 = vld [vmem:[#allocation2 + $0x1a] sm:$0xff] }
  0x49   : > { %378 = vperm.xlu1 %3820, %v4101_v46   ;;  %393 = vperm.xlu0 %3819, %v4104_v47   ;;  %6362 = vst [vmem:[#allocation12_spill] sm:$0xff] %v4251_v30 }
  0x4d   : > { %388 = vperm.xlu1 %3820, %v4107_v48   ;;  %403 = vperm.xlu0 %3819, %v4110_v49  }
  0x51   : > { %398 = vperm.xlu1 %3820, %v4113_v50   ;;  %413 = vperm.xlu0 %3819, %v4116_v51  }
  0x55   : > { %408 = vperm.xlu1 %3820, %v4119_v52   ;;  %423 = vperm.xlu0 %3819, %v4122_v53  }
  0x59   : > { %418 = vperm.xlu1 %3820, %v4125_v54   ;;  %433 = vperm.xlu0 %3819, %v4128_v55  }
  0x5d   : > { %428 = vperm.xlu1 %3820, %v4131_v56   ;;  %443 = vperm.xlu0 %3819, %v4134_v57  }
  0x61   : > { %438 = vperm.xlu1 %3820, %v4137_v58   ;;  %453 = vperm.xlu0 %3819, %v4140_v59  }
  0x65   : > { %448 = vperm.xlu1 %3820, %v4143_v60   ;;  %463 = vperm.xlu0 %3819, %v4146_v61  }
  0x69   : > { %458 = vperm.xlu1 %3820, %v4149_v62   ;;  %573 = vperm.xlu0 %3819, %v539_v63  }
  0x6d   : > { %468 = vperm.xlu1 %3820, %v4153_v0   ;;  %583 = vperm.xlu0 %3819, %v4155_v1  }
  0x71   : > { %578 = vperm.xlu1 %3820, %v540_v2   ;;  %593 = vperm.xlu0 %3819, %v4159_v3   ;;  %v4249_v2 = vld [vmem:[#allocation2 + $0x171] sm:$0xff] }
  0x75   : > { %588 = vperm.xlu1 %3820, %v4161_v4   ;;  %603 = vperm.xlu0 %3819, %v4164_v5  }
  0x79   : > { %598 = vperm.xlu1 %3820, %v4167_v6   ;;  %613 = vperm.xlu0 %3819, %v4170_v7  }
  0x7d   : > { %608 = vperm.xlu1 %3820, %v4173_v8   ;;  %623 = vperm.xlu0 %3819, %v4176_v9  }
  0x81   : > { %618 = vperm.xlu1 %3820, %v4179_v10   ;;  %633 = vperm.xlu0 %3819, %v4182_v11  }
  0x85   : > { %628 = vperm.xlu1 %3820, %v4185_v12   ;;  %643 = vperm.xlu0 %3819, %v4188_v13  }
  0x89   : > { %638 = vperm.xlu1 %3820, %v4191_v14   ;;  %653 = vperm.xlu0 %3819, %v4194_v15  }
  0x8d   : > { %648 = vperm.xlu1 %3820, %v4197_v16   ;;  %663 = vperm.xlu0 %3819, %v4200_v17  }
  0x91   : > { %658 = vperm.xlu1 %3820, %v4203_v18   ;;  %673 = vperm.xlu0 %3819, %v4206_v19  }
  0x95   : > { %668 = vperm.xlu1 %3820, %v4209_v20   ;;  %683 = vperm.xlu0 %3819, %v4212_v21  }
  0x99   : > { %678 = vperm.xlu1 %3820, %v4215_v22   ;;  %693 = vperm.xlu0 %3819, %v4218_v23  }
  0x9d   : > { %688 = vperm.xlu1 %3820, %v4221_v24   ;;  %703 = vperm.xlu0 %3819, %v4224_v25  }
  0x9e   : > { %v4247_v63 = vpop.permute.xlu0 %313 }
  0x9f   : > { %6361 = vst [vmem:[#allocation11_spill] sm:$0xff] %v4247_v63  ;;  %v4263_v63 = vld [vmem:[#allocation2 + $0x22] sm:$0xff] }
  0xa0   : > { %6367 = vst [vmem:[#allocation17_spill] sm:$0xff] %v4263_v63 }
  0xa1   : > { %698 = vperm.xlu1 %3820, %v4227_v29   ;;  %713 = vperm.xlu0 %3819, %v4232_v34   ;;  %v4268_v29 = vld [vmem:[#allocation2 + $0x4a] sm:$0xff] }
  0xa2   : > { %v4254_v34 = vpop.permute.xlu0 %318  ;;  %6369 = vst [vmem:[#allocation19_spill] sm:$0xff] %v4268_v29 }
  0xa3   : > { %6363 = vst [vmem:[#allocation13_spill] sm:$0xff] %v4254_v34 }
  0xa5   : > { %708 = vperm.xlu1 %3820, %v4235_v35   ;;  %723 = vperm.xlu0 %3819, %v4238_v36   ;;  %v800_v35 = vld [vmem:[#allocation2 + $0xa] sm:$0xff]  ;;  %v4259_v36 = vld [vmem:[#allocation2 + $0x32] sm:$0xff] }
  0xa6   : > { %6365 = vst [vmem:[#allocation15_spill] sm:$0xff] %v4259_v36 }
  0xa9   : > { %718 = vperm.xlu1 %3820, %v4243_v38   ;;  %833 = vperm.xlu0 %3819, %v799_v40  }
  0xad   : > { %728 = vperm.xlu1 %3820, %v4249_v2   ;;  %843 = vperm.xlu0 %3819, %v4251_v30   ;;  %v4273_v30 = vld [vmem:[#allocation2 + $0x3a] sm:$0xff] }
  0xae   : > { %6371 = vst [vmem:[#allocation21_spill] sm:$0xff] %v4273_v30 }
  0xb0   : > { %v4257_v37 = vpop.permute.xlu1 %323  ;;  %v4261_v38 = vpop.permute.xlu0 %333 }
  0xb1   : > { %6364 = vst [vmem:[#allocation14_spill] sm:$0xff] %v4257_v37  ;;  %838 = vperm.xlu1 %3820, %v800_v35   ;;  %6366 = vst [vmem:[#allocation16_spill] sm:$0xff] %v4261_v38  ;;  %853 = vperm.xlu0 %3819, %v4259_v36   ;;  %v4278_v35 = vld [vmem:[#allocation2 + $0x62] sm:$0xff]  ;;  %v4283_v36 = vld [vmem:[#allocation2 + $0x52] sm:$0xff] }
  0xb2   : > { %6373 = vst [vmem:[#allocation23_spill] sm:$0xff] %v4278_v35  ;;  %6375 = vst [vmem:[#allocation25_spill] sm:$0xff] %v4283_v36 }
  0xb4   : > { %v4266_v40 = vpop.permute.xlu1 %328  ;;  %v4271_v34 = vpop.permute.xlu0 %343 }
  0xb5   : > { %6368 = vst [vmem:[#allocation18_spill] sm:$0xff] %v4266_v40  ;;  %848 = vperm.xlu1 %3820, %v4263_v63   ;;  %6370 = vst [vmem:[#allocation20_spill] sm:$0xff] %v4271_v34  ;;  %863 = vperm.xlu0 %3819, %v4268_v29   ;;  %v4288_v63 = vld [vmem:[#allocation2 + $0x7a] sm:$0xff]  ;;  %v4293_v29 = vld [vmem:[#allocation2 + $0x6a] sm:$0xff] }
  0xb6   : > { %6377 = vst [vmem:[#allocation27_spill] sm:$0xff] %v4288_v63  ;;  %6379 = vst [vmem:[#allocation29_spill] sm:$0xff] %v4293_v29 }
  0xb8   : > { %v4276_v37 = vpop.permute.xlu1 %338  ;;  %v4281_v38 = vpop.permute.xlu0 %353 }
  0xb9   : > { %6372 = vst [vmem:[#allocation22_spill] sm:$0xff] %v4276_v37  ;;  %858 = vperm.xlu1 %3820, %v4273_v30   ;;  %6374 = vst [vmem:[#allocation24_spill] sm:$0xff] %v4281_v38  ;;  %873 = vperm.xlu0 %3819, %v4278_v35   ;;  %v4298_v30 = vld [vmem:[#allocation2 + $0x92] sm:$0xff]  ;;  %v4303_v35 = vld [vmem:[#allocation2 + $0x82] sm:$0xff] }
  0xba   : > { %6381 = vst [vmem:[#allocation31_spill] sm:$0xff] %v4298_v30  ;;  %6383 = vst [vmem:[#allocation33_spill] sm:$0xff] %v4303_v35 }
  0xbc   : > { %v4286_v40 = vpop.permute.xlu1 %348  ;;  %v4291_v34 = vpop.permute.xlu0 %363 }
  0xbd   : > { %6376 = vst [vmem:[#allocation26_spill] sm:$0xff] %v4286_v40  ;;  %868 = vperm.xlu1 %3820, %v4283_v36   ;;  %6378 = vst [vmem:[#allocation28_spill] sm:$0xff] %v4291_v34  ;;  %883 = vperm.xlu0 %3819, %v4288_v63   ;;  %v4308_v36 = vld [vmem:[#allocation2 + $0xaa] sm:$0xff]  ;;  %v4313_v63 = vld [vmem:[#allocation2 + $0x9a] sm:$0xff] }
  0xbe   : > { %6385 = vst [vmem:[#allocation35_spill] sm:$0xff] %v4308_v36  ;;  %6387 = vst [vmem:[#allocation37_spill] sm:$0xff] %v4313_v63 }
  0xc0   : > { %v4296_v37 = vpop.permute.xlu1 %358  ;;  %v4301_v38 = vpop.permute.xlu0 %373 }
  0xc1   : > { %6380 = vst [vmem:[#allocation30_spill] sm:$0xff] %v4296_v37  ;;  %878 = vperm.xlu1 %3820, %v4293_v29   ;;  %6382 = vst [vmem:[#allocation32_spill] sm:$0xff] %v4301_v38  ;;  %893 = vperm.xlu0 %3819, %v4298_v30   ;;  %v4318_v29 = vld [vmem:[#allocation2 + $0xc2] sm:$0xff]  ;;  %v4323_v30 = vld [vmem:[#allocation2 + $0xb2] sm:$0xff] }
  0xc2   : > { %6389 = vst [vmem:[#allocation39_spill] sm:$0xff] %v4318_v29  ;;  %6391 = vst [vmem:[#allocation41_spill] sm:$0xff] %v4323_v30 }
  0xc4   : > { %v4306_v40 = vpop.permute.xlu1 %368  ;;  %v4311_v34 = vpop.permute.xlu0 %383 }
  0xc5   : > { %6384 = vst [vmem:[#allocation34_spill] sm:$0xff] %v4306_v40  ;;  %888 = vperm.xlu1 %3820, %v4303_v35   ;;  %6386 = vst [vmem:[#allocation36_spill] sm:$0xff] %v4311_v34  ;;  %903 = vperm.xlu0 %3819, %v4308_v36   ;;  %v4328_v35 = vld [vmem:[#allocation2 + $0xda] sm:$0xff]  ;;  %v4333_v36 = vld [vmem:[#allocation2 + $0xca] sm:$0xff] }
  0xc6   : > { %6393 = vst [vmem:[#allocation43_spill] sm:$0xff] %v4328_v35  ;;  %6395 = vst [vmem:[#allocation45_spill] sm:$0xff] %v4333_v36 }
  0xc8   : > { %v4316_v37 = vpop.permute.xlu1 %378  ;;  %v4321_v38 = vpop.permute.xlu0 %393 }
  0xc9   : > { %6388 = vst [vmem:[#allocation38_spill] sm:$0xff] %v4316_v37  ;;  %898 = vperm.xlu1 %3820, %v4313_v63   ;;  %6390 = vst [vmem:[#allocation40_spill] sm:$0xff] %v4321_v38  ;;  %913 = vperm.xlu0 %3819, %v4318_v29   ;;  %v4338_v63 = vld [vmem:[#allocation2 + $0xf2] sm:$0xff]  ;;  %v4343_v29 = vld [vmem:[#allocation2 + $0xe2] sm:$0xff] }
  0xca   : > { %6397 = vst [vmem:[#allocation47_spill] sm:$0xff] %v4338_v63  ;;  %6399 = vst [vmem:[#allocation49_spill] sm:$0xff] %v4343_v29 }
  0xcc   : > { %v4326_v40 = vpop.permute.xlu1 %388  ;;  %v4331_v34 = vpop.permute.xlu0 %403 }
  0xcd   : > { %6392 = vst [vmem:[#allocation42_spill] sm:$0xff] %v4326_v40  ;;  %908 = vperm.xlu1 %3820, %v4323_v30   ;;  %6394 = vst [vmem:[#allocation44_spill] sm:$0xff] %v4331_v34  ;;  %923 = vperm.xlu0 %3819, %v4328_v35   ;;  %v4348_v30 = vld [vmem:[#allocation2 + $0x10a] sm:$0xff]  ;;  %v4353_v35 = vld [vmem:[#allocation2 + $0xfa] sm:$0xff] }
  0xce   : > { %6401 = vst [vmem:[#allocation51_spill] sm:$0xff] %v4348_v30  ;;  %6403 = vst [vmem:[#allocation53_spill] sm:$0xff] %v4353_v35 }
  0xd0   : > { %v4336_v37 = vpop.permute.xlu1 %398  ;;  %v4341_v38 = vpop.permute.xlu0 %413 }
  0xd1   : > { %6396 = vst [vmem:[#allocation46_spill] sm:$0xff] %v4336_v37  ;;  %918 = vperm.xlu1 %3820, %v4333_v36   ;;  %6398 = vst [vmem:[#allocation48_spill] sm:$0xff] %v4341_v38  ;;  %933 = vperm.xlu0 %3819, %v4338_v63   ;;  %v4358_v36 = vld [vmem:[#allocation2 + $0x122] sm:$0xff]  ;;  %v4363_v63 = vld [vmem:[#allocation2 + $0x112] sm:$0xff] }
  0xd2   : > { %6405 = vst [vmem:[#allocation55_spill] sm:$0xff] %v4358_v36  ;;  %6407 = vst [vmem:[#allocation57_spill] sm:$0xff] %v4363_v63 }
  0xd4   : > { %v4346_v40 = vpop.permute.xlu1 %408  ;;  %v4351_v34 = vpop.permute.xlu0 %423 }
  0xd5   : > { %6400 = vst [vmem:[#allocation50_spill] sm:$0xff] %v4346_v40  ;;  %928 = vperm.xlu1 %3820, %v4343_v29   ;;  %6402 = vst [vmem:[#allocation52_spill] sm:$0xff] %v4351_v34  ;;  %943 = vperm.xlu0 %3819, %v4348_v30   ;;  %v4368_v29 = vld [vmem:[#allocation2 + $0x13a] sm:$0xff]  ;;  %v4373_v30 = vld [vmem:[#allocation2 + $0x12a] sm:$0xff] }
  0xd6   : > { %6409 = vst [vmem:[#allocation59_spill] sm:$0xff] %v4368_v29  ;;  %6411 = vst [vmem:[#allocation61_spill] sm:$0xff] %v4373_v30 }
  0xd8   : > { %v4356_v37 = vpop.permute.xlu1 %418  ;;  %v4361_v38 = vpop.permute.xlu0 %433 }
  0xd9   : > { %6404 = vst [vmem:[#allocation54_spill] sm:$0xff] %v4356_v37  ;;  %938 = vperm.xlu1 %3820, %v4353_v35   ;;  %6406 = vst [vmem:[#allocation56_spill] sm:$0xff] %v4361_v38  ;;  %953 = vperm.xlu0 %3819, %v4358_v36   ;;  %v4378_v35 = vld [vmem:[#allocation2 + $0x152] sm:$0xff]  ;;  %v4383_v36 = vld [vmem:[#allocation2 + $0x142] sm:$0xff] }
  0xda   : > { %6414 = vst [vmem:[#allocation64_spill] sm:$0xff] %v4383_v36 }
  0xdc   : > { %v4366_v40 = vpop.permute.xlu1 %428  ;;  %v4371_v34 = vpop.permute.xlu0 %443 }
  0xdd   : > { %6408 = vst [vmem:[#allocation58_spill] sm:$0xff] %v4366_v40  ;;  %948 = vperm.xlu1 %3820, %v4363_v63   ;;  %6410 = vst [vmem:[#allocation60_spill] sm:$0xff] %v4371_v34  ;;  %963 = vperm.xlu0 %3819, %v4368_v29   ;;  %v4388_v63 = vld [vmem:[#allocation2 + $0x16a] sm:$0xff]  ;;  %v4393_v29 = vld [vmem:[#allocation2 + $0x15a] sm:$0xff] }
  0xe0   : > { %v4376_v37 = vpop.permute.xlu1 %438  ;;  %v4381_v38 = vpop.permute.xlu0 %453 }
  0xe1   : > { %6412 = vst [vmem:[#allocation62_spill] sm:$0xff] %v4376_v37  ;;  %958 = vperm.xlu1 %3820, %v4373_v30   ;;  %6413 = vst [vmem:[#allocation63_spill] sm:$0xff] %v4381_v38  ;;  %973 = vperm.xlu0 %3819, %v4378_v35   ;;  %v4401_v30 = vld [vmem:[#allocation2 + $0x172] sm:$0xff] }
  0xe4   : > { %v4386_v40 = vpop.permute.xlu1 %448  ;;  %v4391_v34 = vpop.permute.xlu0 %463 }
  0xe5   : > { %6415 = vst [vmem:[#allocation65_spill] sm:$0xff] %v4386_v40  ;;  %968 = vperm.xlu1 %3820, %v4383_v36   ;;  %6416 = vst [vmem:[#allocation66_spill] sm:$0xff] %v4391_v34  ;;  %983 = vperm.xlu0 %3819, %v4388_v63  }
  0xe8   : > { %v4396_v37 = vpop.permute.xlu1 %458  ;;  %v4399_v38 = vpop.permute.xlu0 %573 }
  0xe9   : > { %6417 = vst [vmem:[#allocation67_spill] sm:$0xff] %v4396_v37  ;;  %978 = vperm.xlu1 %3820, %v4393_v29   ;;  %6418 = vst [vmem:[#allocation68_spill] sm:$0xff] %v4399_v38  ;;  %1093 = vperm.xlu0 %3819, %v4047_v26  }
  0xec   : > { %v4404_v40 = vpop.permute.xlu1 %468  ;;  %v4407_v36 = vpop.permute.xlu0 %583 }
  0xed   : > { %6419 = vst [vmem:[#allocation69_spill] sm:$0xff] %v4404_v40  ;;  %988 = vperm.xlu1 %3820, %v4401_v30   ;;  %1103 = vperm.xlu0 %3819, %v4049_v27  }
  0xf0   : > { %v4410_v34 = vpop.permute.xlu1 %578  ;;  %v4413_v37 = vpop.permute.xlu0 %593 }
  0xf1   : > { %1098 = vperm.xlu1 %3820, %v4055_v28   ;;  %1113 = vperm.xlu0 %3819, %v4062_v31  }
  0xf4   : > { %v4416_v38 = vpop.permute.xlu1 %588  ;;  %v4419_v26 = vpop.permute.xlu0 %603 }
  0xf5   : > { %6420 = vst [vmem:[#allocation70_spill] sm:$0xff] %v4416_v38  ;;  %1108 = vperm.xlu1 %3820, %v4065_v32   ;;  %1123 = vperm.xlu0 %3819, %v4068_v33   ;;  %v4490_v38 = vld [vmem:[#allocation2 + $0x180] sm:$0xff] }
  0xf8   : > { %v4422_v40 = vpop.permute.xlu1 %598  ;;  %v4425_v27 = vpop.permute.xlu0 %613 }
  0xf9   : > { %1118 = vperm.xlu1 %3820, %v4079_v39   ;;  %1133 = vperm.xlu0 %3819, %v4086_v41  }
  0xfc   : > { %v4428_v28 = vpop.permute.xlu1 %608  ;;  %v4431_v31 = vpop.permute.xlu0 %623 }
  0xfd   : > { %1128 = vperm.xlu1 %3820, %v4089_v42   ;;  %1143 = vperm.xlu0 %3819, %v4092_v43  }
 0x100   : > { %v4434_v32 = vpop.permute.xlu1 %618  ;;  %v4437_v33 = vpop.permute.xlu0 %633 }
 0x101   : > { %1138 = vperm.xlu1 %3820, %v4095_v44   ;;  %1153 = vperm.xlu0 %3819, %v4098_v45  }
 0x104   : > { %v4440_v39 = vpop.permute.xlu1 %628  ;;  %v4443_v41 = vpop.permute.xlu0 %643 }
 0x105   : > { %1148 = vperm.xlu1 %3820, %v4101_v46   ;;  %1163 = vperm.xlu0 %3819, %v4104_v47  }
 0x108   : > { %v4446_v42 = vpop.permute.xlu1 %638  ;;  %v4449_v43 = vpop.permute.xlu0 %653 }
 0x109   : > { %1158 = vperm.xlu1 %3820, %v4107_v48   ;;  %1173 = vperm.xlu0 %3819, %v4110_v49  }
 0x10c   : > { %v4452_v44 = vpop.permute.xlu1 %648  ;;  %v4455_v45 = vpop.permute.xlu0 %663 }
 0x10d   : > { %1168 = vperm.xlu1 %3820, %v4113_v50   ;;  %1183 = vperm.xlu0 %3819, %v4116_v51  }
 0x110   : > { %v4458_v46 = vpop.permute.xlu1 %658  ;;  %v4461_v47 = vpop.permute.xlu0 %673 }
 0x111   : > { %1178 = vperm.xlu1 %3820, %v4119_v52   ;;  %1193 = vperm.xlu0 %3819, %v4122_v53  }
 0x114   : > { %v4464_v48 = vpop.permute.xlu1 %668  ;;  %v4467_v49 = vpop.permute.xlu0 %683 }
 0x115   : > { %1188 = vperm.xlu1 %3820, %v4125_v54   ;;  %1203 = vperm.xlu0 %3819, %v4128_v55  }
 0x118   : > { %v4470_v50 = vpop.permute.xlu1 %678  ;;  %v4473_v51 = vpop.permute.xlu0 %693 }
 0x119   : > { %1198 = vperm.xlu1 %3820, %v4131_v56   ;;  %1213 = vperm.xlu0 %3819, %v4134_v57  }
 0x11c   : > { %v4476_v52 = vpop.permute.xlu1 %688  ;;  %v4479_v53 = vpop.permute.xlu0 %703 }
 0x11d   : > { %1208 = vperm.xlu1 %3820, %v4137_v58   ;;  %1223 = vperm.xlu0 %3819, %v4140_v59  }
 0x120   : > { %v4482_v54 = vpop.permute.xlu1 %698  ;;  %v4485_v55 = vpop.permute.xlu0 %713 }
 0x121   : > { %1218 = vperm.xlu1 %3820, %v4143_v60   ;;  %1233 = vperm.xlu0 %3819, %v4146_v61   ;;  %v4501_v60 = vld [vmem:[#allocation2 + $0x188] sm:$0xff] }
 0x124   : > { %v4488_v56 = vpop.permute.xlu1 %708  ;;  %v4493_v57 = vpop.permute.xlu0 %723 }
 0x125   : > { %6421 = vst [vmem:[#allocation71_spill] sm:$0xff] %v4488_v56  ;;  %1228 = vperm.xlu1 %3820, %v4149_v62   ;;  %6422 = vst [vmem:[#allocation72_spill] sm:$0xff] %v4493_v57  ;;  %1243 = vperm.xlu0 %3819, %v4490_v38   ;;  %v6628_v57 = vld [vmem:[#allocation63_spill] sm:$0xff] }
 0x128   : > { %v4496_v58 = vpop.permute.xlu1 %718  ;;  %v4499_v59 = vpop.permute.xlu0 %833 }
 0x129   : > { %6423 = vst [vmem:[#allocation73_spill] sm:$0xff] %v4496_v58  ;;  %1238 = vperm.xlu1 %3820, %v4153_v0   ;;  %6424 = vst [vmem:[#allocation74_spill] sm:$0xff] %v4499_v59  ;;  %1353 = vperm.xlu0 %3819, %v4155_v1   ;;  %v6626_v59 = vld [vmem:[#allocation68_spill] sm:$0xff] }
 0x12c   : > { %v4504_v61 = vpop.permute.xlu1 %728  ;;  %v4507_v56 = vpop.permute.xlu0 %843 }
 0x12d   : > { %6425 = vst [vmem:[#allocation75_spill] sm:$0xff] %v4504_v61  ;;  %1248 = vperm.xlu1 %3820, %v4501_v60   ;;  %6426 = vst [vmem:[#allocation76_spill] sm:$0xff] %v4507_v56  ;;  %1363 = vperm.xlu0 %3819, %v4159_v3  }
 0x130   : > { %v4510_v62 = vpop.permute.xlu1 %838  ;;  %v4513_v58 = vpop.permute.xlu0 %853 }
 0x131   : > { %6427 = vst [vmem:[#allocation77_spill] sm:$0xff] %v4510_v62  ;;  %1358 = vperm.xlu1 %3820, %v4161_v4   ;;  %6428 = vst [vmem:[#allocation78_spill] sm:$0xff] %v4513_v58  ;;  %1373 = vperm.xlu0 %3819, %v4164_v5   ;;  %v2370_v58 = vld [vmem:[#allocation2 + $0xaa] sm:$0xff] }
 0x132   : > { %v6622_v62 = vld [vmem:[#allocation58_spill] sm:$0xff] }
 0x134   : > { %v4516_v0 = vpop.permute.xlu1 %848  ;;  %v4519_v1 = vpop.permute.xlu0 %863 }
 0x135   : > { %6429 = vst [vmem:[#allocation79_spill] sm:$0xff] %v4516_v0  ;;  %1368 = vperm.xlu1 %3820, %v4167_v6   ;;  %6430 = vst [vmem:[#allocation80_spill] sm:$0xff] %v4519_v1  ;;  %1383 = vperm.xlu0 %3819, %v4170_v7   ;;  %v6450_v0 = vld [vmem:[#allocation6_spill] sm:$0xff] }
 0x138   : > { %v4522_v61 = vpop.permute.xlu1 %858  ;;  %v4525_v3 = vpop.permute.xlu0 %873 }
 0x139   : > { %6431 = vst [vmem:[#allocation81_spill] sm:$0xff] %v4522_v61  ;;  %1378 = vperm.xlu1 %3820, %v4173_v8   ;;  %6432 = vst [vmem:[#allocation82_spill] sm:$0xff] %v4525_v3  ;;  %1393 = vperm.xlu0 %3819, %v4176_v9   ;;  %v6617_v3 = vld [vmem:[#allocation52_spill] sm:$0xff]  ;;  %v6618_v61 = vld [vmem:[#allocation54_spill] sm:$0xff] }
 0x13c   : > { %v4528_v4 = vpop.permute.xlu1 %868  ;;  %v4531_v5 = vpop.permute.xlu0 %883 }
 0x13d   : > { %6433 = vst [vmem:[#allocation83_spill] sm:$0xff] %v4528_v4  ;;  %1388 = vperm.xlu1 %3820, %v4179_v10   ;;  %6434 = vst [vmem:[#allocation84_spill] sm:$0xff] %v4531_v5  ;;  %1403 = vperm.xlu0 %3819, %v4182_v11  }
 0x140   : > { %v4534_v6 = vpop.permute.xlu1 %878  ;;  %v4537_v7 = vpop.permute.xlu0 %893 }
 0x141   : > { %6435 = vst [vmem:[#allocation85_spill] sm:$0xff] %v4534_v6  ;;  %1398 = vperm.xlu1 %3820, %v4185_v12   ;;  %6436 = vst [vmem:[#allocation86_spill] sm:$0xff] %v4537_v7  ;;  %1413 = vperm.xlu0 %3819, %v4188_v13  }
 0x144   : > { %v4540_v8 = vpop.permute.xlu1 %888  ;;  %v4543_v9 = vpop.permute.xlu0 %903 }
 0x145   : > { %6437 = vst [vmem:[#allocation87_spill] sm:$0xff] %v4540_v8  ;;  %1408 = vperm.xlu1 %3820, %v4191_v14   ;;  %6438 = vst [vmem:[#allocation88_spill] sm:$0xff] %v4543_v9  ;;  %1423 = vperm.xlu0 %3819, %v4194_v15   ;;  %v6609_v9 = vld [vmem:[#allocation38_spill] sm:$0xff]  ;;  %v6610_v8 = vld [vmem:[#allocation40_spill] sm:$0xff] }
 0x148   : > { %v4546_v10 = vpop.permute.xlu1 %898  ;;  %v4549_v11 = vpop.permute.xlu0 %913 }
 0x149   : > { %6439 = vst [vmem:[#allocation89_spill] sm:$0xff] %v4546_v10  ;;  %1418 = vperm.xlu1 %3820, %v4197_v16   ;;  %6440 = vst [vmem:[#allocation90_spill] sm:$0xff] %v4549_v11  ;;  %1433 = vperm.xlu0 %3819, %v4200_v17   ;;  %v6606_v11 = vld [vmem:[#allocation32_spill] sm:$0xff] }
 0x14a   : > { %v6608_v10 = vld [vmem:[#allocation36_spill] sm:$0xff] }
 0x14c   : > { %v4552_v12 = vpop.permute.xlu1 %908  ;;  %v4555_v13 = vpop.permute.xlu0 %923 }
 0x14d   : > { %6441 = vst [vmem:[#allocation91_spill] sm:$0xff] %v4552_v12  ;;  %1428 = vperm.xlu1 %3820, %v4203_v18   ;;  %6442 = vst [vmem:[#allocation92_spill] sm:$0xff] %v4555_v13  ;;  %1443 = vperm.xlu0 %3819, %v4206_v19  }
 0x150   : > { %v4558_v14 = vpop.permute.xlu1 %918  ;;  %v4561_v15 = vpop.permute.xlu0 %933 }
 0x151   : > { %6443 = vst [vmem:[#allocation93_spill] sm:$0xff] %v4558_v14  ;;  %1438 = vperm.xlu1 %3820, %v4209_v20   ;;  %6444 = vst [vmem:[#allocation94_spill] sm:$0xff] %v4561_v15  ;;  %1453 = vperm.xlu0 %3819, %v4212_v21   ;;  %v6600_v14 = vld [vmem:[#allocation22_spill] sm:$0xff] }
 0x154   : > { %v4564_v16 = vpop.permute.xlu1 %928  ;;  %v4567_v17 = vpop.permute.xlu0 %943 }
 0x155   : > { %6445 = vst [vmem:[#allocation95_spill] sm:$0xff] %v4564_v16  ;;  %1448 = vperm.xlu1 %3820, %v4215_v22   ;;  %6446 = vst [vmem:[#allocation96_spill] sm:$0xff] %v4567_v17  ;;  %1463 = vperm.xlu0 %3819, %v4218_v23   ;;  %v6452_v16 = vld [vmem:[#allocation7_spill] sm:$0xff]  ;;  %v6454_v17 = vld [vmem:[#allocation8_spill] sm:$0xff] }
 0x158   : > { %v4570_v18 = vpop.permute.xlu1 %938  ;;  %v4573_v19 = vpop.permute.xlu0 %953 }
 0x159   : > { %6447 = vst [vmem:[#allocation97_spill] sm:$0xff] %v4570_v18  ;;  %1458 = vperm.xlu1 %3820, %v4221_v24   ;;  %6448 = vst [vmem:[#allocation98_spill] sm:$0xff] %v4573_v19  ;;  %1473 = vperm.xlu0 %3819, %v4224_v25   ;;  %v6456_v18 = vld [vmem:[#allocation9_spill] sm:$0xff]  ;;  %v6458_v25 = vld [vmem:[#allocation10_spill] sm:$0xff] }
 0x15a   : > { %v4590_v19 = vld [vmem:[#allocation2 + $0x181] sm:$0xff] }
 0x15c   : > { %v4576_v20 = vpop.permute.xlu1 %948  ;;  %v4579_v21 = vpop.permute.xlu0 %963 }
 0x15d   : > { %6449 = vst [vmem:[#allocation99_spill] sm:$0xff] %v4576_v20  ;;  %1468 = vperm.xlu1 %3820, %v6450_v0   ;;  %6451 = vst [vmem:[#allocation6_spill] sm:$0xff] %v4579_v21  ;;  %1483 = vperm.xlu0 %3819, %v6452_v16   ;;  %v6471_v21 = vld [vmem:[#allocation21_spill] sm:$0xff] }
 0x160   : > { %v4582_v22 = vpop.permute.xlu1 %958  ;;  %v4585_v23 = vpop.permute.xlu0 %973 }
 0x161   : > { %6453 = vst [vmem:[#allocation7_spill] sm:$0xff] %v4582_v22  ;;  %1478 = vperm.xlu1 %3820, %v6454_v17   ;;  %6455 = vst [vmem:[#allocation8_spill] sm:$0xff] %v4585_v23  ;;  %1493 = vperm.xlu0 %3819, %v6456_v18   ;;  %v4601_v17 = vld [vmem:[#allocation2 + $0x189] sm:$0xff]  ;;  %v6462_v23 = vld [vmem:[#allocation12_spill] sm:$0xff] }
 0x162   : > { %v6467_v22 = vld [vmem:[#allocation17_spill] sm:$0xff] }
 0x164   : > { %v4588_v24 = vpop.permute.xlu1 %968  ;;  %v4593_v20 = vpop.permute.xlu0 %983 }
 0x165   : > { %6457 = vst [vmem:[#allocation9_spill] sm:$0xff] %v4588_v24  ;;  %1488 = vperm.xlu1 %3820, %v6458_v25   ;;  %6459 = vst [vmem:[#allocation10_spill] sm:$0xff] %v4593_v20  ;;  %1503 = vperm.xlu0 %3819, %v4590_v19   ;;  %v6465_v25 = vld [vmem:[#allocation15_spill] sm:$0xff] }
 0x168   : > { %v4596_v0 = vpop.permute.xlu1 %978  ;;  %v4599_v16 = vpop.permute.xlu0 %1093 }
 0x169   : > { %6460 = vst [vmem:[#allocation100_spill] sm:$0xff] %v4596_v0  ;;  %1498 = vperm.xlu1 %3820, %v4249_v2   ;;  %6461 = vst [vmem:[#allocation101_spill] sm:$0xff] %v4599_v16  ;;  %1613 = vperm.xlu0 %3819, %v6462_v23   ;;  %v6469_v2 = vld [vmem:[#allocation19_spill] sm:$0xff] }
 0x16c   : > { %v4604_v18 = vpop.permute.xlu1 %988  ;;  %v4607_v24 = vpop.permute.xlu0 %1103 }
 0x16d   : > { %6463 = vst [vmem:[#allocation12_spill] sm:$0xff] %v4604_v18  ;;  %1508 = vperm.xlu1 %3820, %v4601_v17   ;;  %6464 = vst [vmem:[#allocation102_spill] sm:$0xff] %v4607_v24  ;;  %1623 = vperm.xlu0 %3819, %v6465_v25   ;;  %v6473_v18 = vld [vmem:[#allocation23_spill] sm:$0xff]  ;;  %v6475_v24 = vld [vmem:[#allocation25_spill] sm:$0xff] }
 0x170   : > { %v4610_v20 = vpop.permute.xlu1 %1098  ;;  %v4613_v0 = vpop.permute.xlu0 %1113 }
 0x171   : > { %6466 = vst [vmem:[#allocation15_spill] sm:$0xff] %v4610_v20  ;;  %1618 = vperm.xlu1 %3820, %v6467_v22   ;;  %6468 = vst [vmem:[#allocation17_spill] sm:$0xff] %v4613_v0  ;;  %1633 = vperm.xlu0 %3819, %v6469_v2   ;;  %v6477_v20 = vld [vmem:[#allocation27_spill] sm:$0xff]  ;;  %v6479_v0 = vld [vmem:[#allocation29_spill] sm:$0xff] }
 0x174   : > { %v4616_v16 = vpop.permute.xlu1 %1108  ;;  %v4619_v23 = vpop.permute.xlu0 %1123 }
 0x175   : > { %6470 = vst [vmem:[#allocation19_spill] sm:$0xff] %v4616_v16  ;;  %1628 = vperm.xlu1 %3820, %v6471_v21   ;;  %6472 = vst [vmem:[#allocation21_spill] sm:$0xff] %v4619_v23  ;;  %1643 = vperm.xlu0 %3819, %v6473_v18   ;;  %v6481_v16 = vld [vmem:[#allocation31_spill] sm:$0xff]  ;;  %v6483_v23 = vld [vmem:[#allocation33_spill] sm:$0xff] }
 0x178   : > { %v4622_v15 = vpop.permute.xlu1 %1118  ;;  %v4625_v25 = vpop.permute.xlu0 %1133 }
 0x179   : > { %6474 = vst [vmem:[#allocation23_spill] sm:$0xff] %v4622_v15  ;;  %1638 = vperm.xlu1 %3820, %v6475_v24   ;;  %6476 = vst [vmem:[#allocation25_spill] sm:$0xff] %v4625_v25  ;;  %1653 = vperm.xlu0 %3819, %v6477_v20   ;;  %v6485_v15 = vld [vmem:[#allocation35_spill] sm:$0xff]  ;;  %v6487_v25 = vld [vmem:[#allocation37_spill] sm:$0xff] }
 0x17c   : > { %v4628_v22 = vpop.permute.xlu1 %1128  ;;  %v4631_v2 = vpop.permute.xlu0 %1143 }
 0x17d   : > { %6478 = vst [vmem:[#allocation27_spill] sm:$0xff] %v4628_v22  ;;  %1648 = vperm.xlu1 %3820, %v6479_v0   ;;  %6480 = vst [vmem:[#allocation29_spill] sm:$0xff] %v4631_v2  ;;  %1663 = vperm.xlu0 %3819, %v6481_v16   ;;  %v6489_v22 = vld [vmem:[#allocation39_spill] sm:$0xff]  ;;  %v6491_v2 = vld [vmem:[#allocation41_spill] sm:$0xff] }
 0x180   : > { %v4634_v21 = vpop.permute.xlu1 %1138  ;;  %v4637_v18 = vpop.permute.xlu0 %1153 }
 0x181   : > { %6482 = vst [vmem:[#allocation31_spill] sm:$0xff] %v4634_v21  ;;  %1658 = vperm.xlu1 %3820, %v6483_v23   ;;  %6484 = vst [vmem:[#allocation33_spill] sm:$0xff] %v4637_v18  ;;  %1673 = vperm.xlu0 %3819, %v6485_v15   ;;  %v6493_v21 = vld [vmem:[#allocation43_spill] sm:$0xff]  ;;  %v6495_v18 = vld [vmem:[#allocation45_spill] sm:$0xff] }
 0x184   : > { %v4640_v24 = vpop.permute.xlu1 %1148  ;;  %v4643_v20 = vpop.permute.xlu0 %1163 }
 0x185   : > { %6486 = vst [vmem:[#allocation35_spill] sm:$0xff] %v4640_v24  ;;  %1668 = vperm.xlu1 %3820, %v6487_v25   ;;  %6488 = vst [vmem:[#allocation37_spill] sm:$0xff] %v4643_v20  ;;  %1683 = vperm.xlu0 %3819, %v6489_v22   ;;  %v6497_v24 = vld [vmem:[#allocation47_spill] sm:$0xff]  ;;  %v6499_v20 = vld [vmem:[#allocation49_spill] sm:$0xff] }
 0x188   : > { %v4646_v0 = vpop.permute.xlu1 %1158  ;;  %v4649_v16 = vpop.permute.xlu0 %1173 }
 0x189   : > { %6490 = vst [vmem:[#allocation39_spill] sm:$0xff] %v4646_v0  ;;  %1678 = vperm.xlu1 %3820, %v6491_v2   ;;  %6492 = vst [vmem:[#allocation41_spill] sm:$0xff] %v4649_v16  ;;  %1693 = vperm.xlu0 %3819, %v6493_v21   ;;  %v6501_v0 = vld [vmem:[#allocation51_spill] sm:$0xff]  ;;  %v6503_v16 = vld [vmem:[#allocation53_spill] sm:$0xff] }
 0x18c   : > { %v4652_v23 = vpop.permute.xlu1 %1168  ;;  %v4655_v15 = vpop.permute.xlu0 %1183 }
 0x18d   : > { %6494 = vst [vmem:[#allocation43_spill] sm:$0xff] %v4652_v23  ;;  %1688 = vperm.xlu1 %3820, %v6495_v18   ;;  %6496 = vst [vmem:[#allocation45_spill] sm:$0xff] %v4655_v15  ;;  %1703 = vperm.xlu0 %3819, %v6497_v24   ;;  %v6505_v23 = vld [vmem:[#allocation55_spill] sm:$0xff]  ;;  %v6507_v15 = vld [vmem:[#allocation57_spill] sm:$0xff] }
 0x190   : > { %v4658_v25 = vpop.permute.xlu1 %1178  ;;  %v4661_v22 = vpop.permute.xlu0 %1193 }
 0x191   : > { %6498 = vst [vmem:[#allocation47_spill] sm:$0xff] %v4658_v25  ;;  %1698 = vperm.xlu1 %3820, %v6499_v20   ;;  %6500 = vst [vmem:[#allocation49_spill] sm:$0xff] %v4661_v22  ;;  %1713 = vperm.xlu0 %3819, %v6501_v0   ;;  %v6509_v25 = vld [vmem:[#allocation59_spill] sm:$0xff]  ;;  %v6511_v22 = vld [vmem:[#allocation61_spill] sm:$0xff] }
 0x194   : > { %v4664_v2 = vpop.permute.xlu1 %1188  ;;  %v4667_v21 = vpop.permute.xlu0 %1203 }
 0x195   : > { %6502 = vst [vmem:[#allocation51_spill] sm:$0xff] %v4664_v2  ;;  %1708 = vperm.xlu1 %3820, %v6503_v16   ;;  %6504 = vst [vmem:[#allocation53_spill] sm:$0xff] %v4667_v21  ;;  %1723 = vperm.xlu0 %3819, %v6505_v23   ;;  %v6514_v21 = vld [vmem:[#allocation64_spill] sm:$0xff]  ;;  %v1845_v2 = vld [vmem:[#allocation2 + $0x68] sm:$0xff] }
 0x198   : > { %v4670_v18 = vpop.permute.xlu1 %1198  ;;  %v4673_v24 = vpop.permute.xlu0 %1213 }
 0x199   : > { %6506 = vst [vmem:[#allocation55_spill] sm:$0xff] %v4670_v18  ;;  %1718 = vperm.xlu1 %3820, %v6507_v15   ;;  %6508 = vst [vmem:[#allocation57_spill] sm:$0xff] %v4673_v24  ;;  %1733 = vperm.xlu0 %3819, %v6509_v25   ;;  %v4690_v24 = vld [vmem:[#allocation2 + $0x182] sm:$0xff] }
 0x19a   : > { %6517 = vst [vmem:[#allocation105_spill] sm:$0xff] %v4690_v24 }
 0x19c   : > { %v4676_v20 = vpop.permute.xlu1 %1208  ;;  %v4679_v0 = vpop.permute.xlu0 %1223 }
 0x19d   : > { %6510 = vst [vmem:[#allocation59_spill] sm:$0xff] %v4676_v20  ;;  %1728 = vperm.xlu1 %3820, %v6511_v22   ;;  %6512 = vst [vmem:[#allocation61_spill] sm:$0xff] %v4679_v0  ;;  %1743 = vperm.xlu0 %3819, %v4378_v35   ;;  %v1840_v35 = vld [vmem:[#allocation2 + $0x30] sm:$0xff] }
 0x1a0   : > { %v4682_v16 = vpop.permute.xlu1 %1218  ;;  %v4685_v23 = vpop.permute.xlu0 %1233 }
 0x1a1   : > { %6513 = vst [vmem:[#allocation103_spill] sm:$0xff] %v4682_v16  ;;  %1738 = vperm.xlu1 %3820, %v6514_v21   ;;  %6515 = vst [vmem:[#allocation64_spill] sm:$0xff] %v4685_v23  ;;  %1753 = vperm.xlu0 %3819, %v4388_v63   ;;  %v4701_v23 = vld [vmem:[#allocation2 + $0x18a] sm:$0xff]  ;;  %v1841_v16 = vld [vmem:[#allocation2 + $0x38] sm:$0xff] }
 0x1a2   : > { %6521 = vst [vmem:[#allocation109_spill] sm:$0xff] %v4701_v23 }
 0x1a4   : > { %v4688_v15 = vpop.permute.xlu1 %1228  ;;  %v4693_v25 = vpop.permute.xlu0 %1243 }
 0x1a5   : > { %6516 = vst [vmem:[#allocation104_spill] sm:$0xff] %v4688_v15  ;;  %1748 = vperm.xlu1 %3820, %v4393_v29   ;;  %6518 = vst [vmem:[#allocation106_spill] sm:$0xff] %v4693_v25  ;;  %1763 = vperm.xlu0 %3819, %v4690_v24   ;;  %v1842_v15 = vld [vmem:[#allocation2 + $0x48] sm:$0xff]  ;;  %v6601_v24 = vld [vmem:[#allocation24_spill] sm:$0xff] }
 0x1a8   : > { %v4696_v22 = vpop.permute.xlu1 %1238  ;;  %v4699_v21 = vpop.permute.xlu0 %1353 }
 0x1a9   : > { %6519 = vst [vmem:[#allocation107_spill] sm:$0xff] %v4696_v22  ;;  %1758 = vperm.xlu1 %3820, %v4401_v30   ;;  %6520 = vst [vmem:[#allocation108_spill] sm:$0xff] %v4699_v21  ;;  %1874 = vperm.xlu0 %3819, %v1840_v35   ;;  %v1844_v22 = vld [vmem:[#allocation2 + $0x60] sm:$0xff]  ;;  %v1843_v30 = vld [vmem:[#allocation2 + $0x50] sm:$0xff] }
 0x1aa   : > { %v1846_v35 = vld [vmem:[#allocation2 + $0x78] sm:$0xff]  ;;  %v6594_v21 = vld [vmem:[#allocation13_spill] sm:$0xff] }
 0x1ac   : > { %v4703_v63 = vpop.permute.xlu1 %1248  ;;  %v4706_v29 = vpop.permute.xlu0 %1363 }
 0x1ad   : > { %6522 = vst [vmem:[#allocation110_spill] sm:$0xff] %v4703_v63  ;;  %1768 = vperm.xlu1 %3820, %v4701_v23   ;;  %6523 = vst [vmem:[#allocation111_spill] sm:$0xff] %v4706_v29  ;;  %1884 = vperm.xlu0 %3819, %v1842_v15   ;;  %v1848_v29 = vld [vmem:[#allocation2 + $0x90] sm:$0xff] }
 0x1b0   : > { %v4708_v0 = vpop.permute.xlu1 %1358  ;;  %v4710_v20 = vpop.permute.xlu0 %1373 }
 0x1b1   : > { %6524 = vst [vmem:[#allocation112_spill] sm:$0xff] %v4708_v0  ;;  %1879 = vperm.xlu1 %3820, %v1841_v16   ;;  %6525 = vst [vmem:[#allocation113_spill] sm:$0xff] %v4710_v20  ;;  %1894 = vperm.xlu0 %3819, %v1844_v22   ;;  %v1847_v0 = vld [vmem:[#allocation2 + $0x80] sm:$0xff]  ;;  %v1850_v20 = vld [vmem:[#allocation2 + $0xa8] sm:$0xff] }
 0x1b4   : > { %v4712_v18 = vpop.permute.xlu1 %1368  ;;  %v4714_v63 = vpop.permute.xlu0 %1383 }
 0x1b5   : > { %6526 = vst [vmem:[#allocation114_spill] sm:$0xff] %v4712_v18  ;;  %1889 = vperm.xlu1 %3820, %v1843_v30   ;;  %6527 = vst [vmem:[#allocation115_spill] sm:$0xff] %v4714_v63  ;;  %1904 = vperm.xlu0 %3819, %v1846_v35   ;;  %v1849_v18 = vld [vmem:[#allocation2 + $0x98] sm:$0xff]  ;;  %v1852_v63 = vld [vmem:[#allocation2 + $0xc0] sm:$0xff] }
 0x1b8   : > { %v4716_v23 = vpop.permute.xlu1 %1378  ;;  %v4718_v15 = vpop.permute.xlu0 %1393 }
 0x1b9   : > { %6528 = vst [vmem:[#allocation116_spill] sm:$0xff] %v4716_v23  ;;  %1899 = vperm.xlu1 %3820, %v1845_v2   ;;  %6529 = vst [vmem:[#allocation117_spill] sm:$0xff] %v4718_v15  ;;  %1914 = vperm.xlu0 %3819, %v1848_v29   ;;  %v1851_v23 = vld [vmem:[#allocation2 + $0xb0] sm:$0xff]  ;;  %v1854_v15 = vld [vmem:[#allocation2 + $0xd8] sm:$0xff] }
 0x1bc   : > { %v4720_v16 = vpop.permute.xlu1 %1388  ;;  %v4722_v22 = vpop.permute.xlu0 %1403 }
 0x1bd   : > { %6530 = vst [vmem:[#allocation118_spill] sm:$0xff] %v4720_v16  ;;  %1909 = vperm.xlu1 %3820, %v1847_v0   ;;  %6531 = vst [vmem:[#allocation119_spill] sm:$0xff] %v4722_v22  ;;  %1924 = vperm.xlu0 %3819, %v1850_v20   ;;  %v1853_v16 = vld [vmem:[#allocation2 + $0xc8] sm:$0xff]  ;;  %v1856_v22 = vld [vmem:[#allocation2 + $0xf0] sm:$0xff] }
 0x1c0   : > { %v4724_v30 = vpop.permute.xlu1 %1398  ;;  %v4726_v35 = vpop.permute.xlu0 %1413 }
 0x1c1   : > { %6532 = vst [vmem:[#allocation120_spill] sm:$0xff] %v4724_v30  ;;  %1919 = vperm.xlu1 %3820, %v1849_v18   ;;  %6533 = vst [vmem:[#allocation121_spill] sm:$0xff] %v4726_v35  ;;  %1934 = vperm.xlu0 %3819, %v1852_v63   ;;  %v1855_v30 = vld [vmem:[#allocation2 + $0xe0] sm:$0xff]  ;;  %v1858_v35 = vld [vmem:[#allocation2 + $0x108] sm:$0xff] }
 0x1c4   : > { %v4728_v2 = vpop.permute.xlu1 %1408  ;;  %v4730_v29 = vpop.permute.xlu0 %1423 }
 0x1c5   : > { %6534 = vst [vmem:[#allocation122_spill] sm:$0xff] %v4728_v2  ;;  %1929 = vperm.xlu1 %3820, %v1851_v23   ;;  %6535 = vst [vmem:[#allocation123_spill] sm:$0xff] %v4730_v29  ;;  %1944 = vperm.xlu0 %3819, %v1854_v15   ;;  %v1857_v2 = vld [vmem:[#allocation2 + $0xf8] sm:$0xff]  ;;  %v1860_v29 = vld [vmem:[#allocation2 + $0x120] sm:$0xff] }
 0x1c8   : > { %v4732_v0 = vpop.permute.xlu1 %1418  ;;  %v4734_v20 = vpop.permute.xlu0 %1433 }
 0x1c9   : > { %6536 = vst [vmem:[#allocation124_spill] sm:$0xff] %v4732_v0  ;;  %1939 = vperm.xlu1 %3820, %v1853_v16   ;;  %6537 = vst [vmem:[#allocation125_spill] sm:$0xff] %v4734_v20  ;;  %1954 = vperm.xlu0 %3819, %v1856_v22   ;;  %v1859_v0 = vld [vmem:[#allocation2 + $0x110] sm:$0xff]  ;;  %v1862_v20 = vld [vmem:[#allocation2 + $0x138] sm:$0xff] }
 0x1cc   : > { %v4736_v18 = vpop.permute.xlu1 %1428  ;;  %v4738_v63 = vpop.permute.xlu0 %1443 }
 0x1cd   : > { %6538 = vst [vmem:[#allocation126_spill] sm:$0xff] %v4736_v18  ;;  %1949 = vperm.xlu1 %3820, %v1855_v30   ;;  %6539 = vst [vmem:[#allocation127_spill] sm:$0xff] %v4738_v63  ;;  %1964 = vperm.xlu0 %3819, %v1858_v35   ;;  %v1861_v18 = vld [vmem:[#allocation2 + $0x128] sm:$0xff]  ;;  %v1864_v63 = vld [vmem:[#allocation2 + $0x150] sm:$0xff] }
 0x1d0   : > { %v4740_v23 = vpop.permute.xlu1 %1438  ;;  %v4742_v15 = vpop.permute.xlu0 %1453 }
 0x1d1   : > { %6540 = vst [vmem:[#allocation128_spill] sm:$0xff] %v4740_v23  ;;  %1959 = vperm.xlu1 %3820, %v1857_v2   ;;  %6541 = vst [vmem:[#allocation129_spill] sm:$0xff] %v4742_v15  ;;  %1974 = vperm.xlu0 %3819, %v1860_v29   ;;  %v1863_v23 = vld [vmem:[#allocation2 + $0x140] sm:$0xff]  ;;  %v1866_v15 = vld [vmem:[#allocation2 + $0x168] sm:$0xff] }
 0x1d4   : > { %v4744_v16 = vpop.permute.xlu1 %1448  ;;  %v4746_v22 = vpop.permute.xlu0 %1463 }
 0x1d5   : > { %6542 = vst [vmem:[#allocation130_spill] sm:$0xff] %v4744_v16  ;;  %1969 = vperm.xlu1 %3820, %v1859_v0   ;;  %6543 = vst [vmem:[#allocation131_spill] sm:$0xff] %v4746_v22  ;;  %1984 = vperm.xlu0 %3819, %v1862_v20   ;;  %v1865_v16 = vld [vmem:[#allocation2 + $0x158] sm:$0xff] }
 0x1d6   : > { %v2106_v22 = vld [vmem:[#allocation2 + $0x79] sm:$0xff] }
 0x1d8   : > { %v4748_v30 = vpop.permute.xlu1 %1458  ;;  %v4750_v35 = vpop.permute.xlu0 %1473 }
 0x1d9   : > { %6544 = vst [vmem:[#allocation132_spill] sm:$0xff] %v4748_v30  ;;  %1979 = vperm.xlu1 %3820, %v1861_v18   ;;  %6545 = vst [vmem:[#allocation133_spill] sm:$0xff] %v4750_v35  ;;  %1994 = vperm.xlu0 %3819, %v1864_v63   ;;  %v1867_v30 = vld [vmem:[#allocation2 + $0x170] sm:$0xff]  ;;  %v1870_v35 = vld [vmem:[#allocation2 + $0x198] sm:$0xff] }
 0x1dc   : > { %v4752_v2 = vpop.permute.xlu1 %1468  ;;  %v4754_v29 = vpop.permute.xlu0 %1483 }
 0x1dd   : > { %6546 = vst [vmem:[#allocation134_spill] sm:$0xff] %v4752_v2  ;;  %1989 = vperm.xlu1 %3820, %v1863_v23   ;;  %6547 = vst [vmem:[#allocation135_spill] sm:$0xff] %v4754_v29  ;;  %2004 = vperm.xlu0 %3819, %v1866_v15   ;;  %v2100_v29 = vld [vmem:[#allocation2 + $0x31] sm:$0xff] }
 0x1de   : > { %v2103_v2 = vld [vmem:[#allocation2 + $0x51] sm:$0xff] }
 0x1e0   : > { %v4756_v0 = vpop.permute.xlu1 %1478  ;;  %v4758_v20 = vpop.permute.xlu0 %1493 }
 0x1e1   : > { %6548 = vst [vmem:[#allocation136_spill] sm:$0xff] %v4756_v0  ;;  %1999 = vperm.xlu1 %3820, %v1865_v16   ;;  %6549 = vst [vmem:[#allocation137_spill] sm:$0xff] %v4758_v20  ;;  %2014 = vperm.xlu0 %3819, %v4490_v38   ;;  %v1871_v16 = vld [vmem:[#allocation2 + $0x1a0] sm:$0xff]  ;;  %v2102_v0 = vld [vmem:[#allocation2 + $0x49] sm:$0xff] }
 0x1e4   : > { %v4761_v18 = vpop.permute.xlu1 %1488  ;;  %v4763_v63 = vpop.permute.xlu0 %1503 }
 0x1e5   : > { %6550 = vst [vmem:[#allocation138_spill] sm:$0xff] %v4761_v18  ;;  %2009 = vperm.xlu1 %3820, %v1867_v30   ;;  %6551 = vst [vmem:[#allocation139_spill] sm:$0xff] %v4763_v63  ;;  %2024 = vperm.xlu0 %3819, %v1870_v35   ;;  %v2101_v18 = vld [vmem:[#allocation2 + $0x39] sm:$0xff]  ;;  %v2104_v35 = vld [vmem:[#allocation2 + $0x61] sm:$0xff] }
 0x1e6   : > { %v6595_v63 = vld [vmem:[#allocation14_spill] sm:$0xff] }
 0x1e8   : > { %v4765_v23 = vpop.permute.xlu1 %1498  ;;  %v4768_v15 = vpop.permute.xlu0 %1613 }
 0x1e9   : > { %6552 = vst [vmem:[#allocation140_spill] sm:$0xff] %v4765_v23  ;;  %2019 = vperm.xlu1 %3820, %v4501_v60   ;;  %6553 = vst [vmem:[#allocation141_spill] sm:$0xff] %v4768_v15  ;;  %2134 = vperm.xlu0 %3819, %v2100_v29  }
 0x1ec   : > { %v4770_v20 = vpop.permute.xlu1 %1508  ;;  %v4772_v38 = vpop.permute.xlu0 %1623 }
 0x1ed   : > { %6554 = vst [vmem:[#allocation142_spill] sm:$0xff] %v4770_v20  ;;  %2029 = vperm.xlu1 %3820, %v1871_v16   ;;  %6555 = vst [vmem:[#allocation143_spill] sm:$0xff] %v4772_v38  ;;  %2144 = vperm.xlu0 %3819, %v2102_v0   ;;  %v2105_v20 = vld [vmem:[#allocation2 + $0x69] sm:$0xff]  ;;  %v2108_v38 = vld [vmem:[#allocation2 + $0x91] sm:$0xff] }
 0x1f0   : > { %v4774_v30 = vpop.permute.xlu1 %1618  ;;  %v4776_v23 = vpop.permute.xlu0 %1633 }
 0x1f1   : > { %6556 = vst [vmem:[#allocation144_spill] sm:$0xff] %v4774_v30  ;;  %2139 = vperm.xlu1 %3820, %v2101_v18   ;;  %6557 = vst [vmem:[#allocation145_spill] sm:$0xff] %v4776_v23  ;;  %2154 = vperm.xlu0 %3819, %v2104_v35   ;;  %v2107_v30 = vld [vmem:[#allocation2 + $0x81] sm:$0xff]  ;;  %v2110_v23 = vld [vmem:[#allocation2 + $0xa9] sm:$0xff] }
 0x1f4   : > { %v4778_v60 = vpop.permute.xlu1 %1628  ;;  %v4780_v29 = vpop.permute.xlu0 %1643 }
 0x1f5   : > { %6558 = vst [vmem:[#allocation146_spill] sm:$0xff] %v4778_v60  ;;  %2149 = vperm.xlu1 %3820, %v2103_v2   ;;  %6559 = vst [vmem:[#allocation147_spill] sm:$0xff] %v4780_v29  ;;  %2164 = vperm.xlu0 %3819, %v2106_v22   ;;  %v2109_v60 = vld [vmem:[#allocation2 + $0x99] sm:$0xff]  ;;  %v2112_v29 = vld [vmem:[#allocation2 + $0xc1] sm:$0xff] }
 0x1f8   : > { %v4782_v16 = vpop.permute.xlu1 %1638  ;;  %v4784_v0 = vpop.permute.xlu0 %1653 }
 0x1f9   : > { %6560 = vst [vmem:[#allocation148_spill] sm:$0xff] %v4782_v16  ;;  %2159 = vperm.xlu1 %3820, %v2105_v20   ;;  %6561 = vst [vmem:[#allocation149_spill] sm:$0xff] %v4784_v0  ;;  %2174 = vperm.xlu0 %3819, %v2108_v38   ;;  %v2111_v16 = vld [vmem:[#allocation2 + $0xb1] sm:$0xff]  ;;  %v2114_v0 = vld [vmem:[#allocation2 + $0xd9] sm:$0xff] }
 0x1fc   : > { %v4786_v18 = vpop.permute.xlu1 %1648  ;;  %v4788_v35 = vpop.permute.xlu0 %1663 }
 0x1fd   : > { %6562 = vst [vmem:[#allocation150_spill] sm:$0xff] %v4786_v18  ;;  %2169 = vperm.xlu1 %3820, %v2107_v30   ;;  %6563 = vst [vmem:[#allocation151_spill] sm:$0xff] %v4788_v35  ;;  %2184 = vperm.xlu0 %3819, %v2110_v23   ;;  %v2113_v18 = vld [vmem:[#allocation2 + $0xc9] sm:$0xff]  ;;  %v2116_v35 = vld [vmem:[#allocation2 + $0xf1] sm:$0xff] }
 0x200   : > { %v4790_v2 = vpop.permute.xlu1 %1658  ;;  %v4792_v22 = vpop.permute.xlu0 %1673 }
 0x201   : > { %6564 = vst [vmem:[#allocation152_spill] sm:$0xff] %v4790_v2  ;;  %2179 = vperm.xlu1 %3820, %v2109_v60   ;;  %6565 = vst [vmem:[#allocation153_spill] sm:$0xff] %v4792_v22  ;;  %2194 = vperm.xlu0 %3819, %v2112_v29   ;;  %v2115_v2 = vld [vmem:[#allocation2 + $0xe1] sm:$0xff]  ;;  %v2118_v22 = vld [vmem:[#allocation2 + $0x109] sm:$0xff] }
 0x204   : > { %v4794_v20 = vpop.permute.xlu1 %1668  ;;  %v4796_v38 = vpop.permute.xlu0 %1683 }
 0x205   : > { %6566 = vst [vmem:[#allocation154_spill] sm:$0xff] %v4794_v20  ;;  %2189 = vperm.xlu1 %3820, %v2111_v16   ;;  %6567 = vst [vmem:[#allocation155_spill] sm:$0xff] %v4796_v38  ;;  %2204 = vperm.xlu0 %3819, %v2114_v0   ;;  %v2117_v20 = vld [vmem:[#allocation2 + $0xf9] sm:$0xff]  ;;  %v2120_v38 = vld [vmem:[#allocation2 + $0x121] sm:$0xff] }
 0x208   : > { %v4798_v30 = vpop.permute.xlu1 %1678  ;;  %v4800_v23 = vpop.permute.xlu0 %1693 }
 0x209   : > { %6568 = vst [vmem:[#allocation156_spill] sm:$0xff] %v4798_v30  ;;  %2199 = vperm.xlu1 %3820, %v2113_v18   ;;  %6569 = vst [vmem:[#allocation157_spill] sm:$0xff] %v4800_v23  ;;  %2214 = vperm.xlu0 %3819, %v2116_v35   ;;  %v2119_v30 = vld [vmem:[#allocation2 + $0x111] sm:$0xff]  ;;  %v2122_v23 = vld [vmem:[#allocation2 + $0x139] sm:$0xff] }
 0x20c   : > { %v4802_v60 = vpop.permute.xlu1 %1688  ;;  %v4804_v29 = vpop.permute.xlu0 %1703 }
 0x20d   : > { %6570 = vst [vmem:[#allocation158_spill] sm:$0xff] %v4802_v60  ;;  %2209 = vperm.xlu1 %3820, %v2115_v2   ;;  %6571 = vst [vmem:[#allocation159_spill] sm:$0xff] %v4804_v29  ;;  %2224 = vperm.xlu0 %3819, %v2118_v22   ;;  %v2121_v60 = vld [vmem:[#allocation2 + $0x129] sm:$0xff]  ;;  %v2124_v29 = vld [vmem:[#allocation2 + $0x151] sm:$0xff] }
 0x210   : > { %v4806_v16 = vpop.permute.xlu1 %1698  ;;  %v4808_v0 = vpop.permute.xlu0 %1713 }
 0x211   : > { %6572 = vst [vmem:[#allocation160_spill] sm:$0xff] %v4806_v16  ;;  %2219 = vperm.xlu1 %3820, %v2117_v20   ;;  %6573 = vst [vmem:[#allocation161_spill] sm:$0xff] %v4808_v0  ;;  %2234 = vperm.xlu0 %3819, %v2120_v38   ;;  %v2123_v16 = vld [vmem:[#allocation2 + $0x141] sm:$0xff]  ;;  %v2126_v0 = vld [vmem:[#allocation2 + $0x169] sm:$0xff] }
 0x214   : > { %v4810_v18 = vpop.permute.xlu1 %1708  ;;  %v4812_v35 = vpop.permute.xlu0 %1723 }
 0x215   : > { %6574 = vst [vmem:[#allocation162_spill] sm:$0xff] %v4810_v18  ;;  %2229 = vperm.xlu1 %3820, %v2119_v30   ;;  %6575 = vst [vmem:[#allocation163_spill] sm:$0xff] %v4812_v35  ;;  %2244 = vperm.xlu0 %3819, %v2122_v23   ;;  %v2125_v18 = vld [vmem:[#allocation2 + $0x159] sm:$0xff]  ;;  %v471_v35 = vlaneseq }
 0x218   : > { %v4814_v2 = vpop.permute.xlu1 %1718  ;;  %v4816_v22 = vpop.permute.xlu0 %1733 }
 0x219   : > { %6576 = vst [vmem:[#allocation164_spill] sm:$0xff] %v4814_v2  ;;  %2239 = vperm.xlu1 %3820, %v2121_v60   ;;  %6577 = vst [vmem:[#allocation165_spill] sm:$0xff] %v4816_v22  ;;  %2254 = vperm.xlu0 %3819, %v2124_v29   ;;  %v2127_v2 = vld [vmem:[#allocation2 + $0x171] sm:$0xff]  ;;  %v2130_v29 = vld [vmem:[#allocation2 + $0x199] sm:$0xff] }
 0x21c   : > { %v4818_v20 = vpop.permute.xlu1 %1728  ;;  %v4820_v38 = vpop.permute.xlu0 %1743 }
 0x21d   : > { %6578 = vst [vmem:[#allocation166_spill] sm:$0xff] %v4818_v20  ;;  %2249 = vperm.xlu1 %3820, %v2123_v16   ;;  %6579 = vst [vmem:[#allocation167_spill] sm:$0xff] %v4820_v38  ;;  %2264 = vperm.xlu0 %3819, %v2126_v0   ;;  %v4831_v16 = vshrl.u32 %v471_v35, 7  ;;  %v2360_v0 = vld [vmem:[#allocation2 + $0x32] sm:$0xff]  ;;  %v2362_v35 = vld [vmem:[#allocation2 + $0x4a] sm:$0xff] }
 0x21f   : > { %6584 = vst [vmem:[#allocation172_spill] sm:$0xff] %v4831_v16  ;;  %v993_v22 = vsub.s32 2, %v4831_v16 }
 0x220   : > { %v4822_v30 = vpop.permute.xlu1 %1738  ;;  %v4824_v23 = vpop.permute.xlu0 %1753 }
 0x221   : > { %6580 = vst [vmem:[#allocation168_spill] sm:$0xff] %v4822_v30  ;;  %2259 = vperm.xlu1 %3820, %v2125_v18   ;;  %6581 = vst [vmem:[#allocation169_spill] sm:$0xff] %v4824_v23  ;;  %2274 = vperm.xlu0 %3819, %v4590_v19   ;;  %v2131_v23 = vld [vmem:[#allocation2 + $0x1a1] sm:$0xff]  ;;  %v473_v30 = vsub.s32 0, %v4831_v16 }
 0x222   : > { %v4842_v19 = vld [vmem:[%s6311_s1] sm:$0xff] }
 0x224   : > { %v4827_v60 = vpop.permute.xlu1 %1748  ;;  %v4829_v20 = vpop.permute.xlu0 %1763 }
 0x225   : > { %6582 = vst [vmem:[#allocation170_spill] sm:$0xff] %v4827_v60  ;;  %2269 = vperm.xlu1 %3820, %v2127_v2   ;;  %6583 = vst [vmem:[#allocation171_spill] sm:$0xff] %v4829_v20  ;;  %2284 = vperm.xlu0 %3819, %v2130_v29   ;;  %v733_v29 = vsub.s32 1, %v4831_v16  ;;  %v4850_v60 = vrot.slane %v4842_v19, %v473_v30  ;;  %v6593_v20 = vld [vmem:[#allocation11_spill] sm:$0xff] }
 0x227   : > { %6589 = vst [vmem:[#allocation177_spill] sm:$0xff] %v4850_v60  ;;  %v4856_v15 = vrot.slane %v4842_v19, %v733_v29  ;;  %v476_v30 = vmul.f32 %v4850_v60, %v6594_v21  ;;  %v4866_v25 = vmul.f32 %v4850_v60, %v6595_v63  ;;  %v4879_v21 = vmul.f32 %v4850_v60, %v6601_v24  ;;  %v2366_v63 = vld [vmem:[#allocation2 + $0x7a] sm:$0xff]  ;;  %v6607_v24 = vld [vmem:[#allocation34_spill] sm:$0xff] }
 0x228   : > { %v4833_v38 = vpop.permute.xlu1 %1758  ;;  %v4836_v18 = vpop.permute.xlu0 %1874 }
 0x229   : > { %6585 = vst [vmem:[#allocation173_spill] sm:$0xff] %v4833_v38  ;;  %2279 = vperm.xlu1 %3820, %v4601_v17   ;;  %6586 = vst [vmem:[#allocation174_spill] sm:$0xff] %v4836_v18  ;;  %2394 = vperm.xlu0 %3819, %v2360_v0   ;;  %v2361_v17 = vld [vmem:[#allocation2 + $0x3a] sm:$0xff]  ;;  %v2364_v18 = vld [vmem:[#allocation2 + $0x62] sm:$0xff] }
 0x22a   : > { %6591 = vst [vmem:[#allocation179_spill] sm:$0xff] %v4856_v15  ;;  %6596 = vst [vmem:[#allocation11_spill] sm:$0xff] %v4866_v25  ;;  %v6603_v25 = vld [vmem:[#allocation26_spill] sm:$0xff] }
 0x22c   : > { %v4844_v2 = vpop.permute.xlu1 %1768  ;;  %v4847_v38 = vpop.permute.xlu0 %1884 }
 0x22d   : > { %6587 = vst [vmem:[#allocation175_spill] sm:$0xff] %v4844_v2  ;;  %2289 = vperm.xlu1 %3820, %v2131_v23   ;;  %6588 = vst [vmem:[#allocation176_spill] sm:$0xff] %v4847_v38  ;;  %2404 = vperm.xlu0 %3819, %v2362_v35   ;;  %v2363_v23 = vld [vmem:[#allocation2 + $0x52] sm:$0xff]  ;;  %v475_v38 = vmul.f32 %v4850_v60, %v6593_v20  ;;  %v4869_v35 = vrot.slane %v4842_v19, %v993_v22 }
 0x22e   : > { %v480_v20 = vmul.f32 %v4850_v60, %v6600_v14  ;;  %v482_v22 = vmul.f32 %v4850_v60, %v6603_v25  ;;  %v4895_v14 = vmul.f32 %v4850_v60, %v6606_v11  ;;  %v4903_v25 = vmul.f32 %v4850_v60, %v6608_v10  ;;  %v2365_v11 = vld [vmem:[#allocation2 + $0x6a] sm:$0xff] }
 0x22f   : > { %6597 = vst [vmem:[#allocation13_spill] sm:$0xff] %v4869_v35  ;;  %v6614_v10 = vld [vmem:[#allocation46_spill] sm:$0xff]  ;;  %v6624_v35 = vld [vmem:[#allocation60_spill] sm:$0xff] }
 0x230   : > { %v4853_v0 = vpop.permute.xlu1 %1879  ;;  %v4858_v2 = vpop.permute.xlu0 %1894  ;;  %v4925_v5 = vmul.f32 %v4850_v60, %v6614_v10  ;;  %v1253_v10 = vsub.s32 3, %v4831_v16  ;;  %v6627_v16 = vld [vmem:[#allocation62_spill] sm:$0xff] }
 0x231   : > { %6590 = vst [vmem:[#allocation178_spill] sm:$0xff] %v4853_v0  ;;  %2399 = vperm.xlu1 %3820, %v2361_v17   ;;  %6592 = vst [vmem:[#allocation180_spill] sm:$0xff] %v4858_v2  ;;  %2414 = vperm.xlu0 %3819, %v2364_v18   ;;  %v6598_v17 = vld [vmem:[#allocation16_spill] sm:$0xff] }
 0x232   : > { %v479_v29 = vmul.f32 %v4850_v60, %v6598_v17  ;;  %v6599_v0 = vld [vmem:[#allocation20_spill] sm:$0xff]  ;;  %v6605_v17 = vld [vmem:[#allocation30_spill] sm:$0xff] }
 0x233   : > { %v481_v2 = vmul.f32 %v4850_v60, %v6599_v0  ;;  %v6604_v18 = vld [vmem:[#allocation28_spill] sm:$0xff]  ;;  %v4891_v0 = vmul.f32 %v4850_v60, %v6605_v17  ;;  %v4911_v17 = vmul.f32 %v4850_v60, %v6610_v8  ;;  %v6616_v8 = vld [vmem:[#allocation50_spill] sm:$0xff] }
 0x234   : > { %v4881_v13 = vpop.permute.xlu1 %1889  ;;  %v4887_v12 = vmul.f32 %v4850_v60, %v6604_v18  ;;  %v4907_v18 = vmul.f32 %v4850_v60, %v6609_v9  ;;  %v4913_v56 = vpop.permute.xlu0 %1904  ;;  %v6615_v9 = vld [vmem:[#allocation48_spill] sm:$0xff] }
 0x235   : > { %6602 = vst [vmem:[#allocation14_spill] sm:$0xff] %v4881_v13  ;;  %2409 = vperm.xlu1 %3820, %v2363_v23   ;;  %v4899_v13 = vmul.f32 %v4850_v60, %v6607_v24  ;;  %6611 = vst [vmem:[#allocation16_spill] sm:$0xff] %v4913_v56  ;;  %v6612_v23 = vld [vmem:[#allocation42_spill] sm:$0xff]  ;;  %v6613_v24 = vld [vmem:[#allocation44_spill] sm:$0xff]  ;;  %v4929_v4 = vmul.f32 %v4850_v60, %v6615_v9  ;;  %2424 = vperm.xlu0 %3819, %v2366_v63  }
 0x236   : > { %v4917_v7 = vmul.f32 %v4850_v60, %v6612_v23  ;;  %v4921_v6 = vmul.f32 %v4850_v60, %v6613_v24  ;;  %v4933_v56 = vmul.f32 %v4850_v60, %v6616_v8  ;;  %v4937_v23 = vmul.f32 %v4850_v60, %v6617_v3  ;;  %v6620_v9 = vld [vmem:[#allocation56_spill] sm:$0xff] }
 0x237   : > { %v4941_v24 = vmul.f32 %v4850_v60, %v6618_v61  ;;  %v4948_v63 = vmul.f32 %v4850_v60, %v6620_v9  ;;  %v4952_v8 = vmul.f32 %v4850_v60, %v6622_v62  ;;  %v4956_v3 = vmul.f32 %v4850_v60, %v6624_v35 }
 0x238   : > { %v4944_v1 = vpop.permute.xlu1 %1899  ;;  %v735_v61 = vmul.f32 %v4856_v15, %v6626_v59  ;;  %v4966_v9 = vmul.f32 %v4850_v60, %v6628_v57  ;;  %v736_v62 = vmul.f32 %v4856_v15, %v4410_v34  ;;  %v4972_v35 = vpop.permute.xlu0 %1914  ;;  %v741_v57 = vmul.f32 %v4856_v15, %v4419_v26  ;;  %v2374_v26 = vld [vmem:[#allocation2 + $0xda] sm:$0xff] }
 0x239   : > { %6619 = vst [vmem:[#allocation20_spill] sm:$0xff] %v4944_v1  ;;  %6621 = vst [vmem:[#allocation22_spill] sm:$0xff] %v4948_v63  ;;  %2419 = vperm.xlu1 %3820, %v2365_v11   ;;  %v4962_v1 = vmul.f32 %v4850_v60, %v6627_v16  ;;  %v6631_v63 = vld [vmem:[#allocation65_spill] sm:$0xff]  ;;  %v6633_v11 = vld [vmem:[#allocation66_spill] sm:$0xff]  ;;  %v740_v34 = vmul.f32 %v4856_v15, %v4422_v40  ;;  %2444 = vperm.xlu0 %3819, %v2370_v58  }
 0x23a   : > { %6623 = vst [vmem:[#allocation24_spill] sm:$0xff] %v4952_v8  ;;  %6625 = vst [vmem:[#allocation26_spill] sm:$0xff] %v4956_v3  ;;  %v739_v8 = vmul.f32 %v4856_v15, %v4413_v37  ;;  %v2368_v3 = vld [vmem:[#allocation2 + $0x92] sm:$0xff]  ;;  %v4976_v59 = vmul.f32 %v4850_v60, %v6631_v63  ;;  %v4980_v16 = vmul.f32 %v4850_v60, %v6633_v11  ;;  %v6637_v40 = vld [vmem:[#allocation69_spill] sm:$0xff] }
 0x23b   : > { %6629 = vst [vmem:[#allocation28_spill] sm:$0xff] %v4966_v9  ;;  %6630 = vst [vmem:[#allocation30_spill] sm:$0xff] %v4972_v35  ;;  %v6635_v9 = vld [vmem:[#allocation67_spill] sm:$0xff]  ;;  %v743_v35 = vmul.f32 %v4856_v15, %v4425_v27  ;;  %v742_v63 = vmul.f32 %v4856_v15, %v4428_v28  ;;  %v4995_v11 = vrot.slane %v4842_v19, %v1253_v10 }
 0x23c   : > { %6632 = vst [vmem:[#allocation32_spill] sm:$0xff] %v4976_v59  ;;  %6634 = vst [vmem:[#allocation34_spill] sm:$0xff] %v4980_v16  ;;  %v4988_v37 = vmul.f32 %v4850_v60, %v6635_v9  ;;  %v4997_v16 = vpop.permute.xlu1 %1909  ;;  %v4999_v59 = vadd.f32 %v735_v61, %v475_v38  ;;  %v5003_v58 = vmul.f32 %v4850_v60, %v6637_v40  ;;  %v5019_v61 = vpop.permute.xlu0 %1924  ;;  %v2372_v40 = vld [vmem:[#allocation2 + $0xc2] sm:$0xff] }
 0x23d   : > { %6636 = vst [vmem:[#allocation36_spill] sm:$0xff] %v4997_v16  ;;  %v745_v9 = vmul.f32 %v4856_v15, %v4431_v31  ;;  %v744_v27 = vmul.f32 %v4856_v15, %v4434_v32  ;;  %2434 = vperm.xlu1 %3820, %v2368_v3   ;;  %v5011_v28 = vmul.f32 %v4856_v15, %v4407_v36 }
 0x23e   : > { %v5013_v10 = vadd.f32 %v736_v62, %v476_v30  ;;  %v5015_v16 = vadd.f32 %v739_v8, %v479_v29  ;;  %v747_v38 = vmul.f32 %v4856_v15, %v4437_v33  ;;  %v5021_v60 = vadd.f32 %v741_v57, %v481_v2  ;;  %2464 = vperm.xlu0 %3819, %v2374_v26   ;;  %v2378_v8 = vld [vmem:[#allocation2 + $0x10a] sm:$0xff]  ;;  %v2376_v62 = vld [vmem:[#allocation2 + $0xf2] sm:$0xff]  ;;  %v2382_v57 = vld [vmem:[#allocation2 + $0x13a] sm:$0xff] }
 0x23f   : > { %6638 = vst [vmem:[#allocation38_spill] sm:$0xff] %v5011_v28  ;;  %v5023_v31 = vadd.f32 %v740_v34, %v480_v20  ;;  %v746_v32 = vmul.f32 %v4856_v15, %v4440_v39  ;;  %v749_v36 = vmul.f32 %v4856_v15, %v4443_v41  ;;  %v5030_v30 = vadd.f32 %v743_v35, %v4879_v21  ;;  %v6676_v28 = vld [vmem:[#allocation95_spill] sm:$0xff] }
 0x240   : > { %v5032_v29 = vadd.f32 %v742_v63, %v482_v22  ;;  %v748_v33 = vmul.f32 %v4856_v15, %v4446_v42  ;;  %v751_v2 = vmul.f32 %v4856_v15, %v4449_v43  ;;  %v5038_v20 = vpop.permute.xlu1 %1919  ;;  %v5041_v39 = vadd.f32 %v745_v9, %v4887_v12  ;;  %v5059_v3 = vpop.permute.xlu0 %1934  ;;  %v2380_v63 = vld [vmem:[#allocation2 + $0x122] sm:$0xff] }
 0x241   : > { %v5044_v41 = vadd.f32 %v744_v27, %v4891_v0  ;;  %v750_v21 = vmul.f32 %v4856_v15, %v4452_v44  ;;  %v753_v22 = vmul.f32 %v4856_v15, %v4455_v45  ;;  %2454 = vperm.xlu1 %3820, %v2372_v40   ;;  %v5051_v42 = vadd.f32 %v747_v38, %v4895_v14  ;;  %v6643_v40 = vld [vmem:[#allocation73_spill] sm:$0xff] }
 0x242   : > { %v752_v43 = vmul.f32 %v4856_v15, %v4458_v46  ;;  %v755_v12 = vmul.f32 %v4856_v15, %v4461_v47  ;;  %v754_v0 = vmul.f32 %v4856_v15, %v4464_v48  ;;  %v5062_v44 = vadd.f32 %v746_v32, %v4899_v13  ;;  %2484 = vperm.xlu0 %3819, %v2378_v8   ;;  %v6644_v32 = vld [vmem:[#allocation172_spill] sm:$0xff] }
 0x243   : > { %v5065_v45 = vadd.f32 %v749_v36, %v4903_v25  ;;  %v757_v14 = vmul.f32 %v4856_v15, %v4467_v49  ;;  %v756_v46 = vmul.f32 %v4856_v15, %v4470_v50  ;;  %v5072_v47 = vadd.f32 %v748_v33, %v4907_v18  ;;  %v2386_v33 = vld [vmem:[#allocation2 + $0x16a] sm:$0xff] }
 0x244   : > { %v5075_v48 = vadd.f32 %v751_v2, %v4911_v17  ;;  %v759_v13 = vmul.f32 %v4856_v15, %v4473_v51  ;;  %v758_v25 = vmul.f32 %v4856_v15, %v4476_v52  ;;  %v5081_v35 = vpop.permute.xlu1 %1929  ;;  %v5084_v49 = vadd.f32 %v750_v21, %v4917_v7  ;;  %v5104_v7 = vpop.permute.xlu0 %1944  ;;  %v6645_v2 = vld [vmem:[#allocation26_spill] sm:$0xff] }
 0x245   : > { %v5087_v50 = vadd.f32 %v753_v22, %v4921_v6  ;;  %v761_v18 = vmul.f32 %v4856_v15, %v4479_v53  ;;  %v760_v17 = vmul.f32 %v4856_v15, %v4482_v54  ;;  %2474 = vperm.xlu1 %3820, %v2376_v62   ;;  %v5094_v51 = vadd.f32 %v752_v43, %v4925_v5  ;;  %v6639_v5 = vld [vmem:[#allocation71_spill] sm:$0xff]  ;;  %v6646_v22 = vld [vmem:[#allocation74_spill] sm:$0xff]  ;;  %v6647_v43 = vld [vmem:[#allocation13_spill] sm:$0xff] }
 0x246   : > { %v5097_v52 = vadd.f32 %v755_v12, %v4929_v4  ;;  %v5100_v34 = vadd.f32 %v754_v0, %v4933_v56  ;;  %v763_v6 = vmul.f32 %v4856_v15, %v4485_v55  ;;  %v5107_v53 = vadd.f32 %v757_v14, %v4937_v23  ;;  %v6640_v4 = vld [vmem:[#allocation72_spill] sm:$0xff]  ;;  %2504 = vperm.xlu0 %3819, %v2382_v57   ;;  %v6641_v56 = vld [vmem:[#allocation22_spill] sm:$0xff]  ;;  %v6648_v0 = vld [vmem:[#allocation75_spill] sm:$0xff] }
 0x247   : > { %v5110_v54 = vadd.f32 %v756_v46, %v4941_v24  ;;  %v762_v26 = vmul.f32 %v4856_v15, %v6639_v5  ;;  %v765_v9 = vmul.f32 %v4856_v15, %v6640_v4  ;;  %v5117_v27 = vadd.f32 %v759_v13, %v6641_v56  ;;  %v6642_v55 = vld [vmem:[#allocation24_spill] sm:$0xff]  ;;  %v6650_v13 = vld [vmem:[#allocation77_spill] sm:$0xff]  ;;  %v6651_v57 = vld [vmem:[#allocation78_spill] sm:$0xff] }
 0x248   : > { %v5120_v38 = vadd.f32 %v758_v25, %v6642_v55  ;;  %v764_v23 = vmul.f32 %v4856_v15, %v6643_v40  ;;  %v1513_v36 = vsub.s32 4, %v6644_v32  ;;  %v5125_v24 = vpop.permute.xlu1 %1939  ;;  %v5128_v8 = vadd.f32 %v761_v18, %v6645_v2  ;;  %v6649_v14 = vld [vmem:[#allocation28_spill] sm:$0xff]  ;;  %v2384_v4 = vld [vmem:[#allocation2 + $0x152] sm:$0xff] }
 0x249   : > { %v5131_v21 = vadd.f32 %v760_v17, %v4962_v1  ;;  %v995_v12 = vmul.f32 %v6647_v43, %v6646_v22  ;;  %v766_v62 = vmul.f32 %v4856_v15, %v6648_v0  ;;  %2494 = vperm.xlu1 %3820, %v2380_v63   ;;  %v5138_v46 = vadd.f32 %v763_v6, %v6649_v14  ;;  %v6652_v5 = vld [vmem:[#allocation80_spill] sm:$0xff]  ;;  %v5146_v17 = vpop.permute.xlu0 %1954  ;;  %v6654_v40 = vld [vmem:[#allocation34_spill] sm:$0xff]  ;;  %v6655_v6 = vld [vmem:[#allocation81_spill] sm:$0xff] }
 0x24a   : > { %v996_v25 = vmul.f32 %v6647_v43, %v6650_v13  ;;  %v999_v18 = vmul.f32 %v6647_v43, %v6651_v57  ;;  %v1001_v1 = vmul.f32 %v6647_v43, %v6652_v5  ;;  %v6653_v56 = vld [vmem:[#allocation32_spill] sm:$0xff]  ;;  %v5152_v63 = vadd.f32 %v765_v9, %v6654_v40  ;;  %v6656_v22 = vld [vmem:[#allocation82_spill] sm:$0xff]  ;;  %2524 = vperm.xlu0 %3819, %v2386_v33   ;;  %v6658_v13 = vld [vmem:[#allocation83_spill] sm:$0xff] }
 0x24b   : > { %v5149_v55 = vadd.f32 %v762_v26, %v6653_v56  ;;  %v1000_v2 = vmul.f32 %v6647_v43, %v6655_v6  ;;  %v1003_v0 = vmul.f32 %v6647_v43, %v6656_v22  ;;  %v5159_v14 = vadd.f32 %v764_v23, %v4988_v37  ;;  %v6659_v5 = vld [vmem:[#allocation84_spill] sm:$0xff]  ;;  %v6661_v37 = vld [vmem:[#allocation85_spill] sm:$0xff]  ;;  %v6662_v22 = vld [vmem:[#allocation86_spill] sm:$0xff] }
 0x24c   : > { %v1002_v57 = vmul.f32 %v6647_v43, %v6658_v13  ;;  %v1005_v26 = vmul.f32 %v6647_v43, %v6659_v5  ;;  %v5166_v56 = vrot.slane %v4842_v19, %v1513_v36  ;;  %v5168_v9 = vpop.permute.xlu1 %1949  ;;  %v2390_v40 = vld [vmem:[#allocation2 + $0x19a] sm:$0xff]  ;;  %v5171_v6 = vadd.f32 %v995_v12, %v4999_v59 }
 0x24d   : > { %6657 = vst [vmem:[#allocation40_spill] sm:$0xff] %v5159_v14  ;;  %6660 = vst [vmem:[#allocation42_spill] sm:$0xff] %v5168_v9  ;;  %v5174_v33 = vadd.f32 %v766_v62, %v5003_v58  ;;  %v1004_v23 = vmul.f32 %v6647_v43, %v6661_v37  ;;  %v1007_v13 = vmul.f32 %v6647_v43, %v6662_v22  ;;  %2514 = vperm.xlu1 %3820, %v2384_v4   ;;  %v6663_v5 = vld [vmem:[#allocation76_spill] sm:$0xff]  ;;  %v5193_v12 = vpop.permute.xlu0 %1964  ;;  %v6666_v37 = vld [vmem:[#allocation87_spill] sm:$0xff] }
 0x24e   : > { %v5182_v36 = vmul.f32 %v6647_v43, %v6663_v5  ;;  %v5185_v15 = vadd.f32 %v996_v25, %v5013_v10  ;;  %v5188_v59 = vadd.f32 %v999_v18, %v5015_v16  ;;  %v5191_v58 = vadd.f32 %v1001_v1, %v5021_v60  ;;  %6665 = vst [vmem:[#allocation46_spill] sm:$0xff] %v5193_v12  ;;  %v6667_v5 = vld [vmem:[#allocation88_spill] sm:$0xff]  ;;  %v6668_v25 = vld [vmem:[#allocation89_spill] sm:$0xff]  ;;  %v6669_v18 = vld [vmem:[#allocation90_spill] sm:$0xff] }
 0x24f   : > { %v5196_v62 = vadd.f32 %v1000_v2, %v5023_v31  ;;  %v5199_v4 = vadd.f32 %v1003_v0, %v5030_v30  ;;  %v1006_v22 = vmul.f32 %v6647_v43, %v6666_v37  ;;  %v1009_v10 = vmul.f32 %v6647_v43, %v6667_v5  ;;  %2544 = vperm.xlu0 %3819, %v2390_v40   ;;  %v2369_v2 = vld [vmem:[#allocation2 + $0x9a] sm:$0xff]  ;;  %v6673_v37 = vld [vmem:[#allocation105_spill] sm:$0xff] }
 0x250   : > { %6664 = vst [vmem:[#allocation44_spill] sm:$0xff] %v5182_v36  ;;  %v5206_v16 = vadd.f32 %v1002_v57, %v5032_v29  ;;  %v5209_v60 = vadd.f32 %v1005_v26, %v5041_v39  ;;  %v1008_v31 = vmul.f32 %v6647_v43, %v6668_v25  ;;  %v1011_v30 = vmul.f32 %v6647_v43, %v6669_v18  ;;  %v5215_v1 = vpop.permute.xlu1 %1959  ;;  %v6671_v29 = vld [vmem:[#allocation91_spill] sm:$0xff]  ;;  %v6672_v39 = vld [vmem:[#allocation92_spill] sm:$0xff]  ;;  %v6674_v5 = vld [vmem:[#allocation93_spill] sm:$0xff] }
 0x251   : > { %6670 = vst [vmem:[#allocation48_spill] sm:$0xff] %v5215_v1  ;;  %v5218_v0 = vadd.f32 %v1004_v23, %v5044_v41  ;;  %v5221_v40 = vadd.f32 %v1007_v13, %v5051_v42  ;;  %v1010_v57 = vmul.f32 %v6647_v43, %v6671_v29  ;;  %v1013_v26 = vmul.f32 %v6647_v43, %v6672_v39  ;;  %v6675_v18 = vld [vmem:[#allocation94_spill] sm:$0xff]  ;;  %v6677_v23 = vld [vmem:[#allocation96_spill] sm:$0xff]  ;;  %v5236_v13 = vpop.permute.xlu0 %1974 }
 0x252   : > { %2534 = vperm.xlu1 %3820, %v6673_v37   ;;  %v1012_v25 = vmul.f32 %v6647_v43, %v6674_v5  ;;  %v1015_v36 = vmul.f32 %v6647_v43, %v6675_v18  ;;  %v1014_v41 = vmul.f32 %v6647_v43, %v6676_v28  ;;  %v1017_v42 = vmul.f32 %v6647_v43, %v6677_v23  ;;  %v2367_v29 = vld [vmem:[#allocation2 + $0x82] sm:$0xff]  ;;  %v6680_v1 = vld [vmem:[#allocation98_spill] sm:$0xff] }
 0x253   : > { %6678 = vst [vmem:[#allocation50_spill] sm:$0xff] %v5236_v13  ;;  %v5239_v14 = vadd.f32 %v1006_v22, %v5062_v44  ;;  %v5242_v39 = vadd.f32 %v1009_v10, %v5065_v45  ;;  %v6679_v37 = vld [vmem:[#allocation97_spill] sm:$0xff]  ;;  %v1019_v18 = vmul.f32 %v6647_v43, %v6680_v1  ;;  %2439 = vperm.xlu0 %3819, %v2369_v2   ;;  %v6681_v13 = vld [vmem:[#allocation99_spill] sm:$0xff]  ;;  %v6682_v22 = vld [vmem:[#allocation6_spill] sm:$0xff] }
 0x254   : > { %v1016_v5 = vmul.f32 %v6647_v43, %v6679_v37  ;;  %v5249_v28 = vadd.f32 %v1008_v31, %v5072_v47  ;;  %v5252_v23 = vadd.f32 %v1011_v30, %v5075_v48  ;;  %v1018_v44 = vmul.f32 %v6647_v43, %v6681_v13  ;;  %v5258_v10 = vpop.permute.xlu1 %1969  ;;  %v2373_v12 = vld [vmem:[#allocation2 + $0xca] sm:$0xff]  ;;  %v6684_v47 = vld [vmem:[#allocation7_spill] sm:$0xff]  ;;  %v6685_v48 = vld [vmem:[#allocation8_spill] sm:$0xff] }
 0x255   : > { %v1021_v45 = vmul.f32 %v6647_v43, %v6682_v22  ;;  %6683 = vst [vmem:[#allocation52_spill] sm:$0xff] %v5258_v10  ;;  %v5261_v37 = vadd.f32 %v1010_v57, %v5084_v49  ;;  %v5264_v1 = vadd.f32 %v1013_v26, %v5087_v50  ;;  %v1020_v31 = vmul.f32 %v6647_v43, %v6684_v47  ;;  %v5282_v50 = vpop.permute.xlu0 %1984  ;;  %v2371_v57 = vld [vmem:[#allocation2 + $0xb2] sm:$0xff]  ;;  %v6701_v10 = vld [vmem:[#allocation29_spill] sm:$0xff] }
 0x256   : > { %v1023_v30 = vmul.f32 %v6647_v43, %v6685_v48  ;;  %2429 = vperm.xlu1 %3820, %v2367_v29   ;;  %v5271_v2 = vadd.f32 %v1012_v25, %v5094_v51  ;;  %v5274_v13 = vadd.f32 %v1015_v36, %v5097_v52  ;;  %v5277_v22 = vadd.f32 %v1014_v41, %v5100_v34  ;;  %v6687_v51 = vld [vmem:[#allocation9_spill] sm:$0xff]  ;;  %v6688_v52 = vld [vmem:[#allocation10_spill] sm:$0xff] }
 0x257   : > { %v5280_v49 = vadd.f32 %v1017_v42, %v5107_v53  ;;  %6686 = vst [vmem:[#allocation54_spill] sm:$0xff] %v5282_v50  ;;  %v5285_v26 = vadd.f32 %v1016_v5, %v5110_v54  ;;  %v5288_v29 = vadd.f32 %v1019_v18, %v5117_v27  ;;  %v1022_v25 = vmul.f32 %v6647_v43, %v6687_v51  ;;  %v6689_v41 = vld [vmem:[#allocation101_spill] sm:$0xff]  ;;  %v2377_v5 = vld [vmem:[#allocation2 + $0xfa] sm:$0xff] }
 0x258   : > { %v1025_v36 = vmul.f32 %v6647_v43, %v6688_v52  ;;  %2459 = vperm.xlu0 %3819, %v2373_v12   ;;  %v5295_v34 = vadd.f32 %v1018_v44, %v5120_v38  ;;  %v5298_v53 = vadd.f32 %v1021_v45, %v5128_v8  ;;  %v1255_v54 = vmul.f32 %v4995_v11, %v6689_v41  ;;  %v5303_v27 = vpop.permute.xlu1 %1979  ;;  %v6691_v12 = vld [vmem:[#allocation12_spill] sm:$0xff]  ;;  %v6692_v44 = vld [vmem:[#allocation15_spill] sm:$0xff]  ;;  %v6693_v45 = vld [vmem:[#allocation17_spill] sm:$0xff] }
 0x259   : > { %v1773_v42 = vsub.s32 5, %v6644_v32  ;;  %6690 = vst [vmem:[#allocation56_spill] sm:$0xff] %v5303_v27  ;;  %v5306_v18 = vadd.f32 %v1020_v31, %v5131_v21  ;;  %v5309_v47 = vadd.f32 %v1023_v30, %v5138_v46  ;;  %v1026_v38 = vmul.f32 %v6647_v43, %v6691_v12  ;;  %v6694_v51 = vld [vmem:[#allocation21_spill] sm:$0xff]  ;;  %v6695_v41 = vld [vmem:[#allocation23_spill] sm:$0xff]  ;;  %v5323_v30 = vpop.permute.xlu0 %1994 }
 0x25a   : > { %v1256_v8 = vmul.f32 %v4995_v11, %v6692_v44  ;;  %2449 = vperm.xlu1 %3820, %v2371_v57   ;;  %v1259_v48 = vmul.f32 %v4995_v11, %v6693_v45  ;;  %v1261_v52 = vmul.f32 %v4995_v11, %v6694_v51  ;;  %v1260_v21 = vmul.f32 %v4995_v11, %v6695_v41  ;;  %v6696_v31 = vld [vmem:[#allocation25_spill] sm:$0xff]  ;;  %v6698_v44 = vld [vmem:[#allocation100_spill] sm:$0xff]  ;;  %v6700_v50 = vld [vmem:[#allocation27_spill] sm:$0xff] }
 0x25b   : > { %v1263_v46 = vmul.f32 %v4995_v11, %v6696_v31  ;;  %6697 = vst [vmem:[#allocation58_spill] sm:$0xff] %v5323_v30  ;;  %v2375_v27 = vld [vmem:[#allocation2 + $0xe2] sm:$0xff]  ;;  %v5326_v12 = vadd.f32 %v1022_v25, %v5149_v55  ;;  %v1057_v57 = vadd.f32 %v1025_v36, %v5152_v63  ;;  %v5331_v45 = vmul.f32 %v6647_v43, %v6698_v44  ;;  %v6702_v30 = vld [vmem:[#allocation31_spill] sm:$0xff]  ;;  %v2381_v25 = vld [vmem:[#allocation2 + $0x12a] sm:$0xff] }
 0x25c   : > { %v1262_v51 = vmul.f32 %v4995_v11, %v6700_v50  ;;  %2479 = vperm.xlu0 %3819, %v2377_v5   ;;  %v1287_v41 = vadd.f32 %v1255_v54, %v5171_v6  ;;  %v1265_v31 = vmul.f32 %v4995_v11, %v6701_v10  ;;  %v1264_v9 = vmul.f32 %v4995_v11, %v6702_v30  ;;  %v5343_v63 = vpop.permute.xlu1 %1989  ;;  %v6704_v5 = vld [vmem:[#allocation33_spill] sm:$0xff]  ;;  %v6705_v54 = vld [vmem:[#allocation35_spill] sm:$0xff] }
 0x25d   : > { %6699 = vst [vmem:[#allocation60_spill] sm:$0xff] %v5331_v45  ;;  %v5341_v55 = vrot.slane %v4842_v19, %v1773_v42  ;;  %6703 = vst [vmem:[#allocation68_spill] sm:$0xff] %v5343_v63  ;;  %v5346_v36 = vadd.f32 %v1026_v38, %v5174_v33  ;;  %v5349_v50 = vadd.f32 %v1256_v8, %v5185_v15  ;;  %v5367_v15 = vpop.permute.xlu0 %2004  ;;  %v2379_v38 = vld [vmem:[#allocation2 + $0x112] sm:$0xff]  ;;  %v6716_v45 = vld [vmem:[#allocation108_spill] sm:$0xff] }
 0x25e   : > { %v1267_v6 = vmul.f32 %v4995_v11, %v6704_v5  ;;  %v1266_v10 = vmul.f32 %v4995_v11, %v6705_v54  ;;  %2469 = vperm.xlu1 %3820, %v2375_v27   ;;  %v5356_v30 = vadd.f32 %v1259_v48, %v5188_v59  ;;  %v5359_v42 = vadd.f32 %v1261_v52, %v5191_v58  ;;  %v6707_v5 = vld [vmem:[#allocation37_spill] sm:$0xff]  ;;  %v6708_v59 = vld [vmem:[#allocation106_spill] sm:$0xff]  ;;  %v6709_v52 = vld [vmem:[#allocation39_spill] sm:$0xff] }
 0x25f   : > { %v5362_v44 = vadd.f32 %v1260_v21, %v5196_v62  ;;  %v5365_v33 = vadd.f32 %v1263_v46, %v5199_v4  ;;  %6706 = vst [vmem:[#allocation62_spill] sm:$0xff] %v5367_v15  ;;  %v5370_v8 = vadd.f32 %v1262_v51, %v5206_v16  ;;  %v1269_v27 = vmul.f32 %v4995_v11, %v6707_v5  ;;  %v6710_v16 = vld [vmem:[#allocation41_spill] sm:$0xff]  ;;  %v2385_v54 = vld [vmem:[#allocation2 + $0x15a] sm:$0xff] }
 0x260   : > { %v1285_v48 = vmul.f32 %v4995_v11, %v6708_v59  ;;  %v2034_v58 = vsub.s32 6, %v6644_v32  ;;  %2499 = vperm.xlu0 %3819, %v2381_v25   ;;  %v5378_v62 = vadd.f32 %v1265_v31, %v5209_v60  ;;  %v5381_v4 = vadd.f32 %v1264_v9, %v5218_v0  ;;  %v5387_v51 = vpop.permute.xlu1 %1999  ;;  %v6712_v60 = vld [vmem:[#allocation43_spill] sm:$0xff]  ;;  %v6714_v59 = vld [vmem:[#allocation45_spill] sm:$0xff] }
 0x261   : > { %v1268_v21 = vmul.f32 %v4995_v11, %v6709_v52  ;;  %v1271_v46 = vmul.f32 %v4995_v11, %v6710_v16  ;;  %6711 = vst [vmem:[#allocation63_spill] sm:$0xff] %v5387_v51  ;;  %v5390_v5 = vadd.f32 %v1267_v6, %v5221_v40  ;;  %v5393_v25 = vadd.f32 %v1266_v10, %v5239_v14  ;;  %v6713_v9 = vld [vmem:[#allocation139_spill] sm:$0xff]  ;;  %v5405_v6 = vpop.permute.xlu0 %2014  ;;  %v2383_v14 = vld [vmem:[#allocation2 + $0x142] sm:$0xff] }
 0x262   : > { %v1270_v31 = vmul.f32 %v4995_v11, %v6712_v60  ;;  %v1545_v0 = vmul.f32 %v5166_v56, %v6713_v9  ;;  %2489 = vperm.xlu1 %3820, %v2379_v38   ;;  %v1273_v52 = vmul.f32 %v4995_v11, %v6714_v59  ;;  %v6715_v16 = vld [vmem:[#allocation47_spill] sm:$0xff]  ;;  %v1515_v40 = vmul.f32 %v5166_v56, %v6716_v45 }
 0x263   : > { %v1272_v43 = vmul.f32 %v4995_v11, %v6715_v16  ;;  %6717 = vst [vmem:[#allocation65_spill] sm:$0xff] %v5405_v6  ;;  %v2294_v10 = vsub.s32 7, %v6644_v32  ;;  %v5409_v60 = vadd.f32 %v1269_v27, %v5242_v39  ;;  %v1317_v51 = vadd.f32 %v1285_v48, %v1057_v57  ;;  %v6718_v9 = vld [vmem:[#allocation171_spill] sm:$0xff]  ;;  %v6719_v6 = vld [vmem:[#allocation49_spill] sm:$0xff]  ;;  %v6722_v48 = vld [vmem:[#allocation110_spill] sm:$0xff] }
 0x264   : > { %v1805_v38 = vmul.f32 %v5341_v55, %v6718_v9  ;;  %v5414_v59 = vrot.slane %v4842_v19, %v2034_v58  ;;  %2519 = vperm.xlu0 %3819, %v2385_v54   ;;  %v5417_v16 = vadd.f32 %v1268_v21, %v5249_v28  ;;  %v5420_v45 = vadd.f32 %v1271_v46, %v5252_v23  ;;  %v6720_v15 = vld [vmem:[#allocation51_spill] sm:$0xff]  ;;  %v5426_v57 = vpop.permute.xlu1 %2009  ;;  %v6723_v28 = vld [vmem:[#allocation141_spill] sm:$0xff] }
 0x265   : > { %v1275_v32 = vmul.f32 %v4995_v11, %v6719_v6  ;;  %v1274_v39 = vmul.f32 %v4995_v11, %v6720_v15  ;;  %6721 = vst [vmem:[#allocation66_spill] sm:$0xff] %v5426_v57  ;;  %v5429_v27 = vadd.f32 %v1270_v31, %v5261_v37  ;;  %v1286_v58 = vmul.f32 %v4995_v11, %v6722_v48  ;;  %v2025_v6 = vpop.permute.xlu0 %2024  ;;  %v2387_v9 = vld [vmem:[#allocation2 + $0x172] sm:$0xff] }
 0x266   : > { %v1577_v54 = vadd.f32 %v1545_v0, %v1317_v51  ;;  %v1775_v21 = vmul.f32 %v5341_v55, %v6723_v28  ;;  %2509 = vperm.xlu1 %3820, %v2383_v14   ;;  %v5436_v23 = vadd.f32 %v1273_v52, %v5264_v1  ;;  %v5439_v46 = vadd.f32 %v1272_v43, %v5271_v2  ;;  %v6724_v31 = vld [vmem:[#allocation142_spill] sm:$0xff]  ;;  %v6726_v1 = vld [vmem:[#allocation109_spill] sm:$0xff]  ;;  %v6728_v52 = vld [vmem:[#allocation112_spill] sm:$0xff] }
 0x267   : > { %v1547_v15 = vadd.f32 %v1515_v40, %v1287_v41  ;;  %v5442_v37 = vrot.slane %v4842_v19, %v2294_v10  ;;  %v1546_v48 = vmul.f32 %v5166_v56, %v6724_v31  ;;  %v6725_v0 = vld [vmem:[#allocation174_spill] sm:$0xff]  ;;  %v2066_v14 = vmul.f32 %v5414_v59, %v2025_v6  ;;  %v6727_v41 = vld [vmem:[#allocation53_spill] sm:$0xff]  ;;  %v6730_v6 = vld [vmem:[#allocation175_spill] sm:$0xff] }
 0x268   : > { %v1837_v51 = vadd.f32 %v1805_v38, %v1577_v54  ;;  %v2036_v28 = vmul.f32 %v5414_v59, %v6725_v0  ;;  %2539 = vperm.xlu0 %3819, %v6726_v1   ;;  %v5451_v43 = vadd.f32 %v1275_v32, %v5274_v13  ;;  %v5454_v2 = vadd.f32 %v1274_v39, %v5277_v22  ;;  %v5460_v10 = vpop.permute.xlu1 %2019  ;;  %v6732_v32 = vld [vmem:[#allocation55_spill] sm:$0xff]  ;;  %v6733_v22 = vld [vmem:[#allocation57_spill] sm:$0xff] }
 0x269   : > { %v1277_v19 = vmul.f32 %v4995_v11, %v6727_v41  ;;  %v1516_v40 = vmul.f32 %v5166_v56, %v6728_v52  ;;  %6729 = vst [vmem:[#allocation67_spill] sm:$0xff] %v5460_v10  ;;  %v1318_v38 = vadd.f32 %v1286_v58, %v5346_v36  ;;  %v1807_v54 = vadd.f32 %v1775_v21, %v1547_v15  ;;  %v6734_v1 = vld [vmem:[#allocation59_spill] sm:$0xff]  ;;  %v6735_v52 = vld [vmem:[#allocation113_spill] sm:$0xff]  ;;  %v2135_v36 = vpop.permute.xlu0 %2134  ;;  %v6736_v15 = vld [vmem:[#allocation144_spill] sm:$0xff] }
 0x26a   : > { %v1806_v31 = vmul.f32 %v5341_v55, %v6730_v6  ;;  %v5465_v0 = vadd.f32 %v2066_v14, %v1837_v51  ;;  %2529 = vperm.xlu1 %3820, %v2387_v9   ;;  %v1276_v13 = vmul.f32 %v4995_v11, %v6732_v32  ;;  %v1279_v39 = vmul.f32 %v4995_v11, %v6733_v22  ;;  %v2391_v58 = vld [vmem:[#allocation2 + $0x1a2] sm:$0xff] }
 0x26b   : > { %v1278_v41 = vmul.f32 %v4995_v11, %v6734_v1  ;;  %v1519_v10 = vmul.f32 %v5166_v56, %v6735_v52  ;;  %v1578_v21 = vadd.f32 %v1546_v48, %v1318_v38  ;;  %v1776_v51 = vmul.f32 %v5341_v55, %v6736_v15  ;;  %v6737_v32 = vld [vmem:[#allocation61_spill] sm:$0xff]  ;;  %v6739_v48 = vld [vmem:[#allocation178_spill] sm:$0xff] }
 0x26c   : > { %6731 = vst [vmem:[#allocation69_spill] sm:$0xff] %v5465_v0  ;;  %v2068_v14 = vadd.f32 %v2036_v28, %v1807_v54  ;;  %v2296_v9 = vmul.f32 %v5442_v37, %v2135_v36  ;;  %v5479_v6 = vadd.f32 %v1277_v19, %v5280_v49  ;;  %v1281_v22 = vmul.f32 %v4995_v11, %v6737_v32  ;;  %v6738_v0 = vld [vmem:[#allocation145_spill] sm:$0xff]  ;;  %v2030_v57 = vpop.permute.xlu1 %2029 }
 0x26d   : > { %v1548_v1 = vadd.f32 %v1516_v40, %v5349_v50  ;;  %v1779_v52 = vmul.f32 %v5341_v55, %v6738_v0  ;;  %v1838_v63 = vadd.f32 %v1806_v31, %v1578_v21  ;;  %v2037_v38 = vmul.f32 %v5414_v59, %v6739_v48  ;;  %v6740_v40 = vld [vmem:[#allocation115_spill] sm:$0xff]  ;;  %v5502_v31 = vpop.permute.xlu0 %2144  ;;  %v6741_v21 = vld [vmem:[#allocation180_spill] sm:$0xff]  ;;  %v6747_v48 = vld [vmem:[#allocation117_spill] sm:$0xff] }
 0x26e   : > { %v5488_v15 = vadd.f32 %v2296_v9, %v2068_v14  ;;  %v2067_v28 = vmul.f32 %v5414_v59, %v2030_v57  ;;  %2549 = vperm.xlu1 %3820, %v2391_v58   ;;  %v5492_v49 = vadd.f32 %v1276_v13, %v5285_v26  ;;  %v5495_v19 = vadd.f32 %v1279_v39, %v5288_v29  ;;  %v6742_v29 = vld [vmem:[#allocation103_spill] sm:$0xff]  ;;  %v6743_v13 = vld [vmem:[#allocation64_spill] sm:$0xff] }
 0x26f   : > { %v5498_v50 = vadd.f32 %v1278_v41, %v5295_v34  ;;  %v1521_v54 = vmul.f32 %v5166_v56, %v6740_v40  ;;  %v1551_v0 = vadd.f32 %v1519_v10, %v5356_v30  ;;  %v1808_v36 = vadd.f32 %v1776_v51, %v1548_v1  ;;  %v6744_v41 = vld [vmem:[#allocation116_spill] sm:$0xff]  ;;  %v6745_v10 = vld [vmem:[#allocation147_spill] sm:$0xff] }
 0x270   : > { %v2040_v57 = vmul.f32 %v5414_v59, %v6741_v21  ;;  %v5507_v58 = vadd.f32 %v2067_v28, %v1838_v63  ;;  %v5510_v26 = vadd.f32 %v1281_v22, %v5298_v53  ;;  %v1280_v34 = vmul.f32 %v4995_v11, %v6742_v29  ;;  %v2140_v9 = vpop.permute.xlu1 %2139  ;;  %v6746_v1 = vld [vmem:[#allocation104_spill] sm:$0xff] }
 0x271   : > { %v1283_v39 = vmul.f32 %v4995_v11, %v6743_v13  ;;  %v1520_v14 = vmul.f32 %v5166_v56, %v6744_v41  ;;  %v1811_v30 = vadd.f32 %v1779_v52, %v1551_v0  ;;  %v1781_v51 = vmul.f32 %v5341_v55, %v6745_v10  ;;  %v6748_v40 = vld [vmem:[#allocation148_spill] sm:$0xff]  ;;  %v2155_v29 = vpop.permute.xlu0 %2154  ;;  %v6751_v10 = vld [vmem:[#allocation149_spill] sm:$0xff] }
 0x272   : > { %v2069_v32 = vadd.f32 %v2037_v38, %v1808_v36  ;;  %v2297_v63 = vmul.f32 %v5442_v37, %v2140_v9  ;;  %v1282_v53 = vmul.f32 %v4995_v11, %v6746_v1  ;;  %v1553_v22 = vadd.f32 %v1521_v54, %v5359_v42  ;;  %v6749_v52 = vld [vmem:[#allocation16_spill] sm:$0xff]  ;;  %v6750_v54 = vld [vmem:[#allocation118_spill] sm:$0xff] }
 0x273   : > { %v1523_v28 = vmul.f32 %v5166_v56, %v6747_v48  ;;  %v1780_v21 = vmul.f32 %v5341_v55, %v6748_v40  ;;  %v2072_v13 = vadd.f32 %v2040_v57, %v1811_v30  ;;  %v2042_v0 = vmul.f32 %v5414_v59, %v6749_v52 }
 0x274   : > { %v5530_v41 = vadd.f32 %v2297_v63, %v2069_v32  ;;  %v2300_v38 = vmul.f32 %v5442_v37, %v2155_v29  ;;  %v5534_v36 = vadd.f32 %v1280_v34, %v5306_v18  ;;  %v5537_v42 = vadd.f32 %v1283_v39, %v5309_v47  ;;  %v5543_v57 = vpop.permute.xlu1 %2149  ;;  %v6752_v63 = vld [vmem:[#allocation20_spill] sm:$0xff]  ;;  %v6753_v34 = vld [vmem:[#allocation119_spill] sm:$0xff]  ;;  %v6754_v29 = vld [vmem:[#allocation150_spill] sm:$0xff] }
 0x275   : > { %v1522_v9 = vmul.f32 %v5166_v56, %v6750_v54  ;;  %v1783_v1 = vmul.f32 %v5341_v55, %v6751_v10  ;;  %v1552_v30 = vadd.f32 %v1520_v14, %v5362_v44  ;;  %v1813_v32 = vadd.f32 %v1781_v51, %v1553_v22  ;;  %v2165_v54 = vpop.permute.xlu0 %2164  ;;  %v6755_v14 = vld [vmem:[#allocation30_spill] sm:$0xff] }
 0x276   : > { %v2041_v48 = vmul.f32 %v5414_v59, %v6752_v63  ;;  %v5548_v40 = vadd.f32 %v2300_v38, %v2072_v13  ;;  %v5551_v18 = vadd.f32 %v1282_v53, %v5326_v12  ;;  %v1555_v47 = vadd.f32 %v1523_v28, %v5365_v33  ;;  %v6756_v12 = vld [vmem:[#allocation120_spill] sm:$0xff]  ;;  %v6757_v28 = vld [vmem:[#allocation151_spill] sm:$0xff] }
 0x277   : > { %v1525_v39 = vmul.f32 %v5166_v56, %v6753_v34  ;;  %v1782_v52 = vmul.f32 %v5341_v55, %v6754_v29  ;;  %v1812_v10 = vadd.f32 %v1780_v21, %v1552_v30  ;;  %v2074_v44 = vadd.f32 %v2042_v0, %v1813_v32  ;;  %v6758_v29 = vld [vmem:[#allocation36_spill] sm:$0xff] }
 0x278   : > { %v2044_v51 = vmul.f32 %v5414_v59, %v6755_v14  ;;  %v2302_v22 = vmul.f32 %v5442_v37, %v2165_v54  ;;  %v1554_v13 = vadd.f32 %v1522_v9, %v5370_v8  ;;  %v1524_v53 = vmul.f32 %v5166_v56, %v6756_v12  ;;  %v2160_v63 = vpop.permute.xlu1 %2159  ;;  %v6759_v54 = vld [vmem:[#allocation121_spill] sm:$0xff]  ;;  %v6760_v14 = vld [vmem:[#allocation152_spill] sm:$0xff] }
 0x279   : > { %v1815_v33 = vadd.f32 %v1783_v1, %v1555_v47  ;;  %v1785_v38 = vmul.f32 %v5341_v55, %v6757_v28  ;;  %v2073_v34 = vadd.f32 %v2041_v48, %v1812_v10  ;;  %v2043_v21 = vmul.f32 %v5414_v59, %v6758_v29  ;;  %v2175_v47 = vpop.permute.xlu0 %2174  ;;  %v6761_v28 = vld [vmem:[#allocation122_spill] sm:$0xff] }
 0x27a   : > { %v5568_v0 = vadd.f32 %v2302_v22, %v2074_v44  ;;  %v2301_v30 = vmul.f32 %v5442_v37, %v2160_v63  ;;  %v1557_v32 = vadd.f32 %v1525_v39, %v5378_v62  ;;  %v1527_v8 = vmul.f32 %v5166_v56, %v6759_v54  ;;  %v6762_v63 = vld [vmem:[#allocation153_spill] sm:$0xff]  ;;  %v6764_v54 = vld [vmem:[#allocation154_spill] sm:$0xff] }
 0x27b   : > { %v1814_v9 = vadd.f32 %v1782_v52, %v1554_v13  ;;  %v1784_v1 = vmul.f32 %v5341_v55, %v6760_v14  ;;  %v2076_v12 = vadd.f32 %v2044_v51, %v1815_v33  ;;  %v2046_v48 = vmul.f32 %v5414_v59, %v5019_v61 }
 0x27c   : > { %v5578_v10 = vadd.f32 %v2301_v30, %v2073_v34  ;;  %v2304_v44 = vmul.f32 %v5442_v37, %v2175_v47  ;;  %v1556_v22 = vadd.f32 %v1524_v53, %v5381_v4  ;;  %v1526_v62 = vmul.f32 %v5166_v56, %v6761_v28  ;;  %v2170_v13 = vpop.permute.xlu1 %2169  ;;  %v6763_v30 = vld [vmem:[#allocation123_spill] sm:$0xff] }
 0x27d   : > { %v1817_v39 = vadd.f32 %v1785_v38, %v1557_v32  ;;  %v1787_v52 = vmul.f32 %v5341_v55, %v6762_v63  ;;  %v2075_v29 = vadd.f32 %v2043_v21, %v1814_v9  ;;  %v2045_v51 = vmul.f32 %v5414_v59, %v5038_v20  ;;  %v2185_v32 = vpop.permute.xlu0 %2184 }
 0x27e   : > { %v5588_v33 = vadd.f32 %v2304_v44, %v2076_v12  ;;  %v2303_v61 = vmul.f32 %v5442_v37, %v2170_v13  ;;  %v1559_v34 = vadd.f32 %v1527_v8, %v5390_v5  ;;  %v1529_v4 = vmul.f32 %v5166_v56, %v6763_v30  ;;  %v6765_v12 = vld [vmem:[#allocation124_spill] sm:$0xff]  ;;  %v6766_v44 = vld [vmem:[#allocation155_spill] sm:$0xff]  ;;  %v6767_v13 = vld [vmem:[#allocation125_spill] sm:$0xff] }
 0x27f   : > { %v1816_v53 = vadd.f32 %v1784_v1, %v1556_v22  ;;  %v1786_v38 = vmul.f32 %v5341_v55, %v6764_v54  ;;  %v2078_v14 = vadd.f32 %v2046_v48, %v1817_v39  ;;  %v2048_v21 = vmul.f32 %v5414_v59, %v5059_v3  ;;  %v6769_v54 = vld [vmem:[#allocation126_spill] sm:$0xff] }
 0x280   : > { %v5598_v9 = vadd.f32 %v2303_v61, %v2075_v29  ;;  %v2306_v20 = vmul.f32 %v5442_v37, %v2185_v32  ;;  %v1558_v47 = vadd.f32 %v1526_v62, %v5393_v25  ;;  %v1528_v5 = vmul.f32 %v5166_v56, %v6765_v12  ;;  %v2180_v22 = vpop.permute.xlu1 %2179  ;;  %v6768_v29 = vld [vmem:[#allocation156_spill] sm:$0xff]  ;;  %v6770_v32 = vld [vmem:[#allocation157_spill] sm:$0xff] }
 0x281   : > { %v1819_v8 = vadd.f32 %v1787_v52, %v1559_v34  ;;  %v1789_v1 = vmul.f32 %v5341_v55, %v6766_v44  ;;  %v2077_v28 = vadd.f32 %v2045_v51, %v1816_v53  ;;  %v2047_v48 = vmul.f32 %v5414_v59, %v5081_v35  ;;  %v2195_v61 = vpop.permute.xlu0 %2194  ;;  %v6772_v44 = vld [vmem:[#allocation158_spill] sm:$0xff] }
 0x282   : > { %v5608_v39 = vadd.f32 %v2306_v20, %v2078_v14  ;;  %v2305_v3 = vmul.f32 %v5442_v37, %v2180_v22  ;;  %v1561_v63 = vadd.f32 %v1529_v4, %v5409_v60  ;;  %v1531_v25 = vmul.f32 %v5166_v56, %v6767_v13  ;;  %v6773_v13 = vld [vmem:[#allocation128_spill] sm:$0xff] }
 0x283   : > { %v1818_v62 = vadd.f32 %v1786_v38, %v1558_v47  ;;  %v1788_v52 = vmul.f32 %v5341_v55, %v6768_v29  ;;  %v2080_v34 = vadd.f32 %v2048_v21, %v1819_v8  ;;  %v2050_v51 = vmul.f32 %v5414_v59, %v5104_v7  ;;  %v6771_v8 = vld [vmem:[#allocation127_spill] sm:$0xff] }
 0x284   : > { %v5618_v30 = vadd.f32 %v2305_v3, %v2077_v28  ;;  %v2308_v35 = vmul.f32 %v5442_v37, %v2195_v61  ;;  %v1560_v53 = vadd.f32 %v1528_v5, %v5417_v16  ;;  %v1530_v60 = vmul.f32 %v5166_v56, %v6769_v54  ;;  %v2190_v14 = vpop.permute.xlu1 %2189  ;;  %v6776_v54 = vld [vmem:[#allocation129_spill] sm:$0xff] }
 0x285   : > { %v1821_v4 = vadd.f32 %v1789_v1, %v1561_v63  ;;  %v1791_v38 = vmul.f32 %v5341_v55, %v6770_v32  ;;  %v2079_v20 = vadd.f32 %v2047_v48, %v1818_v62  ;;  %v2049_v21 = vmul.f32 %v5414_v59, %v5125_v24  ;;  %v2205_v22 = vpop.permute.xlu0 %2204  ;;  %v6774_v62 = vld [vmem:[#allocation159_spill] sm:$0xff] }
 0x286   : > { %v5628_v47 = vadd.f32 %v2308_v35, %v2080_v34  ;;  %v2307_v7 = vmul.f32 %v5442_v37, %v2190_v14  ;;  %v1563_v12 = vadd.f32 %v1531_v25, %v5420_v45  ;;  %v1533_v16 = vmul.f32 %v5166_v56, %v6771_v8  ;;  %v6775_v34 = vld [vmem:[#allocation42_spill] sm:$0xff] }
 0x287   : > { %v1820_v5 = vadd.f32 %v1788_v52, %v1560_v53  ;;  %v1790_v1 = vmul.f32 %v5341_v55, %v6772_v44  ;;  %v2082_v28 = vadd.f32 %v2050_v51, %v1821_v4  ;;  %v2052_v48 = vmul.f32 %v5414_v59, %v5146_v17  ;;  %v6777_v4 = vld [vmem:[#allocation160_spill] sm:$0xff]  ;;  %v6780_v44 = vld [vmem:[#allocation161_spill] sm:$0xff] }
 0x288   : > { %v5638_v3 = vadd.f32 %v2307_v7, %v2079_v20  ;;  %v2310_v24 = vmul.f32 %v5442_v37, %v2205_v22  ;;  %v1562_v63 = vadd.f32 %v1530_v60, %v5429_v27  ;;  %v1532_v45 = vmul.f32 %v5166_v56, %v6773_v13  ;;  %v2200_v52 = vpop.permute.xlu1 %2199  ;;  %v6778_v20 = vld [vmem:[#allocation46_spill] sm:$0xff] }
 0x289   : > { %v1823_v25 = vadd.f32 %v1791_v38, %v1563_v12  ;;  %v1793_v29 = vmul.f32 %v5341_v55, %v6774_v62  ;;  %v2081_v61 = vadd.f32 %v2049_v21, %v1820_v5  ;;  %v2051_v51 = vmul.f32 %v5414_v59, %v6775_v34  ;;  %v2215_v38 = vpop.permute.xlu0 %2214  ;;  %v6779_v5 = vld [vmem:[#allocation130_spill] sm:$0xff]  ;;  %v6782_v62 = vld [vmem:[#allocation131_spill] sm:$0xff] }
 0x28a   : > { %v5648_v35 = vadd.f32 %v2310_v24, %v2082_v28  ;;  %v2309_v17 = vmul.f32 %v5442_v37, %v2200_v52  ;;  %v1565_v53 = vadd.f32 %v1533_v16, %v5436_v23  ;;  %v1535_v27 = vmul.f32 %v5166_v56, %v6776_v54  ;;  %v6781_v24 = vld [vmem:[#allocation48_spill] sm:$0xff]  ;;  %v6783_v52 = vld [vmem:[#allocation162_spill] sm:$0xff] }
 0x28b   : > { %v1822_v60 = vadd.f32 %v1790_v1, %v1562_v63  ;;  %v1792_v32 = vmul.f32 %v5341_v55, %v6777_v4  ;;  %v2084_v14 = vadd.f32 %v2052_v48, %v1823_v25  ;;  %v2054_v21 = vmul.f32 %v5414_v59, %v6778_v20  ;;  %v6785_v4 = vld [vmem:[#allocation132_spill] sm:$0xff] }
 0x28c   : > { %v5658_v7 = vadd.f32 %v2309_v17, %v2081_v61  ;;  %v2312_v12 = vmul.f32 %v5442_v37, %v2215_v38  ;;  %v1564_v8 = vadd.f32 %v1532_v45, %v5439_v46  ;;  %v1534_v23 = vmul.f32 %v5166_v56, %v6779_v5  ;;  %v2210_v22 = vpop.permute.xlu1 %2209  ;;  %v6784_v17 = vld [vmem:[#allocation50_spill] sm:$0xff]  ;;  %v6786_v38 = vld [vmem:[#allocation163_spill] sm:$0xff] }
 0x28d   : > { %v1825_v16 = vadd.f32 %v1793_v29, %v1565_v53  ;;  %v1795_v1 = vmul.f32 %v5341_v55, %v6780_v44  ;;  %v2083_v28 = vadd.f32 %v2051_v51, %v1822_v60  ;;  %v2053_v48 = vmul.f32 %v5414_v59, %v6781_v24  ;;  %v2225_v61 = vpop.permute.xlu0 %2224  ;;  %v6788_v44 = vld [vmem:[#allocation133_spill] sm:$0xff] }
 0x28e   : > { %v5668_v63 = vadd.f32 %v2312_v12, %v2084_v14  ;;  %v2311_v13 = vmul.f32 %v5442_v37, %v2210_v22  ;;  %v1567_v25 = vadd.f32 %v1535_v27, %v5451_v43  ;;  %v1537_v46 = vmul.f32 %v5166_v56, %v6782_v62  ;;  %v6787_v12 = vld [vmem:[#allocation52_spill] sm:$0xff] }
 0x28f   : > { %v1824_v45 = vadd.f32 %v1792_v32, %v1564_v8  ;;  %v1794_v29 = vmul.f32 %v5341_v55, %v6783_v52  ;;  %v2086_v34 = vadd.f32 %v2054_v21, %v1825_v16  ;;  %v2056_v51 = vmul.f32 %v5414_v59, %v6784_v17  ;;  %v6789_v22 = vld [vmem:[#allocation164_spill] sm:$0xff]  ;;  %v6791_v52 = vld [vmem:[#allocation134_spill] sm:$0xff] }
 0x290   : > { %v5678_v53 = vadd.f32 %v2311_v13, %v2083_v28  ;;  %v2314_v54 = vmul.f32 %v5442_v37, %v2225_v61  ;;  %v1566_v60 = vadd.f32 %v1534_v23, %v5454_v2  ;;  %v1536_v43 = vmul.f32 %v5166_v56, %v6785_v4  ;;  %v2220_v14 = vpop.permute.xlu1 %2219  ;;  %v6790_v13 = vld [vmem:[#allocation54_spill] sm:$0xff]  ;;  %v6792_v61 = vld [vmem:[#allocation165_spill] sm:$0xff] }
 0x291   : > { %v1827_v27 = vadd.f32 %v1795_v1, %v1567_v25  ;;  %v1797_v32 = vmul.f32 %v5341_v55, %v6786_v38  ;;  %v2085_v20 = vadd.f32 %v2053_v48, %v1824_v45  ;;  %v2055_v21 = vmul.f32 %v5414_v59, %v6787_v12  ;;  %v2235_v28 = vpop.permute.xlu0 %2234  ;;  %v6794_v38 = vld [vmem:[#allocation135_spill] sm:$0xff] }
 0x292   : > { %v5688_v8 = vadd.f32 %v2314_v54, %v2086_v34  ;;  %v2313_v5 = vmul.f32 %v5442_v37, %v2220_v14  ;;  %v1569_v16 = vadd.f32 %v1537_v46, %v5479_v6  ;;  %v1539_v2 = vmul.f32 %v5166_v56, %v6788_v44  ;;  %v6793_v54 = vld [vmem:[#allocation56_spill] sm:$0xff]  ;;  %v6795_v14 = vld [vmem:[#allocation166_spill] sm:$0xff] }
 0x293   : > { %v1826_v23 = vadd.f32 %v1794_v29, %v1566_v60  ;;  %v1796_v1 = vmul.f32 %v5341_v55, %v6789_v22  ;;  %v2088_v24 = vadd.f32 %v2056_v51, %v1827_v27  ;;  %v2058_v48 = vmul.f32 %v5414_v59, %v6790_v13  ;;  %v6797_v22 = vld [vmem:[#allocation136_spill] sm:$0xff] }
 0x294   : > { %v5698_v25 = vadd.f32 %v2313_v5, %v2085_v20  ;;  %v2316_v62 = vmul.f32 %v5442_v37, %v2235_v28  ;;  %v1568_v45 = vadd.f32 %v1536_v43, %v5492_v49  ;;  %v1538_v6 = vmul.f32 %v5166_v56, %v6791_v52  ;;  %v2230_v34 = vpop.permute.xlu1 %2229  ;;  %v6796_v5 = vld [vmem:[#allocation58_spill] sm:$0xff]  ;;  %v6798_v28 = vld [vmem:[#allocation167_spill] sm:$0xff] }
 0x295   : > { %v1829_v46 = vadd.f32 %v1797_v32, %v1569_v16  ;;  %v1799_v29 = vmul.f32 %v5341_v55, %v6792_v61  ;;  %v2087_v17 = vadd.f32 %v2055_v21, %v1826_v23  ;;  %v2057_v51 = vmul.f32 %v5414_v59, %v6793_v54  ;;  %v2245_v20 = vpop.permute.xlu0 %2244  ;;  %v6800_v61 = vld [vmem:[#allocation137_spill] sm:$0xff] }
 0x296   : > { %v5708_v60 = vadd.f32 %v2316_v62, %v2088_v24  ;;  %v2315_v4 = vmul.f32 %v5442_v37, %v2230_v34  ;;  %v1571_v27 = vadd.f32 %v1539_v2, %v5495_v19  ;;  %v1541_v49 = vmul.f32 %v5166_v56, %v6794_v38  ;;  %v6799_v62 = vld [vmem:[#allocation68_spill] sm:$0xff] }
 0x297   : > { %v1828_v43 = vadd.f32 %v1796_v1, %v1568_v45  ;;  %v1798_v32 = vmul.f32 %v5341_v55, %v6795_v14  ;;  %v2090_v12 = vadd.f32 %v2058_v48, %v1829_v46  ;;  %v2060_v21 = vmul.f32 %v5414_v59, %v6796_v5  ;;  %v6801_v34 = vld [vmem:[#allocation168_spill] sm:$0xff]  ;;  %v6803_v14 = vld [vmem:[#allocation138_spill] sm:$0xff] }
 0x298   : > { %v5718_v16 = vadd.f32 %v2315_v4, %v2087_v17  ;;  %v2318_v44 = vmul.f32 %v5442_v37, %v2245_v20  ;;  %v1570_v23 = vadd.f32 %v1538_v6, %v5498_v50  ;;  %v1540_v19 = vmul.f32 %v5166_v56, %v6797_v22  ;;  %v2240_v24 = vpop.permute.xlu1 %2239  ;;  %v6802_v4 = vld [vmem:[#allocation62_spill] sm:$0xff]  ;;  %v6804_v20 = vld [vmem:[#allocation169_spill] sm:$0xff] }
 0x299   : > { %v1831_v2 = vadd.f32 %v1799_v29, %v1571_v27  ;;  %v1801_v1 = vmul.f32 %v5341_v55, %v6798_v28  ;;  %v2089_v13 = vadd.f32 %v2057_v51, %v1828_v43  ;;  %v2059_v48 = vmul.f32 %v5414_v59, %v6799_v62  ;;  %v2255_v17 = vpop.permute.xlu0 %2254 }
 0x29a   : > { %v5728_v45 = vadd.f32 %v2318_v44, %v2090_v12  ;;  %v2317_v52 = vmul.f32 %v5442_v37, %v2240_v24  ;;  %v1573_v46 = vadd.f32 %v1541_v49, %v5510_v26  ;;  %v1543_v50 = vmul.f32 %v5166_v56, %v6800_v61  ;;  %v6805_v44 = vld [vmem:[#allocation63_spill] sm:$0xff]  ;;  %v6807_v24 = vld [vmem:[#allocation170_spill] sm:$0xff] }
 0x29b   : > { %v1830_v6 = vadd.f32 %v1798_v32, %v1570_v23  ;;  %v1800_v29 = vmul.f32 %v5341_v55, %v6801_v34  ;;  %v2092_v54 = vadd.f32 %v2060_v21, %v1831_v2  ;;  %v2062_v51 = vmul.f32 %v5414_v59, %v6802_v4  ;;  %v6806_v2 = vld [vmem:[#allocation107_spill] sm:$0xff]  ;;  %v6810_v34 = vld [vmem:[#allocation60_spill] sm:$0xff] }
 0x29c   : > { %v5738_v27 = vadd.f32 %v2317_v52, %v2089_v13  ;;  %v2320_v38 = vmul.f32 %v5442_v37, %v2255_v17  ;;  %v1572_v43 = vadd.f32 %v1540_v19, %v5534_v36  ;;  %v1542_v26 = vmul.f32 %v5166_v56, %v6803_v14  ;;  %v2250_v12 = vpop.permute.xlu1 %2249  ;;  %v6808_v52 = vld [vmem:[#allocation65_spill] sm:$0xff]  ;;  %v6811_v4 = vld [vmem:[#allocation140_spill] sm:$0xff] }
 0x29d   : > { %v1833_v49 = vadd.f32 %v1801_v1, %v1573_v46  ;;  %v1803_v32 = vmul.f32 %v5341_v55, %v6804_v20  ;;  %v2091_v5 = vadd.f32 %v2059_v48, %v1830_v6  ;;  %v2061_v21 = vmul.f32 %v5414_v59, %v6805_v44  ;;  %v2265_v13 = vpop.permute.xlu0 %2264  ;;  %v6809_v6 = vld [vmem:[#allocation40_spill] sm:$0xff]  ;;  %v6813_v20 = vld [vmem:[#allocation11_spill] sm:$0xff]  ;;  %v6815_v44 = vld [vmem:[#allocation102_spill] sm:$0xff] }
 0x29e   : > { %v5748_v23 = vadd.f32 %v2320_v38, %v2092_v54  ;;  %v2319_v22 = vmul.f32 %v5442_v37, %v2250_v12  ;;  %v1284_v28 = vmul.f32 %v4995_v11, %v6806_v2  ;;  %v1575_v36 = vadd.f32 %v1543_v50, %v5537_v42  ;;  %v6814_v12 = vld [vmem:[#allocation38_spill] sm:$0xff] }
 0x29f   : > { %v1832_v19 = vadd.f32 %v1800_v29, %v1572_v43  ;;  %v1802_v1 = vmul.f32 %v5341_v55, %v6807_v24  ;;  %v2094_v62 = vadd.f32 %v2062_v51, %v1833_v49  ;;  %v2064_v48 = vmul.f32 %v5414_v59, %v6808_v52  ;;  %v6812_v43 = vld [vmem:[#allocation66_spill] sm:$0xff]  ;;  %v6816_v24 = vld [vmem:[#allocation173_spill] sm:$0xff] }
 0x2a0   : > { %v5758_v46 = vadd.f32 %v2319_v22, %v2091_v5  ;;  %v2322_v61 = vmul.f32 %v5442_v37, %v2265_v13  ;;  %v1056_v17 = vadd.f32 %v6810_v34, %v6809_v6  ;;  %v1574_v54 = vadd.f32 %v1542_v26, %v5551_v18  ;;  %v2260_v29 = vpop.permute.xlu1 %2259  ;;  %v6817_v13 = vld [vmem:[#allocation70_spill] sm:$0xff]  ;;  %v6820_v34 = vld [vmem:[#allocation111_spill] sm:$0xff] }
 0x2a1   : > { %v1544_v42 = vmul.f32 %v5166_v56, %v6811_v4  ;;  %v1835_v50 = vadd.f32 %v1803_v32, %v1575_v36  ;;  %v2093_v38 = vadd.f32 %v2061_v21, %v1832_v19  ;;  %v2063_v51 = vmul.f32 %v5414_v59, %v6812_v43  ;;  %v2275_v2 = vpop.permute.xlu0 %2274 }
 0x2a2   : > { %v5768_v14 = vadd.f32 %v2322_v61, %v2094_v62  ;;  %v2321_v49 = vmul.f32 %v5442_v37, %v2260_v29  ;;  %v769_v5 = vadd.f32 %v6814_v12, %v6813_v20  ;;  %v1257_v22 = vmul.f32 %v4995_v11, %v6815_v44  ;;  %v6818_v62 = vld [vmem:[#allocation179_spill] sm:$0xff]  ;;  %v6819_v61 = vld [vmem:[#allocation44_spill] sm:$0xff]  ;;  %v6825_v12 = vld [vmem:[#allocation13_spill] sm:$0xff] }
 0x2a3   : > { %v1316_v18 = vadd.f32 %v1284_v28, %v1056_v17  ;;  %v1834_v26 = vadd.f32 %v1802_v1, %v1574_v54  ;;  %v1804_v32 = vmul.f32 %v5341_v55, %v6816_v24  ;;  %v2096_v21 = vadd.f32 %v2064_v48, %v1835_v50  ;;  %v6821_v17 = vld [vmem:[#allocation67_spill] sm:$0xff]  ;;  %v6822_v50 = vld [vmem:[#allocation18_spill] sm:$0xff] }
 0x2a4   : > { %v5777_v36 = vadd.f32 %v2321_v49, %v2093_v38  ;;  %v2324_v19 = vmul.f32 %v5442_v37, %v2275_v2  ;;  %v738_v52 = vmul.f32 %v6818_v62, %v6817_v13  ;;  %v1029_v6 = vadd.f32 %v6819_v61, %v769_v5  ;;  %v2270_v28 = vpop.permute.xlu1 %2269  ;;  %v6823_v38 = vld [vmem:[#allocation177_spill] sm:$0xff]  ;;  %v6824_v20 = vld [vmem:[#allocation79_spill] sm:$0xff] }
 0x2a5   : > { %v1517_v4 = vmul.f32 %v5166_v56, %v6820_v34  ;;  %v1576_v29 = vadd.f32 %v1544_v42, %v1316_v18  ;;  %v2095_v1 = vadd.f32 %v2063_v51, %v1834_v26  ;;  %v2065_v54 = vmul.f32 %v5414_v59, %v6821_v17  ;;  %v6826_v2 = vld [vmem:[#allocation143_spill] sm:$0xff]  ;;  %v2285_v42 = vpop.permute.xlu0 %2284  ;;  %v5804_v34 = vld [vmem:[%s6311_s1 + $0x8] ss:$0 sm:$0xff]  ;;  %v6830_v17 = vld [vmem:[#allocation114_spill] sm:$0xff] }
 0x2a6   : > { %v5787_v43 = vadd.f32 %v2324_v19, %v2096_v21  ;;  %v2323_v48 = vmul.f32 %v5442_v37, %v2270_v28  ;;  %v478_v49 = vmul.f32 %v6823_v38, %v6822_v50  ;;  %v998_v44 = vmul.f32 %v6825_v12, %v6824_v20  ;;  %v6827_v19 = vld [vmem:[#allocation19_spill] sm:$0xff] }
 0x2a7   : > { %v1289_v5 = vadd.f32 %v1257_v22, %v1029_v6  ;;  %v1777_v24 = vmul.f32 %v5341_v55, %v6826_v2  ;;  %v1836_v18 = vadd.f32 %v1804_v32, %v1576_v29  ;;  %v2326_v26 = vmul.f32 %v5442_v37, %v2285_v42  ;;  %v6828_v22 = vld [vmem:[#allocation176_spill] sm:$0xff]  ;;  %v6829_v32 = vld [vmem:[#allocation69_spill] sm:$0xff]  ;;  %v6832_v42 = vld [vmem:[#allocation14_spill] sm:$0xff] }
 0x2a8   : > { %v5796_v51 = vadd.f32 %v2323_v48, %v2095_v1  ;;  %v770_v21 = vadd.f32 %v738_v52, %v478_v49  ;;  %v1258_v13 = vmul.f32 %v4995_v11, %v6827_v19  ;;  %v2280_v61 = vpop.permute.xlu1 %2279  ;;  %v2038_v6 = vmul.f32 %v5414_v59, %v6828_v22 }
 0x2a9   : > { %v1549_v62 = vadd.f32 %v1517_v4, %v1289_v5  ;;  %v2097_v28 = vadd.f32 %v2065_v54, %v1836_v18  ;;  %v5809_v29 = vadd.f32 %v2326_v26, %v6829_v32  ;;  %v2325_v1 = vmul.f32 %v5442_v37, %v2280_v61  ;;  %v2395_v48 = vpop.permute.xlu0 %2394  ;;  %v6831_v54 = vld [vmem:[#allocation146_spill] sm:$0xff] }
 0x2aa   : > { %v1030_v52 = vadd.f32 %v998_v44, %v770_v21  ;;  %v1518_v11 = vmul.f32 %v5166_v56, %v6830_v17  ;;  %v2298_v50 = vmul.f32 %v5442_v37, %v5502_v31  ;;  %v2556_v49 = vmul.f32 %v5804_v34, %v2395_v48  ;;  %v5824_v44 = vld [vmem:[%s6312_s2] ss:$0 sm:$0xff] }
 0x2ab   : > { %v1809_v4 = vadd.f32 %v1777_v24, %v1549_v62  ;;  %v5816_v38 = vadd.f32 %v2325_v1, %v2097_v28  ;;  %v1778_v12 = vmul.f32 %v5341_v55, %v6831_v54  ;;  %v2039_v18 = vmul.f32 %v5414_v59, %v6832_v42 }
 0x2ac   : > { %v1290_v20 = vadd.f32 %v1258_v13, %v1030_v52  ;;  %v2290_v5 = vpop.permute.xlu1 %2289  ;;  %v2588_v2 = vadd.f32 %v2556_v49, %v5488_v15  ;;  %v3889_v26 = vmov 1983009808   ;;  %v2299_v15 = vmul.f32 %v5442_v37, %v5543_v57 }
 0x2ad   : > { %v2070_v56 = vadd.f32 %v2038_v6, %v1809_v4  ;;  %v2327_v24 = vmul.f32 %v5442_v37, %v2290_v5  ;;  %v2757_v21 = vunpack.c.l.s4 %v3889_v26  ;;  %v2405_v19 = vpop.permute.xlu0 %2404 }
 0x2ae   : > { %v1550_v31 = vadd.f32 %v1518_v11, %v1290_v20  ;;  %v2626_v55 = vadd.f32 %v5824_v44, %v2588_v2  ;;  %v2558_v61 = vmul.f32 %v5804_v34, %v2405_v19 }
 0x2af   : > { %v2330_v13 = vadd.f32 %v2298_v50, %v2070_v56  ;;  %v5832_v62 = vadd.f32 %v2327_v24, %v5507_v58  ;;  %v2758_v52 = vunpack.c.0.s8 %v2757_v21 }
 0x2b0   : > { %v1810_v22 = vadd.f32 %v1778_v12, %v1550_v31  ;;  %v2400_v6 = vpop.permute.xlu1 %2399  ;;  %v2658_v1 = vmax.f32 %v2626_v55, 0.0  ;;  %v6833_v12 = vld [vmem:[#allocation172_spill] sm:$0xff] }
 0x2b1   : > { %v2590_v28 = vadd.f32 %v2558_v61, %v2330_v13  ;;  %v2557_v32 = vmul.f32 %v5804_v34, %v2400_v6  ;;  %v2415_v17 = vpop.permute.xlu0 %2414  ;;  %v5846_v5 = vsub.s32 %v2758_v52, %v6833_v12 }
 0x2b2   : > { %v2071_v59 = vadd.f32 %v2039_v18, %v1810_v22  ;;  %v2560_v4 = vmul.f32 %v5804_v34, %v2415_v17  ;;  %v2691_v54 = vsel %vm2690_vm3, %v2658_v1, -inf }
 0x2b3   : > { %v2628_v11 = vadd.f32 %v5824_v44, %v2590_v28  ;;  %v2589_v58 = vadd.f32 %v2557_v32, %v5530_v41 }
 0x2b4   : > { %v2331_v48 = vadd.f32 %v2299_v15, %v2071_v59  ;;  %v2410_v50 = vpop.permute.xlu1 %2409  ;;  %v2592_v57 = vadd.f32 %v2560_v4, %v5548_v40 }
 0x2b5   : > { %v2660_v49 = vmax.f32 %v2628_v11, 0.0  ;;  %v2627_v37 = vadd.f32 %v5824_v44, %v2589_v58  ;;  %v2559_v20 = vmul.f32 %v5804_v34, %v2410_v50  ;;  %v2425_v56 = vpop.permute.xlu0 %2424 }
 0x2b6   : > { %v2630_v24 = vadd.f32 %v5824_v44, %v2592_v57  ;;  %v2562_v18 = vmul.f32 %v5804_v34, %v2425_v56 }
 0x2b7   : > { %v2692_v2 = vsel %vm2690_vm3, %v2660_v49, -inf  ;;  %v2659_v41 = vmax.f32 %v2627_v37, 0.0  ;;  %v2591_v31 = vadd.f32 %v2559_v20, %v2331_v48 }
 0x2b8   : > { %v2693_v42 = vmax.f32 %v2691_v54, %v2692_v2  ;;  %v2420_v26 = vpop.permute.xlu1 %2419  ;;  %v2662_v40 = vmax.f32 %v2630_v24, 0.0  ;;  %v2594_v61 = vadd.f32 %v2562_v18, %v5568_v0 }
 0x2b9   : > { %v2629_v21 = vadd.f32 %v5824_v44, %v2591_v31  ;;  %v2561_v19 = vmul.f32 %v5804_v34, %v2420_v26  ;;  %v2445_v22 = vpop.permute.xlu0 %2444  ;;  %v2694_v15 = vsel %vm2690_vm3, %v2659_v41, -inf }
 0x2ba   : > { %v2755_v13 = vcombine.high %v2693_v42, %v2693_v42  ;;  %v2762_v55 = vrot.slane %v2693_v42, %v5846_v5  ;;  %v2566_v28 = vmul.f32 %v5804_v34, %v2445_v22  ;;  %v2632_v52 = vadd.f32 %v5824_v44, %v2594_v61 }
 0x2bb   : > { %v2661_v6 = vmax.f32 %v2629_v21, 0.0  ;;  %v2697_v11 = vsel %vm2690_vm3, %v2662_v40, -inf  ;;  %v5863_v0 = vadd.f32 %v2561_v19, %v5578_v10 }
 0x2bc   : > { %v2769_v32 = vrot.slane %v2755_v13, %v5846_v5  ;;  %v2770_v59 = vcombine.high %v2762_v55, %v2762_v55  ;;  %v3092_v1 = vsel %vm3091_vm4, %v2762_v55, -inf  ;;  %v2664_v54 = vmax.f32 %v2632_v52, 0.0 }
 0x2bd   : > { %v3093_v17 = vrot.slane %v3092_v1, 4  ;;  %v2695_v58 = vsel %vm2690_vm3, %v2661_v6, -inf  ;;  %v5870_v41 = vadd.f32 %v2566_v28, %v5608_v39 }
 0x2be   : > { %v2771_v4 = vcombine.high %v2769_v32, %v2769_v32  ;;  %v3099_v48 = vsel %vm3091_vm4, %v2770_v59, -inf  ;;  %v3106_v50 = vsel %vm3091_vm4, %v2769_v32, -inf  ;;  %v2696_v49 = vmax.f32 %v2694_v15, %v2695_v58 }
 0x2bf   : > { %v3094_v37 = vmax.f32 %v3092_v1, %v3093_v17  ;;  %v3100_v57 = vrot.slane %v3099_v48, 4  ;;  %v3107_v20 = vrot.slane %v3106_v50, 4  ;;  %v2698_v21 = vsel %vm2690_vm3, %v2664_v54, -inf }
 0x2c0   : > { %v3113_v12 = vsel %vm3091_vm4, %v2771_v4, -inf  ;;  %v2772_v56 = vcombine.high %v2696_v49, %v2696_v49  ;;  %v2779_v2 = vrot.slane %v2696_v49, %v5846_v5 }
 0x2c1   : > { %v3095_v10 = vrot.slane %v3094_v37, 2  ;;  %v3101_v24 = vmax.f32 %v3099_v48, %v3100_v57  ;;  %v3108_v31 = vmax.f32 %v3106_v50, %v3107_v20  ;;  %v3114_v42 = vrot.slane %v3113_v12, 4 }
 0x2c2   : > { %v2786_v18 = vrot.slane %v2772_v56, %v5846_v5  ;;  %v2787_v26 = vcombine.high %v2779_v2, %v2779_v2  ;;  %v3120_v40 = vsel %vm3091_vm4, %v2779_v2, -inf }
 0x2c3   : > { %v3096_v19 = vmax.f32 %v3094_v37, %v3095_v10  ;;  %v3102_v13 = vrot.slane %v3101_v24, 2  ;;  %v3109_v55 = vrot.slane %v3108_v31, 2  ;;  %v3115_v61 = vmax.f32 %v3113_v12, %v3114_v42 }
 0x2c4   : > { %v2788_v22 = vcombine.high %v2786_v18, %v2786_v18  ;;  %v3121_v39 = vrot.slane %v3120_v40, 4  ;;  %v3127_v15 = vsel %vm3091_vm4, %v2787_v26, -inf  ;;  %v3134_v6 = vsel %vm3091_vm4, %v2786_v18, -inf }
 0x2c5   : > { %v3097_v28 = vrot.slane %v3096_v19, 1  ;;  %v3103_v32 = vmax.f32 %v3101_v24, %v3102_v13  ;;  %v3110_v59 = vmax.f32 %v3108_v31, %v3109_v55  ;;  %v3116_v1 = vrot.slane %v3115_v61, 2 }
 0x2c6   : > { %v3122_v52 = vmax.f32 %v3120_v40, %v3121_v39  ;;  %v3128_v17 = vrot.slane %v3127_v15, 4  ;;  %v3135_v58 = vrot.slane %v3134_v6, 4  ;;  %v3141_v4 = vsel %vm3091_vm4, %v2788_v22, -inf }
 0x2c7   : > { %v3098_v48 = vmax.f32 %v3096_v19, %v3097_v28  ;;  %v3104_v50 = vrot.slane %v3103_v32, 1  ;;  %v3111_v49 = vrot.slane %v3110_v59, 1  ;;  %v3117_v37 = vmax.f32 %v3115_v61, %v3116_v1 }
 0x2c8   : > { %v3123_v57 = vrot.slane %v3122_v52, 2  ;;  %v3129_v20 = vmax.f32 %v3127_v15, %v3128_v17  ;;  %v3136_v54 = vmax.f32 %v3134_v6, %v3135_v58  ;;  %v3142_v12 = vrot.slane %v3141_v4, 4  ;;  %v2435_v6 = vpop.permute.xlu1 %2434 }
 0x2c9   : > { %v3105_v56 = vmax.f32 %v3103_v32, %v3104_v50  ;;  %v3112_v2 = vmax.f32 %v3110_v59, %v3111_v49  ;;  %v3118_v10 = vrot.slane %v3117_v37, 1  ;;  %v2699_v24 = vmax.f32 %v2697_v11, %v2698_v21 }
 0x2ca   : > { %v3124_v31 = vmax.f32 %v3122_v52, %v3123_v57  ;;  %v3130_v42 = vrot.slane %v3129_v20, 2  ;;  %v3137_v18 = vrot.slane %v3136_v54, 2  ;;  %v3143_v26 = vmax.f32 %v3141_v4, %v3142_v12 }
 0x2cb   : > { %v3119_v40 = vmax.f32 %v3117_v37, %v3118_v10  ;;  %v3605_v19 = vsel %vm3604_vm5, %v3105_v56, %v3098_v48  ;;  %v2789_v13 = vcombine.high %v2699_v24, %v2699_v24  ;;  %v2796_v55 = vrot.slane %v2699_v24, %v5846_v5  ;;  %v2465_v10 = vpop.permute.xlu0 %2464 }
 0x2cc   : > { %v3607_v61 = vsel %vm3606_vm6, %v3112_v2, %v3605_v19  ;;  %v3125_v22 = vrot.slane %v3124_v31, 1  ;;  %v3131_v39 = vmax.f32 %v3129_v20, %v3130_v42  ;;  %v3138_v15 = vmax.f32 %v3136_v54, %v3137_v18 }
 0x2cd   : > { %v3609_v11 = vsel %vm3608_vm7, %v3119_v40, %v3607_v61  ;;  %v3144_v21 = vrot.slane %v3143_v26, 2  ;;  %v2803_v28 = vrot.slane %v2789_v13, %v5846_v5  ;;  %v2804_v32 = vcombine.high %v2796_v55, %v2796_v55 }
 0x2ce   : > { %v3126_v59 = vmax.f32 %v3124_v31, %v3125_v22  ;;  %v3132_v1 = vrot.slane %v3131_v39, 1  ;;  %v3139_v52 = vrot.slane %v3138_v15, 1  ;;  %v3148_v17 = vsel %vm3091_vm4, %v2796_v55, -inf }
 0x2cf   : > { %v3145_v58 = vmax.f32 %v3143_v26, %v3144_v21  ;;  %v2805_v4 = vcombine.high %v2803_v28, %v2803_v28  ;;  %v3149_v48 = vrot.slane %v3148_v17, 4  ;;  %v3155_v50 = vsel %vm3091_vm4, %v2804_v32, -inf  ;;  %v2455_v26 = vpop.permute.xlu1 %2454 }
 0x2d0   : > { %v3133_v49 = vmax.f32 %v3131_v39, %v3132_v1  ;;  %v3140_v37 = vmax.f32 %v3138_v15, %v3139_v52  ;;  %v3611_v57 = vsel %vm3610_vm8, %v3126_v59, %v3609_v11  ;;  %v3156_v20 = vrot.slane %v3155_v50, 4 }
 0x2d1   : > { %v3146_v54 = vrot.slane %v3145_v58, 1  ;;  %v3150_v12 = vmax.f32 %v3148_v17, %v3149_v48  ;;  %v3162_v56 = vsel %vm3091_vm4, %v2803_v28, -inf  ;;  %v3169_v2 = vsel %vm3091_vm4, %v2805_v4, -inf }
 0x2d2   : > { %v3613_v24 = vsel %vm3612_vm9, %v3133_v49, %v3611_v57  ;;  %v3157_v31 = vmax.f32 %v3155_v50, %v3156_v20  ;;  %v3163_v42 = vrot.slane %v3162_v56, 4  ;;  %v3170_v18 = vrot.slane %v3169_v2, 4 }
 0x2d3   : > { %v3147_v40 = vmax.f32 %v3145_v58, %v3146_v54  ;;  %v3615_v19 = vsel %vm3614_vm10, %v3140_v37, %v3613_v24  ;;  %v3151_v13 = vrot.slane %v3150_v12, 2  ;;  %v2636_v15 = vadd.f32 %v5824_v44, %v5870_v41  ;;  %v2485_v41 = vpop.permute.xlu0 %2484  ;;  %v2475_v4 = vpop.permute.xlu1 %2474 }
 0x2d4   : > { %v3158_v55 = vrot.slane %v3157_v31, 2  ;;  %v3164_v61 = vmax.f32 %v3162_v56, %v3163_v42  ;;  %v3171_v22 = vmax.f32 %v3169_v2, %v3170_v18  ;;  %v2564_v11 = vmul.f32 %v5804_v34, %v2435_v6 }
 0x2d5   : > { %v3617_v39 = vsel %vm3616_vm11, %v3147_v40, %v3615_v19  ;;  %v2570_v21 = vmul.f32 %v5804_v34, %v2465_v10  ;;  %v3152_v28 = vmax.f32 %v3150_v12, %v3151_v13  ;;  %v2631_v32 = vadd.f32 %v5824_v44, %v5863_v0 }
 0x2d6   : > { %3675 = vst.msk [vmem:[%s5898_s10] sm:$0xff] %vm2690_vm3, %v3617_v39  ;;  %v2596_v59 = vadd.f32 %v2564_v11, %v5588_v33  ;;  %v2568_v52 = vmul.f32 %v5804_v34, %v2455_v26  ;;  %v3159_v17 = vmax.f32 %v3157_v31, %v3158_v55  ;;  %v3165_v6 = vrot.slane %v3164_v61, 2 }
 0x2d7   : > { %v2602_v1 = vadd.f32 %v2570_v21, %v5648_v35  ;;  %v3172_v58 = vrot.slane %v3171_v22, 2  ;;  %v2668_v48 = vmax.f32 %v2636_v15, 0.0  ;;  %v3153_v57 = vrot.slane %v3152_v28, 1 }
 0x2d8   : > { %v2634_v50 = vadd.f32 %v5824_v44, %v2596_v59  ;;  %v2600_v37 = vadd.f32 %v2568_v52, %v5628_v47  ;;  %v2663_v0 = vmax.f32 %v2631_v32, 0.0  ;;  %v2574_v33 = vmul.f32 %v5804_v34, %v2485_v41 }
 0x2d9   : > { %v2640_v49 = vadd.f32 %v5824_v44, %v2602_v1  ;;  %v2572_v12 = vmul.f32 %v5804_v34, %v2475_v4  ;;  %v3160_v56 = vrot.slane %v3159_v17, 1  ;;  %v3166_v2 = vmax.f32 %v3164_v61, %v3165_v6 }
 0x2da   : > { %v2666_v20 = vmax.f32 %v2634_v50, 0.0  ;;  %v2638_v54 = vadd.f32 %v5824_v44, %v2600_v37  ;;  %v5913_v10 = vmax.f32 %v3171_v22, %v3172_v58  ;;  %v2606_v24 = vadd.f32 %v2574_v33, %v5688_v8 }
 0x2db   : > { %v2672_v35 = vmax.f32 %v2640_v49, 0.0  ;;  %v2704_v31 = vsel %vm2690_vm3, %v2668_v48, -inf  ;;  %v2604_v18 = vadd.f32 %v2572_v12, %v5668_v63  ;;  %v5924_v61 = vsel %vm2690_vm3, %v2663_v0, -inf  ;;  %v2505_v48 = vpop.permute.xlu0 %2504 }
 0x2dc   : > { %v2703_v47 = vsel %vm2690_vm3, %v2666_v20, -inf  ;;  %v2670_v42 = vmax.f32 %v2638_v54, 0.0  ;;  %v2644_v13 = vadd.f32 %v5824_v44, %v2606_v24  ;;  %v3154_v15 = vmax.f32 %v3152_v28, %v3153_v57 }
 0x2dd   : > { %v2705_v26 = vmax.f32 %v2703_v47, %v2704_v31  ;;  %v2710_v40 = vsel %vm2690_vm3, %v2672_v35, -inf  ;;  %v2642_v55 = vadd.f32 %v5824_v44, %v2604_v18  ;;  %v3161_v11 = vmax.f32 %v3159_v17, %v3160_v56 }
 0x2de   : > { %v2709_v19 = vsel %vm2690_vm3, %v2670_v42, -inf  ;;  %v3167_v21 = vrot.slane %v3166_v2, 1  ;;  %v3174_v63 = vrot.slane %v5913_v10, 1  ;;  %v2676_v58 = vmax.f32 %v2644_v13, 0.0 }
 0x2df   : > { %v2823_v8 = vcombine.high %v2705_v26, %v2705_v26  ;;  %v2830_v22 = vrot.slane %v2705_v26, %v5846_v5  ;;  %v2711_v39 = vmax.f32 %v2709_v19, %v2710_v40  ;;  %v2674_v4 = vmax.f32 %v2642_v55, 0.0  ;;  %v2495_v19 = vpop.permute.xlu1 %2494 }
 0x2e1   : > { %v2837_v32 = vrot.slane %v2823_v8, %v5846_v5  ;;  %v2838_v59 = vcombine.high %v2830_v22, %v2830_v22  ;;  %v3204_v1 = vsel %vm3091_vm4, %v2830_v22, -inf  ;;  %v2857_v52 = vcombine.high %v2711_v39, %v2711_v39 }
 0x2e2   : > { %v3205_v41 = vrot.slane %v3204_v1, 4  ;;  %v2864_v6 = vrot.slane %v2711_v39, %v5846_v5  ;;  %v2525_v39 = vpop.permute.xlu0 %2524 }
 0x2e3   : > { %v2839_v50 = vcombine.high %v2837_v32, %v2837_v32  ;;  %v3211_v49 = vsel %vm3091_vm4, %v2838_v59, -inf  ;;  %v3218_v28 = vsel %vm3091_vm4, %v2837_v32, -inf  ;;  %v2871_v17 = vrot.slane %v2857_v52, %v5846_v5 }
 0x2e4   : > { %v3206_v37 = vmax.f32 %v3204_v1, %v3205_v41  ;;  %v3212_v57 = vrot.slane %v3211_v49, 4  ;;  %v3219_v0 = vrot.slane %v3218_v28, 4  ;;  %v2872_v33 = vcombine.high %v2864_v6, %v2864_v6 }
 0x2e5   : > { %v3225_v20 = vsel %vm3091_vm4, %v2839_v50, -inf  ;;  %v2873_v35 = vcombine.high %v2871_v17, %v2871_v17  ;;  %v3260_v54 = vsel %vm3091_vm4, %v2864_v6, -inf  ;;  %v3274_v12 = vsel %vm3091_vm4, %v2871_v17, -inf }
 0x2e6   : > { %v3207_v56 = vrot.slane %v3206_v37, 2  ;;  %v3213_v24 = vmax.f32 %v3211_v49, %v3212_v57  ;;  %v3220_v31 = vmax.f32 %v3218_v28, %v3219_v0  ;;  %v3226_v47 = vrot.slane %v3225_v20, 4 }
 0x2e7   : > { %v3261_v42 = vrot.slane %v3260_v54, 4  ;;  %v3267_v18 = vsel %vm3091_vm4, %v2872_v33, -inf  ;;  %v3275_v26 = vrot.slane %v3274_v12, 4  ;;  %v3281_v40 = vsel %vm3091_vm4, %v2873_v35, -inf }
 0x2e8   : > { %v3208_v13 = vmax.f32 %v3206_v37, %v3207_v56  ;;  %v3214_v55 = vrot.slane %v3213_v24, 2  ;;  %v3221_v8 = vrot.slane %v3220_v31, 2  ;;  %v3227_v22 = vmax.f32 %v3225_v20, %v3226_v47 }
 0x2e9   : > { %v3262_v32 = vmax.f32 %v3260_v54, %v3261_v42  ;;  %v3268_v59 = vrot.slane %v3267_v18, 4  ;;  %v3276_v1 = vmax.f32 %v3274_v12, %v3275_v26  ;;  %v3282_v52 = vrot.slane %v3281_v40, 4 }
 0x2ea   : > { %v5939_v41 = vmax.f32 %v3166_v2, %v3167_v21  ;;  %v3215_v6 = vmax.f32 %v3213_v24, %v3214_v55  ;;  %v2578_v50 = vmul.f32 %v5804_v34, %v2505_v48  ;;  %v2576_v49 = vmul.f32 %v5804_v34, %v2495_v19 }
 0x2eb   : > { %v3263_v28 = vrot.slane %v3262_v32, 2  ;;  %v3269_v17 = vmax.f32 %v3267_v18, %v3268_v59  ;;  %v2715_v57 = vsel %vm2690_vm3, %v2674_v4, -inf  ;;  %v2582_v37 = vmul.f32 %v5804_v34, %v2525_v39 }
 0x2ec   : > { %v3209_v0 = vrot.slane %v3208_v13, 1  ;;  %v3222_v33 = vmax.f32 %v3220_v31, %v3221_v8  ;;  %v3277_v20 = vrot.slane %v3276_v1, 2  ;;  %v2716_v35 = vsel %vm2690_vm3, %v2676_v58, -inf }
 0x2ed   : > { %v3216_v54 = vrot.slane %v3215_v6, 1  ;;  %v3228_v12 = vrot.slane %v3227_v22, 2  ;;  %v3270_v2 = vrot.slane %v3269_v17, 2  ;;  %v3283_v21 = vmax.f32 %v3281_v40, %v3282_v52 }
 0x2ee   : > { %v5947_v56 = vmax.f32 %v5913_v10, %v3174_v63  ;;  %v3618_v48 = vsel %vm3604_vm5, %v3161_v11, %v3154_v15  ;;  %v2717_v24 = vmax.f32 %v2715_v57, %v2716_v35  ;;  %v2610_v47 = vadd.f32 %v2578_v50, %v5728_v45 }
 0x2ef   : > { %v3264_v4 = vmax.f32 %v3262_v32, %v3263_v28  ;;  %v3271_v42 = vmax.f32 %v3269_v17, %v3270_v2  ;;  %v2608_v18 = vadd.f32 %v2576_v49, %v5708_v60  ;;  %v2614_v31 = vadd.f32 %v2582_v37, %v5768_v14  ;;  %v2515_v17 = vpop.permute.xlu1 %2514 }
 0x2f0   : > { %v3210_v26 = vmax.f32 %v3208_v13, %v3209_v0  ;;  %v3278_v58 = vmax.f32 %v3276_v1, %v3277_v20  ;;  %v2891_v19 = vcombine.high %v2717_v24, %v2717_v24  ;;  %v2898_v55 = vrot.slane %v2717_v24, %v5846_v5 }
 0x2f1   : > { %v3217_v40 = vmax.f32 %v3215_v6, %v3216_v54  ;;  %v3223_v8 = vrot.slane %v3222_v33, 1  ;;  %v3229_v10 = vmax.f32 %v3227_v22, %v3228_v12  ;;  %v3284_v63 = vrot.slane %v3283_v21, 2 }
 0x2f2   : > { %v3272_v39 = vrot.slane %v3271_v42, 1  ;;  %v2905_v15 = vrot.slane %v2891_v19, %v5846_v5  ;;  %v2906_v11 = vcombine.high %v2898_v55, %v2898_v55  ;;  %v3316_v45 = vsel %vm3091_vm4, %v2898_v55, -inf }
 0x2f3   : > { %v3265_v32 = vrot.slane %v3264_v4, 1  ;;  %v3317_v59 = vrot.slane %v3316_v45, 4  ;;  %v2648_v60 = vadd.f32 %v5824_v44, %v2610_v47  ;;  %v2646_v14 = vadd.f32 %v5824_v44, %v2608_v18 }
 0x2f4   : > { %v3279_v13 = vrot.slane %v3278_v58, 1  ;;  %v2907_v1 = vcombine.high %v2905_v15, %v2905_v15  ;;  %v3323_v52 = vsel %vm3091_vm4, %v2906_v11, -inf  ;;  %v3330_v6 = vsel %vm3091_vm4, %v2905_v15, -inf }
 0x2f5   : > { %v3224_v22 = vmax.f32 %v3222_v33, %v3223_v8  ;;  %v3285_v50 = vmax.f32 %v3283_v21, %v3284_v63  ;;  %v3318_v49 = vmax.f32 %v3316_v45, %v3317_v59  ;;  %v3324_v28 = vrot.slane %v3323_v52, 4 }
 0x2f6   : > { %v3230_v57 = vrot.slane %v3229_v10, 1  ;;  %v3273_v37 = vmax.f32 %v3271_v42, %v3272_v39  ;;  %v2680_v0 = vmax.f32 %v2648_v60, 0.0  ;;  %v2678_v20 = vmax.f32 %v2646_v14, 0.0 }
 0x2f7   : > { %v3625_v35 = vsel %vm3604_vm5, %v3217_v40, %v3210_v26  ;;  %v3266_v54 = vmax.f32 %v3264_v4, %v3265_v32  ;;  %v3319_v12 = vrot.slane %v3318_v49, 2  ;;  %v3331_v2 = vrot.slane %v3330_v6, 4 }
 0x2f8   : > { %v3280_v24 = vmax.f32 %v3278_v58, %v3279_v13  ;;  %v3337_v47 = vsel %vm3091_vm4, %v2907_v1, -inf  ;;  %v2721_v18 = vsel %vm2690_vm3, %v2678_v20, -inf  ;;  %v2580_v33 = vmul.f32 %v5804_v34, %v2515_v17 }
 0x2f9   : > { %v3286_v21 = vrot.slane %v3285_v50, 1  ;;  %v3325_v19 = vmax.f32 %v3323_v52, %v3324_v28  ;;  %v2722_v55 = vsel %vm2690_vm3, %v2680_v0, -inf  ;;  %v2652_v42 = vadd.f32 %v5824_v44, %v2614_v31 }
 0x2fa   : > { %v5968_v8 = vsel %vm3606_vm6, %v5939_v41, %v3618_v48  ;;  %v3632_v4 = vsel %vm3604_vm5, %v3273_v37, %v3266_v54  ;;  %v2723_v26 = vmax.f32 %v2721_v18, %v2722_v55  ;;  %v2612_v58 = vadd.f32 %v2580_v33, %v5748_v23 }
 0x2fb   : > { %v5972_v40 = vmax.f32 %v3229_v10, %v3230_v57  ;;  %v3320_v63 = vmax.f32 %v3318_v49, %v3319_v12  ;;  %v3332_v39 = vmax.f32 %v3330_v6, %v3331_v2  ;;  %v3338_v15 = vrot.slane %v3337_v47, 4  ;;  %v2545_v49 = vpop.permute.xlu0 %2544 }
 0x2fc   : > { %v5975_v11 = vsel %vm3606_vm6, %v3224_v22, %v3625_v35  ;;  %v2925_v45 = vcombine.high %v2723_v26, %v2723_v26  ;;  %v2932_v31 = vrot.slane %v2723_v26, %v5846_v5  ;;  %v2650_v32 = vadd.f32 %v5824_v44, %v2612_v58 }
 0x2fd   : > { %v5979_v41 = vmax.f32 %v3285_v50, %v3286_v21  ;;  %v5982_v48 = vsel %vm3606_vm6, %v3280_v24, %v3632_v4  ;;  %v3326_v59 = vrot.slane %v3325_v19, 2  ;;  %v2684_v23 = vmax.f32 %v2652_v42, 0.0 }
 0x2fe   : > { %v2939_v10 = vrot.slane %v2925_v45, %v5846_v5  ;;  %v2940_v60 = vcombine.high %v2932_v31, %v2932_v31  ;;  %v3372_v14 = vsel %vm3091_vm4, %v2932_v31, -inf  ;;  %v2682_v13 = vmax.f32 %v2650_v32, 0.0 }
 0x2ff   : > { %v3321_v1 = vrot.slane %v3320_v63, 1  ;;  %v3333_v52 = vrot.slane %v3332_v39, 2  ;;  %v3339_v6 = vmax.f32 %v3337_v47, %v3338_v15  ;;  %v3373_v22 = vrot.slane %v3372_v14, 4 }
 0x300   : > { %v2941_v28 = vcombine.high %v2939_v10, %v2939_v10  ;;  %v3379_v50 = vsel %vm3091_vm4, %v2940_v60, -inf  ;;  %v3386_v17 = vsel %vm3091_vm4, %v2939_v10, -inf  ;;  %v2727_v57 = vsel %vm2690_vm3, %v2682_v13, -inf  ;;  %v2535_v10 = vpop.permute.xlu1 %2534 }
 0x301   : > { %v3327_v37 = vmax.f32 %v3325_v19, %v3326_v59  ;;  %v3374_v0 = vmax.f32 %v3372_v14, %v3373_v22  ;;  %v3380_v20 = vrot.slane %v3379_v50, 4  ;;  %v2728_v35 = vsel %vm2690_vm3, %v2684_v23, -inf }
 0x302   : > { %v3387_v54 = vrot.slane %v3386_v17, 4  ;;  %v3393_v12 = vsel %vm3091_vm4, %v2941_v28, -inf  ;;  %v2729_v2 = vmax.f32 %v2727_v57, %v2728_v35  ;;  %v2586_v24 = vmul.f32 %v5804_v34, %v2545_v49 }
 0x303   : > { %v3334_v47 = vmax.f32 %v3332_v39, %v3333_v52  ;;  %v3340_v18 = vrot.slane %v3339_v6, 2  ;;  %v3381_v33 = vmax.f32 %v3379_v50, %v3380_v20  ;;  %v3394_v21 = vrot.slane %v3393_v12, 4 }
 0x304   : > { %v3322_v55 = vmax.f32 %v3320_v63, %v3321_v1  ;;  %v3388_v42 = vmax.f32 %v3386_v17, %v3387_v54  ;;  %v2959_v4 = vcombine.high %v2729_v2, %v2729_v2  ;;  %v2966_v26 = vrot.slane %v2729_v2, %v5846_v5 }
 0x305   : > { %v3328_v19 = vrot.slane %v3327_v37, 1  ;;  %v3375_v58 = vrot.slane %v3374_v0, 2  ;;  %v3382_v15 = vrot.slane %v3381_v33, 2  ;;  %v3395_v45 = vmax.f32 %v3393_v12, %v3394_v21 }
 0x306   : > { %v3389_v31 = vrot.slane %v3388_v42, 2  ;;  %v2973_v32 = vrot.slane %v2959_v4, %v5846_v5  ;;  %v2974_v59 = vcombine.high %v2966_v26, %v2966_v26  ;;  %v3428_v23 = vsel %vm3091_vm4, %v2966_v26, -inf }
 0x307   : > { %v3335_v39 = vrot.slane %v3334_v47, 1  ;;  %v3383_v60 = vmax.f32 %v3381_v33, %v3382_v15  ;;  %v3429_v14 = vrot.slane %v3428_v23, 4  ;;  %v2618_v63 = vadd.f32 %v2586_v24, %v5809_v29  ;;  %v2440_v15 = vpop.permute.xlu0 %2439 }
 0x308   : > { %v3396_v13 = vrot.slane %v3395_v45, 2  ;;  %v2975_v1 = vcombine.high %v2973_v32, %v2973_v32  ;;  %v3435_v52 = vsel %vm3091_vm4, %v2974_v59, -inf  ;;  %v3442_v22 = vsel %vm3091_vm4, %v2973_v32, -inf }
 0x309   : > { %v3329_v49 = vmax.f32 %v3327_v37, %v3328_v19  ;;  %v3341_v28 = vmax.f32 %v3339_v6, %v3340_v18  ;;  %v3376_v50 = vmax.f32 %v3374_v0, %v3375_v58  ;;  %v3430_v17 = vmax.f32 %v3428_v23, %v3429_v14  ;;  %v2430_v37 = vpop.permute.xlu1 %2429 }
 0x30a   : > { %v3390_v57 = vmax.f32 %v3388_v42, %v3389_v31  ;;  %v3436_v20 = vrot.slane %v3435_v52, 4  ;;  %v3443_v35 = vrot.slane %v3442_v22, 4  ;;  %v3449_v54 = vsel %vm3091_vm4, %v2975_v1, -inf }
 0x30b   : > { %v3384_v12 = vrot.slane %v3383_v60, 1  ;;  %v3431_v2 = vrot.slane %v3430_v17, 2  ;;  %v3450_v33 = vrot.slane %v3449_v54, 4  ;;  %v2584_v29 = vmul.f32 %v5804_v34, %v2535_v10 }
 0x30c   : > { %v3397_v24 = vmax.f32 %v3395_v45, %v3396_v13  ;;  %v3437_v21 = vmax.f32 %v3435_v52, %v3436_v20  ;;  %v3444_v4 = vmax.f32 %v3442_v22, %v3443_v35  ;;  %v2656_v26 = vadd.f32 %v5824_v44, %v2618_v63 }
 0x30d   : > { %v3336_v6 = vmax.f32 %v3334_v47, %v3335_v39  ;;  %v3342_v0 = vrot.slane %v3341_v28, 1  ;;  %v3377_v18 = vrot.slane %v3376_v50, 1  ;;  %v3451_v42 = vmax.f32 %v3449_v54, %v3450_v33 }
 0x30e   : > { %v3639_v19 = vsel %vm3604_vm5, %v3329_v49, %v3322_v55  ;;  %v3391_v58 = vrot.slane %v3390_v57, 1  ;;  %v3438_v31 = vrot.slane %v3437_v21, 2  ;;  %v3445_v32 = vrot.slane %v3444_v4, 2 }
 0x30f   : > { %v3385_v59 = vmax.f32 %v3383_v60, %v3384_v12  ;;  %v3432_v23 = vmax.f32 %v3430_v17, %v3431_v2  ;;  %v2616_v10 = vadd.f32 %v2584_v29, %v5787_v43  ;;  %v2565_v45 = vmul.f32 %v5804_v34, %v2440_v15  ;;  %v2450_v17 = vpop.permute.xlu1 %2449 }
 0x310   : > { %v3398_v14 = vrot.slane %v3397_v24, 1  ;;  %v3439_v13 = vmax.f32 %v3437_v21, %v3438_v31  ;;  %v2688_v63 = vmax.f32 %v2656_v26, 0.0  ;;  %v2563_v1 = vmul.f32 %v5804_v34, %v2430_v37 }
 0x311   : > { %v3378_v47 = vmax.f32 %v3376_v50, %v3377_v18  ;;  %v3446_v39 = vmax.f32 %v3444_v4, %v3445_v32  ;;  %v3452_v52 = vrot.slane %v3451_v42, 2  ;;  %v2654_v22 = vadd.f32 %v5824_v44, %v2616_v10  ;;  %v2460_v50 = vpop.permute.xlu0 %2459 }
 0x312   : > { %v6006_v55 = vmax.f32 %v3341_v28, %v3342_v0  ;;  %v6009_v49 = vsel %vm3606_vm6, %v3336_v6, %v3639_v19  ;;  %v3392_v60 = vmax.f32 %v3390_v57, %v3391_v58  ;;  %v2595_v43 = vadd.f32 %v2563_v1, %v5598_v9 }
 0x313   : > { %v3646_v20 = vsel %vm3604_vm5, %v3385_v59, %v3378_v47  ;;  %v3433_v35 = vrot.slane %v3432_v23, 1  ;;  %v2686_v54 = vmax.f32 %v2654_v22, 0.0  ;;  %v2597_v12 = vadd.f32 %v2565_v45, %v5618_v30 }
 0x314   : > { %v6014_v2 = vmax.f32 %v3397_v24, %v3398_v14  ;;  %v3440_v33 = vrot.slane %v3439_v13, 1  ;;  %v2734_v28 = vsel %vm2690_vm3, %v2688_v63, -inf  ;;  %v2633_v29 = vadd.f32 %v5824_v44, %v2595_v43 }
 0x315   : > { %v3447_v21 = vrot.slane %v3446_v39, 1  ;;  %v3453_v4 = vmax.f32 %v3451_v42, %v3452_v52  ;;  %v2733_v57 = vsel %vm2690_vm3, %v2686_v54, -inf  ;;  %v2567_v9 = vmul.f32 %v5804_v34, %v2450_v17 }
 0x316   : > { %v6021_v26 = vsel %vm3606_vm6, %v3392_v60, %v3646_v20  ;;  %v2735_v15 = vmax.f32 %v2733_v57, %v2734_v28  ;;  %v2665_v37 = vmax.f32 %v2633_v29, 0.0  ;;  %v2569_v30 = vmul.f32 %v5804_v34, %v2460_v50 }
 0x317   : > { %v3434_v24 = vmax.f32 %v3432_v23, %v3433_v35  ;;  %v2635_v6 = vadd.f32 %v5824_v44, %v2597_v12  ;;  %v6028_v0 = vsel %vm3608_vm7, %v5947_v56, %v5968_v8  ;;  %v2599_v18 = vadd.f32 %v2567_v9, %v5638_v3 }
 0x318   : > { %v3441_v42 = vmax.f32 %v3439_v13, %v3440_v33  ;;  %v2993_v19 = vcombine.high %v2735_v15, %v2735_v15  ;;  %v3000_v58 = vrot.slane %v2735_v15, %v5846_v5  ;;  %v2701_v31 = vsel %vm2690_vm3, %v2665_v37, -inf }
 0x319   : > { %v3448_v32 = vmax.f32 %v3446_v39, %v3447_v21  ;;  %v3454_v59 = vrot.slane %v3453_v4, 1  ;;  %v2702_v10 = vmax.f32 %v5924_v61, %v2701_v31  ;;  %v6037_v23 = vsel %vm3608_vm7, %v5972_v40, %v5975_v11  ;;  %v2480_v39 = vpop.permute.xlu0 %2479 }
 0x31a   : > { %v3007_v56 = vrot.slane %v2993_v19, %v5846_v5  ;;  %v3008_v8 = vcombine.high %v3000_v58, %v3000_v58  ;;  %v3484_v3 = vsel %vm3091_vm4, %v3000_v58, -inf  ;;  %v2601_v45 = vadd.f32 %v2569_v30, %v5658_v7 }
 0x31b   : > { %v3485_v14 = vrot.slane %v3484_v3, 4  ;;  %v2806_v13 = vcombine.high %v2702_v10, %v2702_v10  ;;  %v2813_v63 = vrot.slane %v2702_v10, %v5846_v5  ;;  %v2637_v1 = vadd.f32 %v5824_v44, %v2599_v18 }
 0x31c   : > { %v3653_v61 = vsel %vm3604_vm5, %v3441_v42, %v3434_v24  ;;  %v3491_v47 = vsel %vm3091_vm4, %v3008_v8, -inf  ;;  %v3498_v40 = vsel %vm3091_vm4, %v3007_v56, -inf  ;;  %v2667_v11 = vmax.f32 %v2635_v6, 0.0 }
 0x31d   : > { %v3009_v52 = vcombine.high %v3007_v56, %v3007_v56  ;;  %v3486_v22 = vmax.f32 %v3484_v3, %v3485_v14  ;;  %v3492_v60 = vrot.slane %v3491_v47, 4  ;;  %v2820_v43 = vrot.slane %v2806_v13, %v5846_v5 }
 0x31e   : > { %v6048_v7 = vmax.f32 %v3453_v4, %v3454_v59  ;;  %v2821_v17 = vcombine.high %v2813_v63, %v2813_v63  ;;  %v3176_v20 = vsel %vm3091_vm4, %v2813_v63, -inf  ;;  %v2639_v35 = vadd.f32 %v5824_v44, %v2601_v45 }
 0x31f   : > { %v6053_v54 = vsel %vm3606_vm6, %v3448_v32, %v3653_v61  ;;  %v3499_v12 = vrot.slane %v3498_v40, 4  ;;  %v2669_v50 = vmax.f32 %v2637_v1, 0.0  ;;  %v2573_v33 = vmul.f32 %v5804_v34, %v2480_v39 }
 0x320   : > { %v2822_v28 = vcombine.high %v2820_v43, %v2820_v43  ;;  %v3177_v29 = vrot.slane %v3176_v20, 4  ;;  %v3183_v21 = vsel %vm3091_vm4, %v2821_v17, -inf  ;;  %v3190_v57 = vsel %vm3091_vm4, %v2820_v43, -inf }
 0x321   : > { %v3487_v4 = vrot.slane %v3486_v22, 2  ;;  %v3493_v9 = vmax.f32 %v3491_v47, %v3492_v60  ;;  %v3505_v15 = vsel %vm3091_vm4, %v3009_v52, -inf  ;;  %v2706_v37 = vsel %vm2690_vm3, %v2667_v11, -inf }
 0x322   : > { %v3178_v30 = vmax.f32 %v3176_v20, %v3177_v29  ;;  %v3184_v24 = vrot.slane %v3183_v21, 4  ;;  %v3191_v6 = vrot.slane %v3190_v57, 4  ;;  %v3197_v18 = vsel %vm3091_vm4, %v2822_v28, -inf }
 0x323   : > { %v3500_v42 = vmax.f32 %v3498_v40, %v3499_v12  ;;  %v2671_v19 = vmax.f32 %v2639_v35, 0.0  ;;  %v2707_v34 = vsel %vm2690_vm3, %v2669_v50, -inf  ;;  %v2605_v58 = vadd.f32 %v2573_v33, %v5698_v25  ;;  %v2470_v50 = vpop.permute.xlu1 %2469 }
 0x324   : > { %v3179_v31 = vrot.slane %v3178_v30, 2  ;;  %v3185_v32 = vmax.f32 %v3183_v21, %v3184_v24  ;;  %v3192_v59 = vmax.f32 %v3190_v57, %v3191_v6  ;;  %v3198_v10 = vrot.slane %v3197_v18, 4 }
 0x325   : > { %v3488_v56 = vmax.f32 %v3486_v22, %v3487_v4  ;;  %v3494_v8 = vrot.slane %v3493_v9, 2  ;;  %v3506_v3 = vrot.slane %v3505_v15, 4  ;;  %v6066_v45 = vsel %vm3608_vm7, %v5979_v41, %v5982_v48 }
 0x326   : > { %v3180_v14 = vmax.f32 %v3178_v30, %v3179_v31  ;;  %v3186_v13 = vrot.slane %v3185_v32, 2  ;;  %v3193_v63 = vrot.slane %v3192_v59, 2  ;;  %v3199_v1 = vmax.f32 %v3197_v18, %v3198_v10 }
 0x327   : > { %v3501_v61 = vrot.slane %v3500_v42, 2  ;;  %v6069_v47 = vsel %vm2690_vm3, %v2671_v19, -inf  ;;  %v2708_v25 = vmax.f32 %v2706_v37, %v2707_v34  ;;  %v6072_v40 = vadd.f32 %v5824_v44, %v2605_v58  ;;  %v2500_v58 = vpop.permute.xlu0 %2499 }
 0x328   : > { %v3181_v11 = vrot.slane %v3180_v14, 1  ;;  %v3187_v39 = vmax.f32 %v3185_v32, %v3186_v13  ;;  %v3194_v52 = vmax.f32 %v3192_v59, %v3193_v63  ;;  %v3200_v22 = vrot.slane %v3199_v1, 2  ;;  %v2490_v13 = vpop.permute.xlu1 %2489 }
 0x329   : > { %v3489_v60 = vrot.slane %v3488_v56, 1  ;;  %v3507_v43 = vmax.f32 %v3505_v15, %v3506_v3  ;;  %v2840_v41 = vcombine.high %v2708_v25, %v2708_v25  ;;  %v2847_v48 = vrot.slane %v2708_v25, %v5846_v5  ;;  %v6092_v25 = vld [vmem:[%s6311_s1 + $0x8] ss:$0 sm:$0xff] }
 0x32a   : > { %v6075_v17 = vmax.f32 %v3493_v9, %v3494_v8  ;;  %v3182_v20 = vmax.f32 %v3180_v14, %v3181_v11  ;;  %v3188_v35 = vrot.slane %v3187_v39, 1  ;;  %v3195_v12 = vrot.slane %v3194_v52, 1 }
 0x32b   : > { %v3201_v33 = vmax.f32 %v3199_v1, %v3200_v22  ;;  %v2854_v28 = vrot.slane %v2840_v41, %v5846_v5  ;;  %v2855_v44 = vcombine.high %v2847_v48, %v2847_v48  ;;  %v3232_v29 = vsel %vm3091_vm4, %v2847_v48, -inf }
 0x32c   : > { %v3189_v21 = vmax.f32 %v3187_v39, %v3188_v35  ;;  %v3196_v57 = vmax.f32 %v3194_v52, %v3195_v12  ;;  %v3621_v4 = vsel %vm3610_vm8, %v3182_v20, %v6028_v0  ;;  %v3233_v15 = vrot.slane %v3232_v29, 4 }
 0x32d   : > { %v3202_v37 = vrot.slane %v3201_v33, 1  ;;  %v2856_v30 = vcombine.high %v2854_v28, %v2854_v28  ;;  %v3239_v9 = vsel %vm3091_vm4, %v2855_v44, -inf  ;;  %v3246_v24 = vsel %vm3091_vm4, %v2854_v28, -inf }
 0x32e   : > { %v3622_v6 = vsel %vm3612_vm9, %v3189_v21, %v3621_v4  ;;  %v3234_v18 = vmax.f32 %v3232_v29, %v3233_v15  ;;  %v3240_v19 = vrot.slane %v3239_v9, 4  ;;  %v3247_v34 = vrot.slane %v3246_v24, 4  ;;  %v6107_v29 = vld [vmem:[%s6312_s2] ss:$0 sm:$0xff] }
 0x32f   : > { %v6084_v31 = vmax.f32 %v3500_v42, %v3501_v61  ;;  %v3203_v32 = vmax.f32 %v3201_v33, %v3202_v37  ;;  %v3623_v59 = vsel %vm3614_vm10, %v3196_v57, %v3622_v6  ;;  %v3253_v0 = vsel %vm3091_vm4, %v2856_v30, -inf  ;;  %v2520_v37 = vpop.permute.xlu0 %2519 }
 0x330   : > { %v3235_v10 = vrot.slane %v3234_v18, 2  ;;  %v3241_v8 = vmax.f32 %v3239_v9, %v3240_v19  ;;  %v3248_v3 = vmax.f32 %v3246_v24, %v3247_v34  ;;  %v3254_v14 = vrot.slane %v3253_v0, 4 }
 0x331   : > { %v3508_v63 = vrot.slane %v3507_v43, 2  ;;  %v3624_v1 = vsel %vm3616_vm11, %v3203_v32, %v3623_v59  ;;  %v2571_v42 = vmul.f32 %v6092_v25, %v2470_v50  ;;  %v2577_v61 = vmul.f32 %v6092_v25, %v2500_v58  ;;  %v2510_v58 = vpop.permute.xlu1 %2509 }
 0x332   : > { %3676 = vst.msk [vmem:[%s5898_s10 + $0x8] sm:$0xff] %vm2690_vm3, %v3624_v1  ;;  %v3236_v11 = vmax.f32 %v3234_v18, %v3235_v10  ;;  %v3242_v39 = vrot.slane %v3241_v8, 2  ;;  %v3249_v52 = vrot.slane %v3248_v3, 2  ;;  %v3255_v22 = vmax.f32 %v3253_v0, %v3254_v14 }
 0x333   : > { %v6098_v41 = vmax.f32 %v3488_v56, %v3489_v60  ;;  %v3496_v48 = vrot.slane %v6075_v17, 1  ;;  %v2603_v20 = vadd.f32 %v2571_v42, %v5678_v53  ;;  %v2575_v35 = vmul.f32 %v6092_v25, %v2490_v13 }
 0x334   : > { %v3237_v12 = vrot.slane %v3236_v11, 1  ;;  %v3243_v33 = vmax.f32 %v3241_v8, %v3242_v39  ;;  %v3250_v28 = vmax.f32 %v3248_v3, %v3249_v52  ;;  %v3256_v50 = vrot.slane %v3255_v22, 2 }
 0x335   : > { %v3503_v44 = vrot.slane %v6084_v31, 1  ;;  %v2641_v56 = vadd.f32 %v6107_v29, %v2603_v20  ;;  %v2609_v60 = vadd.f32 %v2577_v61, %v5738_v27  ;;  %v2607_v21 = vadd.f32 %v2575_v35, %v5718_v16  ;;  %v2540_v61 = vpop.permute.xlu0 %2539 }
 0x336   : > { %v3238_v53 = vmax.f32 %v3236_v11, %v3237_v12  ;;  %v3244_v57 = vrot.slane %v3243_v33, 1  ;;  %v3251_v4 = vrot.slane %v3250_v28, 1  ;;  %v3257_v15 = vmax.f32 %v3255_v22, %v3256_v50 }
 0x337   : > { %v6112_v30 = vmax.f32 %v3507_v43, %v3508_v63  ;;  %v2675_v9 = vmax.f32 %v6072_v40, 0.0  ;;  %v2673_v24 = vmax.f32 %v2641_v56, 0.0  ;;  %v2645_v6 = vadd.f32 %v6107_v29, %v2607_v21 }
 0x338   : > { %v3245_v18 = vmax.f32 %v3243_v33, %v3244_v57  ;;  %v3252_v19 = vmax.f32 %v3250_v28, %v3251_v4  ;;  %v3258_v34 = vrot.slane %v3257_v15, 1  ;;  %v3628_v27 = vsel %vm3610_vm8, %v3238_v53, %v6037_v23 }
 0x339   : > { %v2713_v16 = vsel %vm2690_vm3, %v2673_v24, -inf  ;;  %v6120_v32 = vadd.f32 %v6107_v29, %v2609_v60  ;;  %v2677_v43 = vmax.f32 %v2645_v6, 0.0  ;;  %v2581_v59 = vmul.f32 %v6092_v25, %v2520_v37 }
 0x33a   : > { %v6124_v40 = vmax.f32 %v6075_v17, %v3496_v48  ;;  %v3259_v0 = vmax.f32 %v3257_v15, %v3258_v34  ;;  %v3629_v10 = vsel %vm3612_vm9, %v3245_v18, %v3628_v27  ;;  %v2714_v8 = vmax.f32 %v6069_v47, %v2713_v16 }
 0x33b   : > { %v3630_v23 = vsel %vm3614_vm10, %v3252_v19, %v3629_v10  ;;  %v2718_v3 = vsel %vm2690_vm3, %v2675_v9, -inf  ;;  %v2719_v14 = vsel %vm2690_vm3, %v2677_v43, -inf  ;;  %v2579_v13 = vmul.f32 %v6092_v25, %v2510_v58 }
 0x33c   : > { %v3631_v63 = vsel %vm3616_vm11, %v3259_v0, %v3630_v23  ;;  %v2874_v1 = vcombine.high %v2714_v8, %v2714_v8  ;;  %v2881_v42 = vrot.slane %v2714_v8, %v5846_v5  ;;  %v2720_v17 = vmax.f32 %v2718_v3, %v2719_v14 }
 0x33d   : > { %3677 = vst.msk [vmem:[%s5898_s10 + $0x10] sm:$0xff] %vm2690_vm3, %v3631_v63  ;;  %v2679_v11 = vmax.f32 %v6120_v32, 0.0  ;;  %v6140_v47 = vsel %vm3608_vm7, %v6006_v55, %v6009_v49  ;;  %v6143_v39 = vadd.f32 %v2581_v59, %v5777_v36  ;;  %v2611_v52 = vadd.f32 %v2579_v13, %v5758_v46 }
 0x33e   : > { %v2888_v22 = vrot.slane %v2874_v1, %v5846_v5  ;;  %v2889_v48 = vcombine.high %v2881_v42, %v2881_v42  ;;  %v3288_v20 = vsel %vm3091_vm4, %v2881_v42, -inf  ;;  %v2908_v35 = vcombine.high %v2720_v17, %v2720_v17 }
 0x33f   : > { %v3289_v12 = vrot.slane %v3288_v20, 4  ;;  %v2915_v33 = vrot.slane %v2720_v17, %v5846_v5  ;;  %v6150_v28 = vadd.f32 %v6107_v29, %v2611_v52  ;;  %v2585_v55 = vmul.f32 %v6092_v25, %v2540_v61 }
 0x340   : > { %v2890_v49 = vcombine.high %v2888_v22, %v2888_v22  ;;  %v3295_v36 = vsel %vm3091_vm4, %v2889_v48, -inf  ;;  %v3302_v50 = vsel %vm3091_vm4, %v2888_v22, -inf  ;;  %v2922_v46 = vrot.slane %v2908_v35, %v5846_v5  ;;  %v2530_v22 = vpop.permute.xlu1 %2529 }
 0x341   : > { %v3290_v56 = vmax.f32 %v3288_v20, %v3289_v12  ;;  %v3296_v60 = vrot.slane %v3295_v36, 4  ;;  %v3303_v21 = vrot.slane %v3302_v50, 4  ;;  %v2923_v53 = vcombine.high %v2915_v33, %v2915_v33 }
 0x342   : > { %v3309_v57 = vsel %vm3091_vm4, %v2890_v49, -inf  ;;  %v2924_v4 = vcombine.high %v2922_v46, %v2922_v46  ;;  %v3344_v15 = vsel %vm3091_vm4, %v2915_v33, -inf  ;;  %v3358_v37 = vsel %vm3091_vm4, %v2922_v46, -inf }
 0x343   : > { %v3291_v9 = vrot.slane %v3290_v56, 2  ;;  %v3297_v24 = vmax.f32 %v3295_v36, %v3296_v60  ;;  %v3304_v6 = vmax.f32 %v3302_v50, %v3303_v21  ;;  %v3310_v18 = vrot.slane %v3309_v57, 4 }
 0x344   : > { %v3345_v19 = vrot.slane %v3344_v15, 4  ;;  %v3351_v34 = vsel %vm3091_vm4, %v2923_v53, -inf  ;;  %v3359_v27 = vrot.slane %v3358_v37, 4  ;;  %v3365_v58 = vsel %vm3091_vm4, %v2924_v4, -inf }
 0x345   : > { %v3292_v16 = vmax.f32 %v3290_v56, %v3291_v9  ;;  %v3298_v43 = vrot.slane %v3297_v24, 2  ;;  %v3305_v59 = vrot.slane %v3304_v6, 2  ;;  %v3311_v0 = vmax.f32 %v3309_v57, %v3310_v18 }
 0x346   : > { %v3346_v10 = vmax.f32 %v3344_v15, %v3345_v19  ;;  %v3352_v8 = vrot.slane %v3351_v34, 4  ;;  %v3360_v23 = vmax.f32 %v3358_v37, %v3359_v27  ;;  %v3366_v3 = vrot.slane %v3365_v58, 4  ;;  %v2550_v27 = vpop.permute.xlu1 %2549 }
 0x347   : > { %v3293_v14 = vrot.slane %v3292_v16, 1  ;;  %v3299_v13 = vmax.f32 %v3297_v24, %v3298_v43  ;;  %v3306_v63 = vmax.f32 %v3304_v6, %v3305_v59  ;;  %v3312_v1 = vrot.slane %v3311_v0, 2 }
 0x348   : > { %v3347_v42 = vrot.slane %v3346_v10, 2  ;;  %v3353_v17 = vmax.f32 %v3351_v34, %v3352_v8  ;;  %v3361_v61 = vrot.slane %v3360_v23, 2  ;;  %v3367_v52 = vmax.f32 %v3365_v58, %v3366_v3 }
 0x349   : > { %v3294_v48 = vmax.f32 %v3292_v16, %v3293_v14  ;;  %v3300_v20 = vrot.slane %v3299_v13, 1  ;;  %v3307_v35 = vrot.slane %v3306_v63, 1  ;;  %v3313_v12 = vmax.f32 %v3311_v0, %v3312_v1 }
 0x34a   : > { %v3348_v33 = vmax.f32 %v3346_v10, %v3347_v42  ;;  %v3354_v49 = vrot.slane %v3353_v17, 2  ;;  %v3362_v36 = vmax.f32 %v3360_v23, %v3361_v61  ;;  %v3368_v50 = vrot.slane %v3367_v52, 2 }
 0x34b   : > { %v3301_v46 = vmax.f32 %v3299_v13, %v3300_v20  ;;  %v3308_v56 = vmax.f32 %v3306_v63, %v3307_v35  ;;  %v3314_v60 = vrot.slane %v3313_v12, 1  ;;  %v3635_v21 = vsel %vm3610_vm8, %v3294_v48, %v6066_v45 }
 0x34c   : > { %v3349_v53 = vrot.slane %v3348_v33, 1  ;;  %v3355_v57 = vmax.f32 %v3353_v17, %v3354_v49  ;;  %v3363_v4 = vrot.slane %v3362_v36, 1  ;;  %v3369_v15 = vmax.f32 %v3367_v52, %v3368_v50 }
 0x34d   : > { %v3315_v37 = vmax.f32 %v3313_v12, %v3314_v60  ;;  %v3636_v9 = vsel %vm3612_vm9, %v3301_v46, %v3635_v21  ;;  %v2681_v24 = vmax.f32 %v6150_v28, 0.0  ;;  %v2617_v6 = vadd.f32 %v2585_v55, %v5816_v38 }
 0x34e   : > { %v3637_v18 = vsel %vm3614_vm10, %v3308_v56, %v3636_v9  ;;  %v2724_v19 = vsel %vm2690_vm3, %v2679_v11, -inf  ;;  %v3350_v34 = vmax.f32 %v3348_v33, %v3349_v53  ;;  %v3356_v45 = vrot.slane %v3355_v57, 1 }
 0x34f   : > { %v3638_v58 = vsel %vm3616_vm11, %v3315_v37, %v3637_v18  ;;  %v3364_v16 = vmax.f32 %v3362_v36, %v3363_v4  ;;  %v3370_v43 = vrot.slane %v3369_v15, 1  ;;  %v2725_v59 = vsel %vm2690_vm3, %v2681_v24, -inf }
 0x350   : > { %3678 = vst.msk [vmem:[%s5898_s10 + $0x18] sm:$0xff] %vm2690_vm3, %v3638_v58  ;;  %v3357_v28 = vmax.f32 %v3355_v57, %v3356_v45  ;;  %v3642_v38 = vsel %vm3610_vm8, %v3350_v34, %v6140_v47  ;;  %v2726_v55 = vmax.f32 %v2724_v19, %v2725_v59  ;;  %v2583_v32 = vmul.f32 %v6092_v25, %v2530_v22 }
 0x351   : > { %v3371_v0 = vmax.f32 %v3369_v15, %v3370_v43  ;;  %v2651_v11 = vadd.f32 %v6107_v29, %v6143_v39  ;;  %v2655_v10 = vadd.f32 %v6107_v29, %v2617_v6  ;;  %v2587_v8 = vmul.f32 %v6092_v25, %v2550_v27 }
 0x352   : > { %v3643_v23 = vsel %vm3612_vm9, %v3357_v28, %v3642_v38  ;;  %v2942_v3 = vcombine.high %v2726_v55, %v2726_v55  ;;  %v2949_v14 = vrot.slane %v2726_v55, %v5846_v5  ;;  %v2615_v13 = vadd.f32 %v2583_v32, %v5796_v51 }
 0x353   : > { %v6187_v47 = vmax.f32 %v6084_v31, %v3503_v44  ;;  %v3510_v63 = vrot.slane %v6112_v30, 1  ;;  %v3644_v39 = vsel %vm3614_vm10, %v3364_v16, %v3643_v23  ;;  %v2619_v1 = vadd.f32 %v2587_v8, %v5832_v62 }
 0x354   : > { %v3645_v25 = vsel %vm3616_vm11, %v3371_v0, %v3644_v39  ;;  %v2956_v42 = vrot.slane %v2942_v3, %v5846_v5  ;;  %v2957_v17 = vcombine.high %v2949_v14, %v2949_v14  ;;  %v3400_v61 = vsel %vm3091_vm4, %v2949_v14, -inf }
 0x355   : > { %3679 = vst.msk [vmem:[%s5898_s10 + $0x20] sm:$0xff] %vm2690_vm3, %v3645_v25  ;;  %v2683_v51 = vmax.f32 %v2651_v11, 0.0  ;;  %v3401_v52 = vrot.slane %v3400_v61, 4  ;;  %v2653_v31 = vadd.f32 %v6107_v29, %v2615_v13  ;;  %v2657_v44 = vadd.f32 %v6107_v29, %v2619_v1 }
 0x356   : > { %v2958_v22 = vcombine.high %v2956_v42, %v2956_v42  ;;  %v3407_v48 = vsel %vm3091_vm4, %v2957_v17, -inf  ;;  %v3414_v62 = vsel %vm3091_vm4, %v2956_v42, -inf  ;;  %v2687_v20 = vmax.f32 %v2655_v10, 0.0 }
 0x357   : > { %v3402_v35 = vmax.f32 %v3400_v61, %v3401_v52  ;;  %v3408_v12 = vrot.slane %v3407_v48, 4  ;;  %v3415_v33 = vrot.slane %v3414_v62, 4  ;;  %v2685_v49 = vmax.f32 %v2653_v31, 0.0 }
 0x358   : > { %v6202_v36 = vmax.f32 %v6112_v30, %v3510_v63  ;;  %v6207_v50 = vsel %vm3604_vm5, %v6124_v40, %v6098_v41  ;;  %v3421_v29 = vsel %vm3091_vm4, %v2958_v22, -inf  ;;  %v2689_v46 = vmax.f32 %v2657_v44, 0.0 }
 0x359   : > { %v3403_v56 = vrot.slane %v3402_v35, 2  ;;  %v3409_v60 = vmax.f32 %v3407_v48, %v3408_v12  ;;  %v3416_v21 = vmax.f32 %v3414_v62, %v3415_v33  ;;  %v3422_v53 = vrot.slane %v3421_v29, 4 }
 0x35a   : > { %v2730_v57 = vsel %vm2690_vm3, %v2683_v51, -inf  ;;  %v2736_v4 = vsel %vm2690_vm3, %v2687_v20, -inf  ;;  %v2731_v15 = vsel %vm2690_vm3, %v2685_v49, -inf  ;;  %v2737_v30 = vsel %vm2690_vm3, %v2689_v46, -inf }
 0x35b   : > { %v3404_v37 = vmax.f32 %v3402_v35, %v3403_v56  ;;  %v3410_v9 = vrot.slane %v3409_v60, 2  ;;  %v3417_v24 = vrot.slane %v3416_v21, 2  ;;  %v3423_v41 = vmax.f32 %v3421_v29, %v3422_v53 }
 0x35c   : > { %v3648_v40 = vsel %vm3608_vm7, %v6014_v2, %v6021_v26  ;;  %v6220_v6 = vsel %vm3608_vm7, %v6048_v7, %v6053_v54  ;;  %v2732_v18 = vmax.f32 %v2730_v57, %v2731_v15  ;;  %v2738_v19 = vmax.f32 %v2736_v4, %v2737_v30 }
 0x35d   : > { %v3405_v34 = vrot.slane %v3404_v37, 1  ;;  %v3411_v45 = vmax.f32 %v3409_v60, %v3410_v9  ;;  %v3418_v27 = vmax.f32 %v3416_v21, %v3417_v24  ;;  %v3424_v58 = vrot.slane %v3423_v41, 2 }
 0x35e   : > { %v2976_v16 = vcombine.high %v2732_v18, %v2732_v18  ;;  %v2983_v43 = vrot.slane %v2732_v18, %v5846_v5  ;;  %v3010_v59 = vcombine.high %v2738_v19, %v2738_v19  ;;  %v3017_v28 = vrot.slane %v2738_v19, %v5846_v5 }
 0x35f   : > { %v3406_v38 = vmax.f32 %v3404_v37, %v3405_v34  ;;  %v3412_v55 = vrot.slane %v3411_v45, 1  ;;  %v3419_v2 = vrot.slane %v3418_v27, 1  ;;  %v3425_v26 = vmax.f32 %v3423_v41, %v3424_v58 }
 0x360   : > { %v2990_v32 = vrot.slane %v2976_v16, %v5846_v5  ;;  %v2991_v7 = vcombine.high %v2983_v43, %v2983_v43  ;;  %v3456_v54 = vsel %vm3091_vm4, %v2983_v43, -inf  ;;  %v3024_v0 = vrot.slane %v3010_v59, %v5846_v5 }
 0x361   : > { %v3413_v11 = vmax.f32 %v3411_v45, %v3412_v55  ;;  %v3420_v10 = vmax.f32 %v3418_v27, %v3419_v2  ;;  %v3426_v8 = vrot.slane %v3425_v26, 1  ;;  %v3649_v23 = vsel %vm3610_vm8, %v3406_v38, %v3648_v40 }
 0x362   : > { %v2992_v3 = vcombine.high %v2990_v32, %v2990_v32  ;;  %v3457_v14 = vrot.slane %v3456_v54, 4  ;;  %v3463_v13 = vsel %vm3091_vm4, %v2991_v7, -inf  ;;  %v3470_v63 = vsel %vm3091_vm4, %v2990_v32, -inf }
 0x363   : > { %v3427_v39 = vmax.f32 %v3425_v26, %v3426_v8  ;;  %v3650_v1 = vsel %vm3612_vm9, %v3413_v11, %v3649_v23  ;;  %v3464_v25 = vrot.slane %v3463_v13, 4  ;;  %v3471_v42 = vrot.slane %v3470_v63, 4 }
 0x364   : > { %v3651_v17 = vsel %vm3614_vm10, %v3420_v10, %v3650_v1  ;;  %v3458_v5 = vmax.f32 %v3456_v54, %v3457_v14  ;;  %v3477_v61 = vsel %vm3091_vm4, %v2992_v3, -inf  ;;  %v3025_v51 = vcombine.high %v3017_v28, %v3017_v28 }
 0x365   : > { %v3652_v52 = vsel %vm3616_vm11, %v3427_v39, %v3651_v17  ;;  %v3465_v31 = vmax.f32 %v3463_v13, %v3464_v25  ;;  %v3472_v44 = vmax.f32 %v3470_v63, %v3471_v42  ;;  %v3478_v22 = vrot.slane %v3477_v61, 4 }
 0x366   : > { %3680 = vst.msk [vmem:[%s5898_s10 + $0x28] sm:$0xff] %vm2690_vm3, %v3652_v52  ;;  %v3459_v48 = vrot.slane %v3458_v5, 2  ;;  %v3026_v62 = vcombine.high %v3024_v0, %v3024_v0  ;;  %v3512_v20 = vsel %vm3091_vm4, %v3017_v28, -inf  ;;  %v3519_v35 = vsel %vm3091_vm4, %v3025_v51, -inf }
 0x367   : > { %v3466_v12 = vrot.slane %v3465_v31, 2  ;;  %v3473_v33 = vrot.slane %v3472_v44, 2  ;;  %v3479_v49 = vmax.f32 %v3477_v61, %v3478_v22  ;;  %v3513_v29 = vrot.slane %v3512_v20, 4 }
 0x368   : > { %v3460_v46 = vmax.f32 %v3458_v5, %v3459_v48  ;;  %v3520_v56 = vrot.slane %v3519_v35, 4  ;;  %v3526_v60 = vsel %vm3091_vm4, %v3024_v0, -inf  ;;  %v3533_v21 = vsel %vm3091_vm4, %v3026_v62, -inf }
 0x369   : > { %v3467_v53 = vmax.f32 %v3465_v31, %v3466_v12  ;;  %v3474_v57 = vmax.f32 %v3472_v44, %v3473_v33  ;;  %v3480_v4 = vrot.slane %v3479_v49, 2  ;;  %v3514_v15 = vmax.f32 %v3512_v20, %v3513_v29 }
 0x36a   : > { %v3461_v30 = vrot.slane %v3460_v46, 1  ;;  %v3521_v37 = vmax.f32 %v3519_v35, %v3520_v56  ;;  %v3527_v9 = vrot.slane %v3526_v60, 4  ;;  %v3534_v24 = vrot.slane %v3533_v21, 4 }
 0x36b   : > { %v3468_v41 = vrot.slane %v3467_v53, 1  ;;  %v3475_v40 = vrot.slane %v3474_v57, 1  ;;  %v3481_v18 = vmax.f32 %v3479_v49, %v3480_v4  ;;  %v3515_v19 = vrot.slane %v3514_v15, 2 }
 0x36c   : > { %v3462_v34 = vmax.f32 %v3460_v46, %v3461_v30  ;;  %v3522_v45 = vrot.slane %v3521_v37, 2  ;;  %v3528_v27 = vmax.f32 %v3526_v60, %v3527_v9  ;;  %v3535_v58 = vmax.f32 %v3533_v21, %v3534_v24 }
 0x36d   : > { %v3469_v16 = vmax.f32 %v3467_v53, %v3468_v41  ;;  %v3476_v43 = vmax.f32 %v3474_v57, %v3475_v40  ;;  %v3482_v59 = vrot.slane %v3481_v18, 1  ;;  %v3516_v28 = vmax.f32 %v3514_v15, %v3515_v19 }
 0x36e   : > { %v3656_v38 = vsel %vm3610_vm8, %v3462_v34, %v6220_v6  ;;  %v3523_v55 = vmax.f32 %v3521_v37, %v3522_v45  ;;  %v3529_v2 = vrot.slane %v3528_v27, 2  ;;  %v3536_v26 = vrot.slane %v3535_v58, 2 }
 0x36f   : > { %v3661_v32 = vsel %vm3606_vm6, %v6187_v47, %v6207_v50  ;;  %v3483_v7 = vmax.f32 %v3481_v18, %v3482_v59  ;;  %v3657_v54 = vsel %vm3612_vm9, %v3469_v16, %v3656_v38  ;;  %v3517_v0 = vrot.slane %v3516_v28, 1 }
 0x370   : > { %v3658_v11 = vsel %vm3614_vm10, %v3476_v43, %v3657_v54  ;;  %v3524_v10 = vrot.slane %v3523_v55, 1  ;;  %v3530_v8 = vmax.f32 %v3528_v27, %v3529_v2  ;;  %v3537_v23 = vmax.f32 %v3535_v58, %v3536_v26 }
 0x371   : > { %v3659_v6 = vsel %vm3616_vm11, %v3483_v7, %v3658_v11  ;;  %v3518_v3 = vmax.f32 %v3516_v28, %v3517_v0  ;;  %v3662_v47 = vsel %vm3608_vm7, %v6202_v36, %v3661_v32 }
 0x372   : > { %3681 = vst.msk [vmem:[%s5898_s10 + $0x30] sm:$0xff] %vm2690_vm3, %v3659_v6  ;;  %v3525_v50 = vmax.f32 %v3523_v55, %v3524_v10  ;;  %v3531_v14 = vrot.slane %v3530_v8, 1  ;;  %v3538_v13 = vrot.slane %v3537_v23, 1 }
 0x373   : > { %v3663_v63 = vsel %vm3610_vm8, %v3518_v3, %v3662_v47 }
 0x374   : > { %v3532_v39 = vmax.f32 %v3530_v8, %v3531_v14  ;;  %v3539_v1 = vmax.f32 %v3537_v23, %v3538_v13  ;;  %v3664_v25 = vsel %vm3612_vm9, %v3525_v50, %v3663_v63 }
 0x376   : > { %v3665_v36 = vsel %vm3614_vm10, %v3532_v39, %v3664_v25 }
 0x377   : > { %v3666_v42 = vsel %vm3616_vm11, %v3539_v1, %v3665_v36 }
 0x378   : > { %3682 = vst.msk [vmem:[%s5898_s10 + $0x38] sm:$0xff] %vm2690_vm3, %v3666_v42 }
 0x379   : > { %3836 = shalt.err (!%p3833_p3)
}
 0x37a   : > { %s3837_s6 = scalar_lea.hbm %s6259_s28, 1024  ;;  %s3841_s9 = scalar_lea.hbm %s6313_s3, 2048 }
 0x37b   : > { %p3838_p4 = scmp.ne.s32.totalorder %s6259_s28, %s3837_s6  ;;  %p3842_p9 = scmp.lt.u32.totalorder %s6259_s28, %s6313_s3 }
 0x37c   : > { %p3843_p10 = scmp.lt.u32.totalorder %s3841_s9, %s3837_s6  ;;  %p3845_p12 = scmp.lt.u32.totalorder %s3837_s6, %s6259_s28 }
 0x37d   : > { %p3839_p7 = pnand %p3838_p4, %p3951_p5 }
 0x37e   : > { %p3844_p11 = por %p3843_p10, %p3842_p9 }
 0x37f   : > { %p3840_p8 = pneg %p3839_p7 }
 0x380   : > { %p3846_p13 = por %p3845_p12, %p3844_p11 }
 0x382   : > { %p3847_p0 = pnand %p3846_p13, %p3840_p8 }
 0x384   : > { %3850 = shalt.err (!%p3847_p0)
}
 0x385   : > { %s3891_s17 = smov 128   ;;  %s3892_s19 = smov 8  }
 0x386   : > { %3775 = dma.vmem_to_hbm [thread:$0]  (%p3951_p5), %s6261_s25, 1024, %s6259_s28, %s6269_s16, %s3891_s17, %s3891_s17, %s3892_s19  }
 0x387 PF: > { %p3781_p1 = scmp.ge.s32.totalorder %s3885_s15, 2  ;;  %s3712_s20 = sand.u32 1, %s3873_s12  }
 0x388   : > { %s3713_s24 = scalar_lea.sflag [#allocation4], %s3712_s20 }
 0x389   : > { %p3778_p2 = pnand %p3781_p1, %p3955_p6 }
 0x38b   : > { %3868 = dma.done.wait (!%p3778_p2), %s3713_s24, 1024  }
 0x38c   : > { %3870 = vsyncadd (!%p3778_p2), %s3713_s24, 4294966272  ;;  %p13_p3 = scmp.ge.s32.totalorder %s3938_s18, 4   ;;  %s6834_s12 = smov %s3877_s13 }
 0x38d   : > { %s6835_s13 = smov %s3881_s14  ;;  %s6836_s14 = smov %s3949_s21 }
 0x38e   : > { %s6837_s15 = smov %s3938_s18  ;;  %15 = sbr.rel (!%p13_p3) target bundleno = 3 (0x3), region = 70 }
 0x395   :  { %3718 = vsyncpa [#allocation4], 1 }
 0x396   :  { %3720 = vsyncpa [#allocation4 + $0x1], 1 }

</bundles_post_ra>
